<compile_context>
chip_gen: v6e
topology: v6e:2x2x1
jax: 0.10.0
libtpu: 0.0.40
codegen_flags: <defaults>
</compile_context>

<pallas_src>
import math
from functools import partial

import jax
import jax.numpy as jnp
from jax.experimental import pallas as pl
from jax.experimental.pallas import tpu as pltpu


def _gelu_exact(x):
    # PyTorch nn.GELU() default = exact erf-based GELU.
    return 0.5 * x * (1.0 + jax.lax.erf(x * (1.0 / math.sqrt(2.0))))


def _decoder_layer_kernel(n_head, d_tensor,
                          dec_q_ref, dec_kv_ref, enc_ref, tmask_ref, smask_ref,
                          wq1, bq1, wk1, bk1, wv1, bv1, wo1, bo1,
                          wq2, bq2, wk2, bk2, wv2, bv2, wo2, bo2,
                          w1, b1, w2, b2,
                          out_ref,
                          k1_sc, v1_sc, k2_sc, v2_sc):
    # One grid step == (one batch element, one query-row tile).
    scale = jnp.float32(1.0 / math.sqrt(d_tensor))

    def linear(x_bf16, w_ref, b_ref):
        # bf16 MXU inputs, f32 accumulation, f32 bias add.
        y = jnp.dot(x_bf16, w_ref[...], preferred_element_type=jnp.float32)
        return y + b_ref[...]

    def split_heads(x_f32):  # (L, D) f32 -> (H, L, d_head) bf16
        L = x_f32.shape[0]
        return jnp.swapaxes(
            x_f32.reshape(L, n_head, d_tensor), 0, 1).astype(jnp.bfloat16)

    # ---- K/V cache fill: once per batch element (first query tile only). ----
    @pl.when(pl.program_id(1) == 0)
    def _fill_kv():
        dec_kv = dec_kv_ref[0]   # (Lq, D) bf16, pre-cast host-side
        enc_kv = enc_ref[0]      # (Lk, D) bf16
        k1_sc[...] = split_heads(linear(dec_kv, wk1, bk1))
        v1_sc[...] = split_heads(linear(dec_kv, wv1, bv1))
        k2_sc[...] = split_heads(linear(enc_kv, wk2, bk2))
        v2_sc[...] = split_heads(linear(enc_kv, wv2, bv2))

    dec_q = dec_q_ref[0]                                  # (TQ, D) f32 (residual path)
    # int8 masks (4x less DMA than f32); widen before compare for safe lowering.
    tmask0 = tmask_ref[0, 0].astype(jnp.int32) == 0       # (TQ, Lq) bool, hoisted
    smask0 = smask_ref[0, 0].astype(jnp.int32) == 0       # (TQ, Lk) bool

    def attention(q_rows, wq, bq, wo, bo, k_sc, v_sc, mask_zero):
        lq = q_rows.shape[0]
        # Fold 1/sqrt(d_head) into Q: O(TQ*D) mul instead of O(H*TQ*Lk).
        q = linear(q_rows.astype(jnp.bfloat16), wq, bq) * scale
        qh = split_heads(q)                                # (H, TQ, dh) bf16
        # All heads in one batched contraction; K consumed in native (H, Lk, dh).
        score = jnp.einsum("hqd,hkd->hqk", qh, k_sc[...],
                           preferred_element_type=jnp.float32)   # (H, TQ, Lk) f32
        # PyTorch: score.masked_fill(mask == 0, -e), e = 1e-9 (faithful).
        score = jnp.where(mask_zero[None, :, :], jnp.float32(-1e-9), score)
        m = jnp.max(score, axis=-1, keepdims=True)
        p = jnp.exp(score - m)                             # single EUP pass (f32 for v5e)
        p = p * pl.reciprocal(jnp.sum(p, axis=-1, keepdims=True), approx=True)
        # Ask the contraction for (q, h, d) output order directly; the reshape then
        # fuses heads back into d_model without an explicit swapaxes copy.
        ctx = jnp.einsum("hqk,hkd->qhd", p.astype(jnp.bfloat16), v_sc[...],
                         preferred_element_type=jnp.float32)     # (TQ, H, dh) f32
        ctx = ctx.reshape(lq, n_head * d_tensor)
        return linear(ctx.astype(jnp.bfloat16), wo, bo)

    # self attention + residual
    attn1 = attention(dec_q, wq1, bq1, wo1, bo1, k1_sc, v1_sc, tmask0)
    add1 = dec_q + attn1
    # encoder-decoder attention + residual
    attn2 = attention(add1, wq2, bq2, wo2, bo2, k2_sc, v2_sc, smask0)
    add2 = add1 + attn2
    # feed-forward (Linear -> exact GELU -> Linear) + residual
    h = _gelu_exact(linear(add2.astype(jnp.bfloat16), w1, b1))
    ffn = linear(h.astype(jnp.bfloat16), w2, b2)
    out_ref[0] = (ffn + add2).astype(out_ref.dtype)


def _nbytes(shape, itemsize):
    n = 1
    for s in shape:
        n *= int(s)
    return n * int(itemsize)


def decoder_layer_pallas(dec, enc, t_mask, s_mask, params, n_head, q_tile=None):
    B, Lq, D = dec.shape
    Lk = enc.shape[1]
    d_tensor = D // n_head
    F = params["ffn1"][0].shape[1]

    # Query tiling: whole sequence if short, else 256-row tiles (MXU-friendly).
    if q_tile is None:
        q_tile = Lq if Lq <= 256 else 256
    assert Lq % q_tile == 0, "Lq must be divisible by the query tile"
    n_qt = Lq // q_tile

    # K/V-side activations pre-cast to bf16 (only consumed on the MXU path).
    dec_kv = dec.astype(jnp.bfloat16)
    enc_kv = enc.astype(jnp.bfloat16)
    # Masks shipped as int8: preserves the exact `mask == 0` set at 1/4 the bytes.
    t_mask_i8 = (t_mask != 0).astype(jnp.int8)
    s_mask_i8 = (s_mask != 0).astype(jnp.int8)

    # Weights pre-cast to bf16 (half the DMA/VMEM); biases stay f32.
    param_order = []
    for name in ("sa_q", "sa_k", "sa_v", "sa_o", "ca_q", "ca_k", "ca_v", "ca_o",
                 "ffn1", "ffn2"):
        w, b = params[name]
        param_order += [w.astype(jnp.bfloat16), b.astype(jnp.float32)]

    # ---- VMEM budget from actual block/scratch/activation sizes, with headroom ----
    block_bytes = (
        2 * _nbytes((1, q_tile, D), 4)              # dec query tile (double buffered)
        + _nbytes((1, Lq, D), 2)                    # dec K/V block (single buffered)
        + _nbytes((1, Lk, D), 2)                    # enc block (single buffered)
        + 2 * _nbytes((1, 1, q_tile, Lq), 1)        # t_mask tile
        + 2 * _nbytes((1, 1, q_tile, Lk), 1)        # s_mask tile
        + 2 * sum(int(p.size) * p.dtype.itemsize for p in param_order)  # weights
        + 2 * _nbytes((1, q_tile, D), 4))           # output tile (double buffered)
    scratch_bytes = 2 * (_nbytes((n_head, Lq, d_tensor), 2)
                         + _nbytes((n_head, Lk, d_tensor), 2))
    act_bytes = (6 * n_head * q_tile * max(Lq, Lk)  # score f32 + probs bf16
                 + 6 * q_tile * F                   # FFN hidden f32 + bf16 cast
                 + 12 * q_tile * D)                 # misc activation temporaries
    try:
        phys_vmem = int(pltpu.get_tpu_info().vmem_capacity_bytes)
    except Exception:
        phys_vmem = 64 * 1024 * 1024                # conservative (v7x = 64 MiB / TC)
    needed = int(1.5 * (block_bytes + scratch_bytes + act_bytes))
    vmem_limit = max(32 * 1024 * 1024, min(needed, int(phys_vmem * 0.75)))

    # Advisory cost estimate (K/V projections counted once per batch element).
    flops = 2 * B * (4 * Lq * D * D                        # self-attn q,k,v,o proj
                     + 2 * Lq * D * D + 2 * Lk * D * D     # cross-attn projections
                     + 2 * Lq * Lq * D + 2 * Lq * Lk * D   # QK^T + PV (both attns)
                     + 2 * Lq * D * F)                     # FFN
    transcendentals = B * (n_head * Lq * (Lq + Lk) + Lq * F)
    bytes_accessed = (4 * B * Lq * D                       # dec f32 (query tiles)
                      + 2 * B * Lq * D + 2 * B * Lk * D    # bf16 K/V inputs
                      + B * Lq * (Lq + Lk)                 # int8 masks
                      + 4 * B * Lq * D                     # output f32
                      + sum(int(p.size) * p.dtype.itemsize for p in param_order))

    def run(single_buffer_invariants):
        # Grid-invariant blocks (and blocks that only change on the outer batch axis)
        # don't need double buffering; Buffered(1) halves their VMEM footprint.
        inv_kw = ({"pipeline_mode": pl.Buffered(1)}
                  if single_buffer_invariants else {})
        in_specs = [
            pl.BlockSpec((1, q_tile, D), lambda b, q: (b, q, 0)),             # dec q tile
            pl.BlockSpec((1, Lq, D), lambda b, q: (b, 0, 0), **inv_kw),       # dec K/V
            pl.BlockSpec((1, Lk, D), lambda b, q: (b, 0, 0), **inv_kw),       # enc K/V
            pl.BlockSpec((1, 1, q_tile, Lq), lambda b, q: (b, 0, q, 0)),      # t_mask
            pl.BlockSpec((1, 1, q_tile, Lk), lambda b, q: (b, 0, q, 0)),      # s_mask
        ]
        for p in param_order:  # constant block index -> fetched exactly once
            in_specs.append(
                pl.BlockSpec(p.shape, lambda b, q, nd=p.ndim: (0,) * nd, **inv_kw))

        return pl.pallas_call(
            partial(_decoder_layer_kernel, n_head, d_tensor),
            out_shape=jax.ShapeDtypeStruct((B, Lq, D), jnp.float32),
            grid_spec=pltpu.PrefetchScalarGridSpec(
                num_scalar_prefetch=0,
                grid=(B, n_qt),
                in_specs=in_specs,
                out_specs=pl.BlockSpec((1, q_tile, D), lambda b, q: (b, q, 0)),
                scratch_shapes=[
                    pltpu.VMEM((n_head, Lq, d_tensor), jnp.bfloat16),  # self K
                    pltpu.VMEM((n_head, Lq, d_tensor), jnp.bfloat16),  # self V
                    pltpu.VMEM((n_head, Lk, d_tensor), jnp.bfloat16),  # cross K
                    pltpu.VMEM((n_head, Lk, d_tensor), jnp.bfloat16),  # cross V
                ]),
            compiler_params=pltpu.CompilerParams(
                # batch axis parallel (feeds v7x's 2 TensorCores); the q axis must be
                # sequential because the K/V scratch is carried across query tiles.
                dimension_semantics=("parallel", "arbitrary"),
                vmem_limit_bytes=vmem_limit,
            ),
            cost_estimate=pl.CostEstimate(flops=flops,
                                          transcendentals=transcendentals,
                                          bytes_accessed=bytes_accessed),
        )(dec, dec_kv, enc_kv, t_mask_i8, s_mask_i8, *param_order)

    try:
        return run(True)
    except Exception:
        # Fallback if this JAX build rejects pipeline_mode=pl.Buffered(1).
        return run(False)


# ---------------- pure-JAX reference (mirrors the PyTorch forward, f32) ----------------
def decoder_layer_ref(dec, enc, t_mask, s_mask, params, n_head):
    def linear(x, wb):
        w, b = wb
        return x @ w + b

    def mha(q_in, k_in, v_in, wq, wk, wv, wo, mask):
        B, Lq, D = q_in.shape
        Lk = k_in.shape[1]
        dt = D // n_head
        q = linear(q_in, wq).reshape(B, Lq, n_head, dt).transpose(0, 2, 1, 3)
        k = linear(k_in, wk).reshape(B, Lk, n_head, dt).transpose(0, 2, 1, 3)
        v = linear(v_in, wv).reshape(B, Lk, n_head, dt).transpose(0, 2, 1, 3)
        score = jnp.einsum("bhqd,bhkd->bhqk", q, k) / math.sqrt(dt)
        score = jnp.where(mask == 0.0, -1e-9, score)
        score = jax.nn.softmax(score, axis=-1)
        out = jnp.einsum("bhqk,bhkd->bhqd", score, v)
        out = out.transpose(0, 2, 1, 3).reshape(B, Lq, D)
        return linear(out, wo)

    attn1 = mha(dec, dec, dec, params["sa_q"], params["sa_k"], params["sa_v"],
                params["sa_o"], t_mask)
    add1 = dec + attn1
    attn2 = mha(add1, enc, enc, params["ca_q"], params["ca_k"], params["ca_v"],
                params["ca_o"], s_mask)
    add2 = add1 + attn2
    h = _gelu_exact(linear(add2, params["ffn1"]))
    ffn = linear(h, params["ffn2"])
    return ffn + add2


def init_params(key, d_model, ffn_hidden):
    def lin(k, din, dout):
        k1, k2 = jax.random.split(k)
        w = jax.random.normal(k1, (din, dout), jnp.float32) * 0.05
        b = jax.random.normal(k2, (1, dout), jnp.float32) * 0.05
        return w, b

    keys = jax.random.split(key, 10)
    names = ["sa_q", "sa_k", "sa_v", "sa_o", "ca_q", "ca_k", "ca_v", "ca_o"]
    params = {n: lin(keys[i], d_model, d_model) for i, n in enumerate(names)}
    params["ffn1"] = lin(keys[8], d_model, ffn_hidden)
    params["ffn2"] = lin(keys[9], ffn_hidden, d_model)
    return params


if __name__ == "__main__":
    B, Lq, Lk, D, H, FFN = 2, 8, 8, 32, 4, 64

    key = jax.random.PRNGKey(0)
    k_dec, k_enc, k_par = jax.random.split(key, 3)
    dec = jax.random.normal(k_dec, (B, Lq, D), jnp.float32)
    enc = jax.random.normal(k_enc, (B, Lk, D), jnp.float32)

    # causal target mask, padding-style source mask
    t_mask = jnp.broadcast_to(jnp.tril(jnp.ones((Lq, Lq), jnp.float32)),
                              (B, 1, Lq, Lq))
    s_mask = jnp.ones((B, 1, Lq, Lk), jnp.float32)
    s_mask = s_mask.at[1, :, :, -1].set(0.0)

    params = init_params(k_par, D, FFN)

    out = decoder_layer_pallas(dec, enc, t_mask, s_mask, params, n_head=H)
    out = jax.block_until_ready(out)

    ref = decoder_layer_ref(dec, enc, t_mask, s_mask, params, n_head=H)
    assert out.shape == (B, Lq, D)
    # Tolerance accounts for bf16 MXU inputs + approx reciprocal (f32 reference).
    assert float(jnp.max(jnp.abs(out - ref))) < 2e-2, "mismatch vs reference"

    print("KERNEL_OK")
</pallas_src>

<mosaic_0001>
module attributes {stable_mosaic.version = 11 : i64} {
  func.func @_decoder_layer_kernel(%arg0: i32, %arg1: i32, %arg2: memref<1x8x32xf32, #tpu.memory_space<vmem>>, %arg3: memref<1x8x32xbf16, #tpu.memory_space<vmem>>, %arg4: memref<1x8x32xbf16, #tpu.memory_space<vmem>>, %arg5: memref<1x1x8x8xi8, #tpu.memory_space<vmem>>, %arg6: memref<1x1x8x8xi8, #tpu.memory_space<vmem>>, %arg7: memref<32x32xbf16, #tpu.memory_space<vmem>>, %arg8: memref<1x32xf32, #tpu.memory_space<vmem>>, %arg9: memref<32x32xbf16, #tpu.memory_space<vmem>>, %arg10: memref<1x32xf32, #tpu.memory_space<vmem>>, %arg11: memref<32x32xbf16, #tpu.memory_space<vmem>>, %arg12: memref<1x32xf32, #tpu.memory_space<vmem>>, %arg13: memref<32x32xbf16, #tpu.memory_space<vmem>>, %arg14: memref<1x32xf32, #tpu.memory_space<vmem>>, %arg15: memref<32x32xbf16, #tpu.memory_space<vmem>>, %arg16: memref<1x32xf32, #tpu.memory_space<vmem>>, %arg17: memref<32x32xbf16, #tpu.memory_space<vmem>>, %arg18: memref<1x32xf32, #tpu.memory_space<vmem>>, %arg19: memref<32x32xbf16, #tpu.memory_space<vmem>>, %arg20: memref<1x32xf32, #tpu.memory_space<vmem>>, %arg21: memref<32x32xbf16, #tpu.memory_space<vmem>>, %arg22: memref<1x32xf32, #tpu.memory_space<vmem>>, %arg23: memref<32x64xbf16, #tpu.memory_space<vmem>>, %arg24: memref<1x64xf32, #tpu.memory_space<vmem>>, %arg25: memref<64x32xbf16, #tpu.memory_space<vmem>>, %arg26: memref<1x32xf32, #tpu.memory_space<vmem>>, %arg27: memref<1x8x32xf32, #tpu.memory_space<vmem>>, %arg28: memref<4x8x8xbf16, #tpu.memory_space<vmem>>, %arg29: memref<4x8x8xbf16, #tpu.memory_space<vmem>>, %arg30: memref<4x8x8xbf16, #tpu.memory_space<vmem>>, %arg31: memref<4x8x8xbf16, #tpu.memory_space<vmem>>) attributes {dimension_semantics = [#tpu.dimension_semantics<parallel>, #tpu.dimension_semantics<arbitrary>], iteration_bounds = array<i64: 2, 1>, scalar_prefetch = 0 : i64, scratch_operands = 4 : i64, tpu.core_type = #tpu.core_type<tc>, window_params = [{transform_indices = @transform_0, window_bounds = array<i64: 1, 8, 32>}, {pipeline_mode = #tpu.pipeline_mode<synchronous>, transform_indices = @transform_1, window_bounds = array<i64: 1, 8, 32>}, {pipeline_mode = #tpu.pipeline_mode<synchronous>, transform_indices = @transform_2, window_bounds = array<i64: 1, 8, 32>}, {transform_indices = @transform_3, window_bounds = array<i64: 1, 1, 8, 8>}, {transform_indices = @transform_4, window_bounds = array<i64: 1, 1, 8, 8>}, {pipeline_mode = #tpu.pipeline_mode<synchronous>, transform_indices = @transform_5, window_bounds = array<i64: 32, 32>}, {pipeline_mode = #tpu.pipeline_mode<synchronous>, transform_indices = @transform_6, window_bounds = array<i64: 1, 32>}, {pipeline_mode = #tpu.pipeline_mode<synchronous>, transform_indices = @transform_7, window_bounds = array<i64: 32, 32>}, {pipeline_mode = #tpu.pipeline_mode<synchronous>, transform_indices = @transform_8, window_bounds = array<i64: 1, 32>}, {pipeline_mode = #tpu.pipeline_mode<synchronous>, transform_indices = @transform_9, window_bounds = array<i64: 32, 32>}, {pipeline_mode = #tpu.pipeline_mode<synchronous>, transform_indices = @transform_10, window_bounds = array<i64: 1, 32>}, {pipeline_mode = #tpu.pipeline_mode<synchronous>, transform_indices = @transform_11, window_bounds = array<i64: 32, 32>}, {pipeline_mode = #tpu.pipeline_mode<synchronous>, transform_indices = @transform_12, window_bounds = array<i64: 1, 32>}, {pipeline_mode = #tpu.pipeline_mode<synchronous>, transform_indices = @transform_13, window_bounds = array<i64: 32, 32>}, {pipeline_mode = #tpu.pipeline_mode<synchronous>, transform_indices = @transform_14, window_bounds = array<i64: 1, 32>}, {pipeline_mode = #tpu.pipeline_mode<synchronous>, transform_indices = @transform_15, window_bounds = array<i64: 32, 32>}, {pipeline_mode = #tpu.pipeline_mode<synchronous>, transform_indices = @transform_16, window_bounds = array<i64: 1, 32>}, {pipeline_mode = #tpu.pipeline_mode<synchronous>, transform_indices = @transform_17, window_bounds = array<i64: 32, 32>}, {pipeline_mode = #tpu.pipeline_mode<synchronous>, transform_indices = @transform_18, window_bounds = array<i64: 1, 32>}, {pipeline_mode = #tpu.pipeline_mode<synchronous>, transform_indices = @transform_19, window_bounds = array<i64: 32, 32>}, {pipeline_mode = #tpu.pipeline_mode<synchronous>, transform_indices = @transform_20, window_bounds = array<i64: 1, 32>}, {pipeline_mode = #tpu.pipeline_mode<synchronous>, transform_indices = @transform_21, window_bounds = array<i64: 32, 64>}, {pipeline_mode = #tpu.pipeline_mode<synchronous>, transform_indices = @transform_22, window_bounds = array<i64: 1, 64>}, {pipeline_mode = #tpu.pipeline_mode<synchronous>, transform_indices = @transform_23, window_bounds = array<i64: 64, 32>}, {pipeline_mode = #tpu.pipeline_mode<synchronous>, transform_indices = @transform_24, window_bounds = array<i64: 1, 32>}, {transform_indices = @transform_25, window_bounds = array<i64: 1, 8, 32>}]} {
    %c0_i32 = arith.constant 0 : i32
    %0 = arith.cmpi eq, %arg1, %c0_i32 : i32
    %1 = arith.extui %0 : i1 to i32
    %c0_i32_0 = arith.constant 0 : i32
    %2 = arith.cmpi ne, %1, %c0_i32_0 : i32
    scf.if %2 {
      %c0_72 = arith.constant 0 : index
      %c0_73 = arith.constant 0 : index
      %c0_74 = arith.constant 0 : index
      %119 = vector.load %arg3[%c0_72, %c0_73, %c0_74] : memref<1x8x32xbf16, #tpu.memory_space<vmem>>, vector<1x8x32xbf16>
      %120 = vector.shape_cast %119 : vector<1x8x32xbf16> to vector<8x32xbf16>
      %c0_75 = arith.constant 0 : index
      %c0_76 = arith.constant 0 : index
      %c0_77 = arith.constant 0 : index
      %121 = vector.load %arg4[%c0_75, %c0_76, %c0_77] : memref<1x8x32xbf16, #tpu.memory_space<vmem>>, vector<1x8x32xbf16>
      %122 = vector.shape_cast %121 : vector<1x8x32xbf16> to vector<8x32xbf16>
      %c0_78 = arith.constant 0 : index
      %c0_79 = arith.constant 0 : index
      %123 = vector.load %arg9[%c0_78, %c0_79] : memref<32x32xbf16, #tpu.memory_space<vmem>>, vector<32x32xbf16>
      %cst_80 = arith.constant dense<0.000000e+00> : vector<8x32xf32>
      %124 = tpu.matmul %120, %123, %cst_80 {dimension_numbers = #tpu.dot_dimension_numbers<[1], [0], [0], [1], [0, 0, 1, 1], [], []>} : vector<8x32xbf16>, vector<32x32xbf16>, vector<8x32xf32> -> vector<8x32xf32>
      %c0_81 = arith.constant 0 : index
      %c0_82 = arith.constant 0 : index
      %125 = vector.load %arg10[%c0_81, %c0_82] : memref<1x32xf32, #tpu.memory_space<vmem>>, vector<1x32xf32>
      %126 = vector.broadcast %125 : vector<1x32xf32> to vector<8x32xf32>
      %127 = arith.addf %124, %126 : vector<8x32xf32>
      %128 = vector.shape_cast %127 : vector<8x32xf32> to vector<8x4x8xf32>
      %129 = tpu.transpose %128, [1, 0, 2] : vector<8x4x8xf32> -> vector<4x8x8xf32>
      %130 = arith.truncf %129 : vector<4x8x8xf32> to vector<4x8x8xbf16>
      %c0_83 = arith.constant 0 : index
      %c0_84 = arith.constant 0 : index
      %c0_85 = arith.constant 0 : index
      %131 = vector.load %arg28[%c0_83, %c0_84, %c0_85] : memref<4x8x8xbf16, #tpu.memory_space<vmem>>, vector<4x8x8xbf16>
      tpu.vector_store %arg28[%c0_83, %c0_84, %c0_85], %130 {strides = array<i32>} : memref<4x8x8xbf16, #tpu.memory_space<vmem>>, vector<4x8x8xbf16>,
      %c0_86 = arith.constant 0 : index
      %c0_87 = arith.constant 0 : index
      %132 = vector.load %arg11[%c0_86, %c0_87] : memref<32x32xbf16, #tpu.memory_space<vmem>>, vector<32x32xbf16>
      %cst_88 = arith.constant dense<0.000000e+00> : vector<8x32xf32>
      %133 = tpu.matmul %120, %132, %cst_88 {dimension_numbers = #tpu.dot_dimension_numbers<[1], [0], [0], [1], [0, 0, 1, 1], [], []>} : vector<8x32xbf16>, vector<32x32xbf16>, vector<8x32xf32> -> vector<8x32xf32>
      %c0_89 = arith.constant 0 : index
      %c0_90 = arith.constant 0 : index
      %134 = vector.load %arg12[%c0_89, %c0_90] : memref<1x32xf32, #tpu.memory_space<vmem>>, vector<1x32xf32>
      %135 = vector.broadcast %134 : vector<1x32xf32> to vector<8x32xf32>
      %136 = arith.addf %133, %135 : vector<8x32xf32>
      %137 = vector.shape_cast %136 : vector<8x32xf32> to vector<8x4x8xf32>
      %138 = tpu.transpose %137, [1, 0, 2] : vector<8x4x8xf32> -> vector<4x8x8xf32>
      %139 = arith.truncf %138 : vector<4x8x8xf32> to vector<4x8x8xbf16>
      %c0_91 = arith.constant 0 : index
      %c0_92 = arith.constant 0 : index
      %c0_93 = arith.constant 0 : index
      %140 = vector.load %arg29[%c0_91, %c0_92, %c0_93] : memref<4x8x8xbf16, #tpu.memory_space<vmem>>, vector<4x8x8xbf16>
      tpu.vector_store %arg29[%c0_91, %c0_92, %c0_93], %139 {strides = array<i32>} : memref<4x8x8xbf16, #tpu.memory_space<vmem>>, vector<4x8x8xbf16>,
      %c0_94 = arith.constant 0 : index
      %c0_95 = arith.constant 0 : index
      %141 = vector.load %arg17[%c0_94, %c0_95] : memref<32x32xbf16, #tpu.memory_space<vmem>>, vector<32x32xbf16>
      %cst_96 = arith.constant dense<0.000000e+00> : vector<8x32xf32>
      %142 = tpu.matmul %122, %141, %cst_96 {dimension_numbers = #tpu.dot_dimension_numbers<[1], [0], [0], [1], [0, 0, 1, 1], [], []>} : vector<8x32xbf16>, vector<32x32xbf16>, vector<8x32xf32> -> vector<8x32xf32>
      %c0_97 = arith.constant 0 : index
      %c0_98 = arith.constant 0 : index
      %143 = vector.load %arg18[%c0_97, %c0_98] : memref<1x32xf32, #tpu.memory_space<vmem>>, vector<1x32xf32>
      %144 = vector.broadcast %143 : vector<1x32xf32> to vector<8x32xf32>
      %145 = arith.addf %142, %144 : vector<8x32xf32>
      %146 = vector.shape_cast %145 : vector<8x32xf32> to vector<8x4x8xf32>
      %147 = tpu.transpose %146, [1, 0, 2] : vector<8x4x8xf32> -> vector<4x8x8xf32>
      %148 = arith.truncf %147 : vector<4x8x8xf32> to vector<4x8x8xbf16>
      %c0_99 = arith.constant 0 : index
      %c0_100 = arith.constant 0 : index
      %c0_101 = arith.constant 0 : index
      %149 = vector.load %arg30[%c0_99, %c0_100, %c0_101] : memref<4x8x8xbf16, #tpu.memory_space<vmem>>, vector<4x8x8xbf16>
      tpu.vector_store %arg30[%c0_99, %c0_100, %c0_101], %148 {strides = array<i32>} : memref<4x8x8xbf16, #tpu.memory_space<vmem>>, vector<4x8x8xbf16>,
      %c0_102 = arith.constant 0 : index
      %c0_103 = arith.constant 0 : index
      %150 = vector.load %arg19[%c0_102, %c0_103] : memref<32x32xbf16, #tpu.memory_space<vmem>>, vector<32x32xbf16>
      %cst_104 = arith.constant dense<0.000000e+00> : vector<8x32xf32>
      %151 = tpu.matmul %122, %150, %cst_104 {dimension_numbers = #tpu.dot_dimension_numbers<[1], [0], [0], [1], [0, 0, 1, 1], [], []>} : vector<8x32xbf16>, vector<32x32xbf16>, vector<8x32xf32> -> vector<8x32xf32>
      %c0_105 = arith.constant 0 : index
      %c0_106 = arith.constant 0 : index
      %152 = vector.load %arg20[%c0_105, %c0_106] : memref<1x32xf32, #tpu.memory_space<vmem>>, vector<1x32xf32>
      %153 = vector.broadcast %152 : vector<1x32xf32> to vector<8x32xf32>
      %154 = arith.addf %151, %153 : vector<8x32xf32>
      %155 = vector.shape_cast %154 : vector<8x32xf32> to vector<8x4x8xf32>
      %156 = tpu.transpose %155, [1, 0, 2] : vector<8x4x8xf32> -> vector<4x8x8xf32>
      %157 = arith.truncf %156 : vector<4x8x8xf32> to vector<4x8x8xbf16>
      %c0_107 = arith.constant 0 : index
      %c0_108 = arith.constant 0 : index
      %c0_109 = arith.constant 0 : index
      %158 = vector.load %arg31[%c0_107, %c0_108, %c0_109] : memref<4x8x8xbf16, #tpu.memory_space<vmem>>, vector<4x8x8xbf16>
      tpu.vector_store %arg31[%c0_107, %c0_108, %c0_109], %157 {strides = array<i32>} : memref<4x8x8xbf16, #tpu.memory_space<vmem>>, vector<4x8x8xbf16>,
    } else {
    }
    %c0 = arith.constant 0 : index
    %c0_1 = arith.constant 0 : index
    %c0_2 = arith.constant 0 : index
    %3 = vector.load %arg2[%c0, %c0_1, %c0_2] : memref<1x8x32xf32, #tpu.memory_space<vmem>>, vector<1x8x32xf32>
    %4 = vector.shape_cast %3 : vector<1x8x32xf32> to vector<8x32xf32>
    %c0_3 = arith.constant 0 : index
    %c0_4 = arith.constant 0 : index
    %c0_5 = arith.constant 0 : index
    %c0_6 = arith.constant 0 : index
    %5 = vector.load %arg5[%c0_3, %c0_4, %c0_5, %c0_6] : memref<1x1x8x8xi8, #tpu.memory_space<vmem>>, vector<1x1x8x8xi8>
    %6 = vector.shape_cast %5 : vector<1x1x8x8xi8> to vector<8x8xi8>
    %7 = arith.extsi %6 : vector<8x8xi8> to vector<8x8xi32>
    %c0_i32_7 = arith.constant 0 : i32
    %8 = vector.broadcast %c0_i32_7 : i32 to vector<8x8xi32>
    %9 = arith.cmpi eq, %7, %8 : vector<8x8xi32>
    %c0_8 = arith.constant 0 : index
    %c0_9 = arith.constant 0 : index
    %c0_10 = arith.constant 0 : index
    %c0_11 = arith.constant 0 : index
    %10 = vector.load %arg6[%c0_8, %c0_9, %c0_10, %c0_11] : memref<1x1x8x8xi8, #tpu.memory_space<vmem>>, vector<1x1x8x8xi8>
    %11 = vector.shape_cast %10 : vector<1x1x8x8xi8> to vector<8x8xi8>
    %12 = arith.extsi %11 : vector<8x8xi8> to vector<8x8xi32>
    %c0_i32_12 = arith.constant 0 : i32
    %13 = vector.broadcast %c0_i32_12 : i32 to vector<8x8xi32>
    %14 = arith.cmpi eq, %12, %13 : vector<8x8xi32>
    %15 = arith.truncf %4 : vector<8x32xf32> to vector<8x32xbf16>
    %c0_13 = arith.constant 0 : index
    %c0_14 = arith.constant 0 : index
    %16 = vector.load %arg7[%c0_13, %c0_14] : memref<32x32xbf16, #tpu.memory_space<vmem>>, vector<32x32xbf16>
    %cst = arith.constant dense<0.000000e+00> : vector<8x32xf32>
    %17 = tpu.matmul %15, %16, %cst {dimension_numbers = #tpu.dot_dimension_numbers<[1], [0], [0], [1], [0, 0, 1, 1], [], []>} : vector<8x32xbf16>, vector<32x32xbf16>, vector<8x32xf32> -> vector<8x32xf32>
    %c0_15 = arith.constant 0 : index
    %c0_16 = arith.constant 0 : index
    %18 = vector.load %arg8[%c0_15, %c0_16] : memref<1x32xf32, #tpu.memory_space<vmem>>, vector<1x32xf32>
    %19 = vector.broadcast %18 : vector<1x32xf32> to vector<8x32xf32>
    %20 = arith.addf %17, %19 : vector<8x32xf32>
    %cst_17 = arith.constant 0.353553385 : f32
    %21 = vector.broadcast %cst_17 : f32 to vector<8x32xf32>
    %22 = arith.mulf %20, %21 : vector<8x32xf32>
    %23 = vector.shape_cast %22 : vector<8x32xf32> to vector<8x4x8xf32>
    %24 = tpu.transpose %23, [1, 0, 2] : vector<8x4x8xf32> -> vector<4x8x8xf32>
    %25 = arith.truncf %24 : vector<4x8x8xf32> to vector<4x8x8xbf16>
    %c0_18 = arith.constant 0 : index
    %c0_19 = arith.constant 0 : index
    %c0_20 = arith.constant 0 : index
    %26 = vector.load %arg28[%c0_18, %c0_19, %c0_20] : memref<4x8x8xbf16, #tpu.memory_space<vmem>>, vector<4x8x8xbf16>
    "tpu.trace_start"() <{level = 10 : i32, message = "hqd,hkd->hqk"}> : () -> ()
    %cst_21 = arith.constant dense<0.000000e+00> : vector<4x8x8xf32>
    %27 = tpu.matmul %25, %26, %cst_21 {dimension_numbers = #tpu.dot_dimension_numbers<[2], [2], [1], [1], [0, 0, 0, 1, 1, 1], [0], [0]>} : vector<4x8x8xbf16>, vector<4x8x8xbf16>, vector<4x8x8xf32> -> vector<4x8x8xf32>
    "tpu.trace_stop"() : () -> ()
    %28 = vector.shape_cast %9 : vector<8x8xi1> to vector<1x8x8xi1>
    %cst_22 = arith.constant -9.99999971E-10 : f32
    %29 = vector.shape_cast %28 : vector<1x8x8xi1> to vector<1x8x8xi1>
    %30 = vector.broadcast %29 : vector<1x8x8xi1> to vector<4x8x8xi1>
    %31 = vector.broadcast %cst_22 : f32 to vector<4x8x8xf32>
    %32 = arith.select %30, %31, %27 : vector<4x8x8xi1>, vector<4x8x8xf32>
    %cst_23 = arith.constant dense<0xFF800000> : vector<4x8xf32>
    %33 = vector.multi_reduction <maximumf>, %32, %cst_23 [2] : vector<4x8x8xf32> to vector<4x8xf32>
    %34 = vector.shape_cast %33 : vector<4x8xf32> to vector<4x8x1xf32>
    %35 = vector.broadcast %34 : vector<4x8x1xf32> to vector<4x8x8xf32>
    %36 = arith.subf %32, %35 : vector<4x8x8xf32>
    %37 = math.exp %36 : vector<4x8x8xf32>
    %cst_24 = arith.constant dense<0.000000e+00> : vector<4x8xf32>
    %38 = vector.multi_reduction <add>, %37, %cst_24 [2] : vector<4x8x8xf32> to vector<4x8xf32>
    %39 = vector.shape_cast %38 : vector<4x8xf32> to vector<4x8x1xf32>
    %40 = tpu.reciprocal %39 {approx = true} : vector<4x8x1xf32> -> vector<4x8x1xf32>
    %41 = vector.broadcast %40 : vector<4x8x1xf32> to vector<4x8x8xf32>
    %42 = arith.mulf %37, %41 : vector<4x8x8xf32>
    %43 = arith.truncf %42 : vector<4x8x8xf32> to vector<4x8x8xbf16>
    %c0_25 = arith.constant 0 : index
    %c0_26 = arith.constant 0 : index
    %c0_27 = arith.constant 0 : index
    %44 = vector.load %arg29[%c0_25, %c0_26, %c0_27] : memref<4x8x8xbf16, #tpu.memory_space<vmem>>, vector<4x8x8xbf16>
    "tpu.trace_start"() <{level = 10 : i32, message = "hqk,hkd->qhd"}> : () -> ()
    %cst_28 = arith.constant dense<0.000000e+00> : vector<4x8x8xf32>
    %45 = tpu.matmul %44, %43, %cst_28 {dimension_numbers = #tpu.dot_dimension_numbers<[1], [2], [2], [1], [0, 0, 0, 2, 1, 1], [0], [0]>} : vector<4x8x8xbf16>, vector<4x8x8xbf16>, vector<4x8x8xf32> -> vector<4x8x8xf32>
    %46 = tpu.transpose %45, [2, 0, 1] : vector<4x8x8xf32> -> vector<8x4x8xf32>
    "tpu.trace_stop"() : () -> ()
    %47 = vector.shape_cast %46 : vector<8x4x8xf32> to vector<8x32xf32>
    %48 = arith.truncf %47 : vector<8x32xf32> to vector<8x32xbf16>
    %c0_29 = arith.constant 0 : index
    %c0_30 = arith.constant 0 : index
    %49 = vector.load %arg13[%c0_29, %c0_30] : memref<32x32xbf16, #tpu.memory_space<vmem>>, vector<32x32xbf16>
    %cst_31 = arith.constant dense<0.000000e+00> : vector<8x32xf32>
    %50 = tpu.matmul %48, %49, %cst_31 {dimension_numbers = #tpu.dot_dimension_numbers<[1], [0], [0], [1], [0, 0, 1, 1], [], []>} : vector<8x32xbf16>, vector<32x32xbf16>, vector<8x32xf32> -> vector<8x32xf32>
    %c0_32 = arith.constant 0 : index
    %c0_33 = arith.constant 0 : index
    %51 = vector.load %arg14[%c0_32, %c0_33] : memref<1x32xf32, #tpu.memory_space<vmem>>, vector<1x32xf32>
    %52 = vector.broadcast %51 : vector<1x32xf32> to vector<8x32xf32>
    %53 = arith.addf %50, %52 : vector<8x32xf32>
    %54 = arith.addf %4, %53 : vector<8x32xf32>
    %55 = arith.truncf %54 : vector<8x32xf32> to vector<8x32xbf16>
    %c0_34 = arith.constant 0 : index
    %c0_35 = arith.constant 0 : index
    %56 = vector.load %arg15[%c0_34, %c0_35] : memref<32x32xbf16, #tpu.memory_space<vmem>>, vector<32x32xbf16>
    %cst_36 = arith.constant dense<0.000000e+00> : vector<8x32xf32>
    %57 = tpu.matmul %55, %56, %cst_36 {dimension_numbers = #tpu.dot_dimension_numbers<[1], [0], [0], [1], [0, 0, 1, 1], [], []>} : vector<8x32xbf16>, vector<32x32xbf16>, vector<8x32xf32> -> vector<8x32xf32>
    %c0_37 = arith.constant 0 : index
    %c0_38 = arith.constant 0 : index
    %58 = vector.load %arg16[%c0_37, %c0_38] : memref<1x32xf32, #tpu.memory_space<vmem>>, vector<1x32xf32>
    %59 = vector.broadcast %58 : vector<1x32xf32> to vector<8x32xf32>
    %60 = arith.addf %57, %59 : vector<8x32xf32>
    %cst_39 = arith.constant 0.353553385 : f32
    %61 = vector.broadcast %cst_39 : f32 to vector<8x32xf32>
    %62 = arith.mulf %60, %61 : vector<8x32xf32>
    %63 = vector.shape_cast %62 : vector<8x32xf32> to vector<8x4x8xf32>
    %64 = tpu.transpose %63, [1, 0, 2] : vector<8x4x8xf32> -> vector<4x8x8xf32>
    %65 = arith.truncf %64 : vector<4x8x8xf32> to vector<4x8x8xbf16>
    %c0_40 = arith.constant 0 : index
    %c0_41 = arith.constant 0 : index
    %c0_42 = arith.constant 0 : index
    %66 = vector.load %arg30[%c0_40, %c0_41, %c0_42] : memref<4x8x8xbf16, #tpu.memory_space<vmem>>, vector<4x8x8xbf16>
    "tpu.trace_start"() <{level = 10 : i32, message = "hqd,hkd->hqk"}> : () -> ()
    %cst_43 = arith.constant dense<0.000000e+00> : vector<4x8x8xf32>
    %67 = tpu.matmul %65, %66, %cst_43 {dimension_numbers = #tpu.dot_dimension_numbers<[2], [2], [1], [1], [0, 0, 0, 1, 1, 1], [0], [0]>} : vector<4x8x8xbf16>, vector<4x8x8xbf16>, vector<4x8x8xf32> -> vector<4x8x8xf32>
    "tpu.trace_stop"() : () -> ()
    %68 = vector.shape_cast %14 : vector<8x8xi1> to vector<1x8x8xi1>
    %cst_44 = arith.constant -9.99999971E-10 : f32
    %69 = vector.shape_cast %68 : vector<1x8x8xi1> to vector<1x8x8xi1>
    %70 = vector.broadcast %69 : vector<1x8x8xi1> to vector<4x8x8xi1>
    %71 = vector.broadcast %cst_44 : f32 to vector<4x8x8xf32>
    %72 = arith.select %70, %71, %67 : vector<4x8x8xi1>, vector<4x8x8xf32>
    %cst_45 = arith.constant dense<0xFF800000> : vector<4x8xf32>
    %73 = vector.multi_reduction <maximumf>, %72, %cst_45 [2] : vector<4x8x8xf32> to vector<4x8xf32>
    %74 = vector.shape_cast %73 : vector<4x8xf32> to vector<4x8x1xf32>
    %75 = vector.broadcast %74 : vector<4x8x1xf32> to vector<4x8x8xf32>
    %76 = arith.subf %72, %75 : vector<4x8x8xf32>
    %77 = math.exp %76 : vector<4x8x8xf32>
    %cst_46 = arith.constant dense<0.000000e+00> : vector<4x8xf32>
    %78 = vector.multi_reduction <add>, %77, %cst_46 [2] : vector<4x8x8xf32> to vector<4x8xf32>
    %79 = vector.shape_cast %78 : vector<4x8xf32> to vector<4x8x1xf32>
    %80 = tpu.reciprocal %79 {approx = true} : vector<4x8x1xf32> -> vector<4x8x1xf32>
    %81 = vector.broadcast %80 : vector<4x8x1xf32> to vector<4x8x8xf32>
    %82 = arith.mulf %77, %81 : vector<4x8x8xf32>
    %83 = arith.truncf %82 : vector<4x8x8xf32> to vector<4x8x8xbf16>
    %c0_47 = arith.constant 0 : index
    %c0_48 = arith.constant 0 : index
    %c0_49 = arith.constant 0 : index
    %84 = vector.load %arg31[%c0_47, %c0_48, %c0_49] : memref<4x8x8xbf16, #tpu.memory_space<vmem>>, vector<4x8x8xbf16>
    "tpu.trace_start"() <{level = 10 : i32, message = "hqk,hkd->qhd"}> : () -> ()
    %cst_50 = arith.constant dense<0.000000e+00> : vector<4x8x8xf32>
    %85 = tpu.matmul %84, %83, %cst_50 {dimension_numbers = #tpu.dot_dimension_numbers<[1], [2], [2], [1], [0, 0, 0, 2, 1, 1], [0], [0]>} : vector<4x8x8xbf16>, vector<4x8x8xbf16>, vector<4x8x8xf32> -> vector<4x8x8xf32>
    %86 = tpu.transpose %85, [2, 0, 1] : vector<4x8x8xf32> -> vector<8x4x8xf32>
    "tpu.trace_stop"() : () -> ()
    %87 = vector.shape_cast %86 : vector<8x4x8xf32> to vector<8x32xf32>
    %88 = arith.truncf %87 : vector<8x32xf32> to vector<8x32xbf16>
    %c0_51 = arith.constant 0 : index
    %c0_52 = arith.constant 0 : index
    %89 = vector.load %arg21[%c0_51, %c0_52] : memref<32x32xbf16, #tpu.memory_space<vmem>>, vector<32x32xbf16>
    %cst_53 = arith.constant dense<0.000000e+00> : vector<8x32xf32>
    %90 = tpu.matmul %88, %89, %cst_53 {dimension_numbers = #tpu.dot_dimension_numbers<[1], [0], [0], [1], [0, 0, 1, 1], [], []>} : vector<8x32xbf16>, vector<32x32xbf16>, vector<8x32xf32> -> vector<8x32xf32>
    %c0_54 = arith.constant 0 : index
    %c0_55 = arith.constant 0 : index
    %91 = vector.load %arg22[%c0_54, %c0_55] : memref<1x32xf32, #tpu.memory_space<vmem>>, vector<1x32xf32>
    %92 = vector.broadcast %91 : vector<1x32xf32> to vector<8x32xf32>
    %93 = arith.addf %90, %92 : vector<8x32xf32>
    %94 = arith.addf %54, %93 : vector<8x32xf32>
    %95 = arith.truncf %94 : vector<8x32xf32> to vector<8x32xbf16>
    %c0_56 = arith.constant 0 : index
    %c0_57 = arith.constant 0 : index
    %96 = vector.load %arg23[%c0_56, %c0_57] : memref<32x64xbf16, #tpu.memory_space<vmem>>, vector<32x64xbf16>
    %cst_58 = arith.constant dense<0.000000e+00> : vector<8x64xf32>
    %97 = tpu.matmul %95, %96, %cst_58 {dimension_numbers = #tpu.dot_dimension_numbers<[1], [0], [0], [1], [0, 0, 1, 1], [], []>} : vector<8x32xbf16>, vector<32x64xbf16>, vector<8x64xf32> -> vector<8x64xf32>
    %c0_59 = arith.constant 0 : index
    %c0_60 = arith.constant 0 : index
    %98 = vector.load %arg24[%c0_59, %c0_60] : memref<1x64xf32, #tpu.memory_space<vmem>>, vector<1x64xf32>
    %99 = vector.broadcast %98 : vector<1x64xf32> to vector<8x64xf32>
    %100 = arith.addf %97, %99 : vector<8x64xf32>
    %cst_61 = arith.constant 5.000000e-01 : f32
    %101 = vector.broadcast %cst_61 : f32 to vector<8x64xf32>
    %102 = arith.mulf %101, %100 : vector<8x64xf32>
    %cst_62 = arith.constant 0.707106769 : f32
    %103 = vector.broadcast %cst_62 : f32 to vector<8x64xf32>
    %104 = arith.mulf %100, %103 : vector<8x64xf32>
    %105 = math.erf %104 : vector<8x64xf32>
    %cst_63 = arith.constant 1.000000e+00 : f32
    %106 = vector.broadcast %cst_63 : f32 to vector<8x64xf32>
    %107 = arith.addf %106, %105 : vector<8x64xf32>
    %108 = arith.mulf %102, %107 : vector<8x64xf32>
    %109 = arith.truncf %108 : vector<8x64xf32> to vector<8x64xbf16>
    %c0_64 = arith.constant 0 : index
    %c0_65 = arith.constant 0 : index
    %110 = vector.load %arg25[%c0_64, %c0_65] : memref<64x32xbf16, #tpu.memory_space<vmem>>, vector<64x32xbf16>
    %cst_66 = arith.constant dense<0.000000e+00> : vector<8x32xf32>
    %111 = tpu.matmul %109, %110, %cst_66 {dimension_numbers = #tpu.dot_dimension_numbers<[1], [0], [0], [1], [0, 0, 1, 1], [], []>} : vector<8x64xbf16>, vector<64x32xbf16>, vector<8x32xf32> -> vector<8x32xf32>
    %c0_67 = arith.constant 0 : index
    %c0_68 = arith.constant 0 : index
    %112 = vector.load %arg26[%c0_67, %c0_68] : memref<1x32xf32, #tpu.memory_space<vmem>>, vector<1x32xf32>
    %113 = vector.broadcast %112 : vector<1x32xf32> to vector<8x32xf32>
    %114 = arith.addf %111, %113 : vector<8x32xf32>
    %115 = arith.addf %114, %94 : vector<8x32xf32>
    %c0_69 = arith.constant 0 : index
    %c0_70 = arith.constant 0 : index
    %c0_71 = arith.constant 0 : index
    %116 = vector.load %arg27[%c0_69, %c0_70, %c0_71] : memref<1x8x32xf32, #tpu.memory_space<vmem>>, vector<1x8x32xf32>
    %117 = vector.shape_cast %116 : vector<1x8x32xf32> to vector<8x32xf32>
    %118 = vector.shape_cast %115 : vector<8x32xf32> to vector<1x8x32xf32>
    tpu.vector_store %arg27[%c0_69, %c0_70, %c0_71], %118 {strides = array<i32>} : memref<1x8x32xf32, #tpu.memory_space<vmem>>, vector<1x8x32xf32>,
    return
  }
  func.func @transform_0(%arg0: i32, %arg1: i32) -> (i32, i32, i32) {
    %c0_i32 = arith.constant 0 : i32
    %c0_i32_0 = arith.constant 0 : i32
    return %arg0, %arg1, %c0_i32 : i32, i32, i32
  }
  func.func @transform_1(%arg0: i32, %arg1: i32) -> (i32, i32, i32) {
    %c0_i32 = arith.constant 0 : i32
    %c0_i32_0 = arith.constant 0 : i32
    %c0_i32_1 = arith.constant 0 : i32
    return %arg0, %c0_i32, %c0_i32_0 : i32, i32, i32
  }
  func.func @transform_2(%arg0: i32, %arg1: i32) -> (i32, i32, i32) {
    %c0_i32 = arith.constant 0 : i32
    %c0_i32_0 = arith.constant 0 : i32
    %c0_i32_1 = arith.constant 0 : i32
    return %arg0, %c0_i32, %c0_i32_0 : i32, i32, i32
  }
  func.func @transform_3(%arg0: i32, %arg1: i32) -> (i32, i32, i32, i32) {
    %c0_i32 = arith.constant 0 : i32
    %c0_i32_0 = arith.constant 0 : i32
    %c0_i32_1 = arith.constant 0 : i32
    return %arg0, %c0_i32, %arg1, %c0_i32_0 : i32, i32, i32, i32
  }
  func.func @transform_4(%arg0: i32, %arg1: i32) -> (i32, i32, i32, i32) {
    %c0_i32 = arith.constant 0 : i32
    %c0_i32_0 = arith.constant 0 : i32
    %c0_i32_1 = arith.constant 0 : i32
    return %arg0, %c0_i32, %arg1, %c0_i32_0 : i32, i32, i32, i32
  }
  func.func @transform_5(%arg0: i32, %arg1: i32) -> (i32, i32) {
    %c0_i32 = arith.constant 0 : i32
    %c0_i32_0 = arith.constant 0 : i32
    %c0_i32_1 = arith.constant 0 : i32
    return %c0_i32, %c0_i32_0 : i32, i32
  }
  func.func @transform_6(%arg0: i32, %arg1: i32) -> (i32, i32) {
    %c0_i32 = arith.constant 0 : i32
    %c0_i32_0 = arith.constant 0 : i32
    %c0_i32_1 = arith.constant 0 : i32
    return %c0_i32, %c0_i32_0 : i32, i32
  }
  func.func @transform_7(%arg0: i32, %arg1: i32) -> (i32, i32) {
    %c0_i32 = arith.constant 0 : i32
    %c0_i32_0 = arith.constant 0 : i32
    %c0_i32_1 = arith.constant 0 : i32
    return %c0_i32, %c0_i32_0 : i32, i32
  }
  func.func @transform_8(%arg0: i32, %arg1: i32) -> (i32, i32) {
    %c0_i32 = arith.constant 0 : i32
    %c0_i32_0 = arith.constant 0 : i32
    %c0_i32_1 = arith.constant 0 : i32
    return %c0_i32, %c0_i32_0 : i32, i32
  }
  func.func @transform_9(%arg0: i32, %arg1: i32) -> (i32, i32) {
    %c0_i32 = arith.constant 0 : i32
    %c0_i32_0 = arith.constant 0 : i32
    %c0_i32_1 = arith.constant 0 : i32
    return %c0_i32, %c0_i32_0 : i32, i32
  }
  func.func @transform_10(%arg0: i32, %arg1: i32) -> (i32, i32) {
    %c0_i32 = arith.constant 0 : i32
    %c0_i32_0 = arith.constant 0 : i32
    %c0_i32_1 = arith.constant 0 : i32
    return %c0_i32, %c0_i32_0 : i32, i32
  }
  func.func @transform_11(%arg0: i32, %arg1: i32) -> (i32, i32) {
    %c0_i32 = arith.constant 0 : i32
    %c0_i32_0 = arith.constant 0 : i32
    %c0_i32_1 = arith.constant 0 : i32
    return %c0_i32, %c0_i32_0 : i32, i32
  }
  func.func @transform_12(%arg0: i32, %arg1: i32) -> (i32, i32) {
    %c0_i32 = arith.constant 0 : i32
    %c0_i32_0 = arith.constant 0 : i32
    %c0_i32_1 = arith.constant 0 : i32
    return %c0_i32, %c0_i32_0 : i32, i32
  }
  func.func @transform_13(%arg0: i32, %arg1: i32) -> (i32, i32) {
    %c0_i32 = arith.constant 0 : i32
    %c0_i32_0 = arith.constant 0 : i32
    %c0_i32_1 = arith.constant 0 : i32
    return %c0_i32, %c0_i32_0 : i32, i32
  }
  func.func @transform_14(%arg0: i32, %arg1: i32) -> (i32, i32) {
    %c0_i32 = arith.constant 0 : i32
    %c0_i32_0 = arith.constant 0 : i32
    %c0_i32_1 = arith.constant 0 : i32
    return %c0_i32, %c0_i32_0 : i32, i32
  }
  func.func @transform_15(%arg0: i32, %arg1: i32) -> (i32, i32) {
    %c0_i32 = arith.constant 0 : i32
    %c0_i32_0 = arith.constant 0 : i32
    %c0_i32_1 = arith.constant 0 : i32
    return %c0_i32, %c0_i32_0 : i32, i32
  }
  func.func @transform_16(%arg0: i32, %arg1: i32) -> (i32, i32) {
    %c0_i32 = arith.constant 0 : i32
    %c0_i32_0 = arith.constant 0 : i32
    %c0_i32_1 = arith.constant 0 : i32
    return %c0_i32, %c0_i32_0 : i32, i32
  }
  func.func @transform_17(%arg0: i32, %arg1: i32) -> (i32, i32) {
    %c0_i32 = arith.constant 0 : i32
    %c0_i32_0 = arith.constant 0 : i32
    %c0_i32_1 = arith.constant 0 : i32
    return %c0_i32, %c0_i32_0 : i32, i32
  }
  func.func @transform_18(%arg0: i32, %arg1: i32) -> (i32, i32) {
    %c0_i32 = arith.constant 0 : i32
    %c0_i32_0 = arith.constant 0 : i32
    %c0_i32_1 = arith.constant 0 : i32
    return %c0_i32, %c0_i32_0 : i32, i32
  }
  func.func @transform_19(%arg0: i32, %arg1: i32) -> (i32, i32) {
    %c0_i32 = arith.constant 0 : i32
    %c0_i32_0 = arith.constant 0 : i32
    %c0_i32_1 = arith.constant 0 : i32
    return %c0_i32, %c0_i32_0 : i32, i32
  }
  func.func @transform_20(%arg0: i32, %arg1: i32) -> (i32, i32) {
    %c0_i32 = arith.constant 0 : i32
    %c0_i32_0 = arith.constant 0 : i32
    %c0_i32_1 = arith.constant 0 : i32
    return %c0_i32, %c0_i32_0 : i32, i32
  }
  func.func @transform_21(%arg0: i32, %arg1: i32) -> (i32, i32) {
    %c0_i32 = arith.constant 0 : i32
    %c0_i32_0 = arith.constant 0 : i32
    %c0_i32_1 = arith.constant 0 : i32
    return %c0_i32, %c0_i32_0 : i32, i32
  }
  func.func @transform_22(%arg0: i32, %arg1: i32) -> (i32, i32) {
    %c0_i32 = arith.constant 0 : i32
    %c0_i32_0 = arith.constant 0 : i32
    %c0_i32_1 = arith.constant 0 : i32
    return %c0_i32, %c0_i32_0 : i32, i32
  }
  func.func @transform_23(%arg0: i32, %arg1: i32) -> (i32, i32) {
    %c0_i32 = arith.constant 0 : i32
    %c0_i32_0 = arith.constant 0 : i32
    %c0_i32_1 = arith.constant 0 : i32
    return %c0_i32, %c0_i32_0 : i32, i32
  }
  func.func @transform_24(%arg0: i32, %arg1: i32) -> (i32, i32) {
    %c0_i32 = arith.constant 0 : i32
    %c0_i32_0 = arith.constant 0 : i32
    %c0_i32_1 = arith.constant 0 : i32
    return %c0_i32, %c0_i32_0 : i32, i32
  }
  func.func @transform_25(%arg0: i32, %arg1: i32) -> (i32, i32, i32) {
    %c0_i32 = arith.constant 0 : i32
    %c0_i32_0 = arith.constant 0 : i32
    return %arg0, %arg1, %c0_i32 : i32, i32, i32
  }
}

module attributes {stable_mosaic.version = 11 : i64} {
  func.func @_decoder_layer_kernel(%arg0: i32, %arg1: i32, %arg2: memref<1x8x32xf32, #tpu.memory_space<vmem>>, %arg3: memref<1x8x32xbf16, #tpu.memory_space<vmem>>, %arg4: memref<1x8x32xbf16, #tpu.memory_space<vmem>>, %arg5: memref<1x1x8x8xi8, #tpu.memory_space<vmem>>, %arg6: memref<1x1x8x8xi8, #tpu.memory_space<vmem>>, %arg7: memref<32x32xbf16, #tpu.memory_space<vmem>>, %arg8: memref<1x32xf32, #tpu.memory_space<vmem>>, %arg9: memref<32x32xbf16, #tpu.memory_space<vmem>>, %arg10: memref<1x32xf32, #tpu.memory_space<vmem>>, %arg11: memref<32x32xbf16, #tpu.memory_space<vmem>>, %arg12: memref<1x32xf32, #tpu.memory_space<vmem>>, %arg13: memref<32x32xbf16, #tpu.memory_space<vmem>>, %arg14: memref<1x32xf32, #tpu.memory_space<vmem>>, %arg15: memref<32x32xbf16, #tpu.memory_space<vmem>>, %arg16: memref<1x32xf32, #tpu.memory_space<vmem>>, %arg17: memref<32x32xbf16, #tpu.memory_space<vmem>>, %arg18: memref<1x32xf32, #tpu.memory_space<vmem>>, %arg19: memref<32x32xbf16, #tpu.memory_space<vmem>>, %arg20: memref<1x32xf32, #tpu.memory_space<vmem>>, %arg21: memref<32x32xbf16, #tpu.memory_space<vmem>>, %arg22: memref<1x32xf32, #tpu.memory_space<vmem>>, %arg23: memref<32x64xbf16, #tpu.memory_space<vmem>>, %arg24: memref<1x64xf32, #tpu.memory_space<vmem>>, %arg25: memref<64x32xbf16, #tpu.memory_space<vmem>>, %arg26: memref<1x32xf32, #tpu.memory_space<vmem>>, %arg27: memref<1x8x32xf32, #tpu.memory_space<vmem>>, %arg28: memref<4x8x8xbf16, #tpu.memory_space<vmem>>, %arg29: memref<4x8x8xbf16, #tpu.memory_space<vmem>>, %arg30: memref<4x8x8xbf16, #tpu.memory_space<vmem>>, %arg31: memref<4x8x8xbf16, #tpu.memory_space<vmem>>) attributes {dimension_semantics = [#tpu.dimension_semantics<parallel>, #tpu.dimension_semantics<arbitrary>], iteration_bounds = array<i64: 2, 1>, scalar_prefetch = 0 : i64, scratch_operands = 4 : i64, tpu.core_type = #tpu.core_type<tc>, window_params = [{transform_indices = @transform_0, window_bounds = array<i64: 1, 8, 32>}, {transform_indices = @transform_1, window_bounds = array<i64: 1, 8, 32>}, {transform_indices = @transform_2, window_bounds = array<i64: 1, 8, 32>}, {transform_indices = @transform_3, window_bounds = array<i64: 1, 1, 8, 8>}, {transform_indices = @transform_4, window_bounds = array<i64: 1, 1, 8, 8>}, {pipeline_mode = #tpu.pipeline_mode<synchronous>, transform_indices = @transform_5, window_bounds = array<i64: 32, 32>}, {pipeline_mode = #tpu.pipeline_mode<synchronous>, transform_indices = @transform_6, window_bounds = array<i64: 1, 32>}, {pipeline_mode = #tpu.pipeline_mode<synchronous>, transform_indices = @transform_7, window_bounds = array<i64: 32, 32>}, {pipeline_mode = #tpu.pipeline_mode<synchronous>, transform_indices = @transform_8, window_bounds = array<i64: 1, 32>}, {pipeline_mode = #tpu.pipeline_mode<synchronous>, transform_indices = @transform_9, window_bounds = array<i64: 32, 32>}, {pipeline_mode = #tpu.pipeline_mode<synchronous>, transform_indices = @transform_10, window_bounds = array<i64: 1, 32>}, {pipeline_mode = #tpu.pipeline_mode<synchronous>, transform_indices = @transform_11, window_bounds = array<i64: 32, 32>}, {pipeline_mode = #tpu.pipeline_mode<synchronous>, transform_indices = @transform_12, window_bounds = array<i64: 1, 32>}, {pipeline_mode = #tpu.pipeline_mode<synchronous>, transform_indices = @transform_13, window_bounds = array<i64: 32, 32>}, {pipeline_mode = #tpu.pipeline_mode<synchronous>, transform_indices = @transform_14, window_bounds = array<i64: 1, 32>}, {pipeline_mode = #tpu.pipeline_mode<synchronous>, transform_indices = @transform_15, window_bounds = array<i64: 32, 32>}, {pipeline_mode = #tpu.pipeline_mode<synchronous>, transform_indices = @transform_16, window_bounds = array<i64: 1, 32>}, {pipeline_mode = #tpu.pipeline_mode<synchronous>, transform_indices = @transform_17, window_bounds = array<i64: 32, 32>}, {pipeline_mode = #tpu.pipeline_mode<synchronous>, transform_indices = @transform_18, window_bounds = array<i64: 1, 32>}, {pipeline_mode = #tpu.pipeline_mode<synchronous>, transform_indices = @transform_19, window_bounds = array<i64: 32, 32>}, {pipeline_mode = #tpu.pipeline_mode<synchronous>, transform_indices = @transform_20, window_bounds = array<i64: 1, 32>}, {pipeline_mode = #tpu.pipeline_mode<synchronous>, transform_indices = @transform_21, window_bounds = array<i64: 32, 64>}, {pipeline_mode = #tpu.pipeline_mode<synchronous>, transform_indices = @transform_22, window_bounds = array<i64: 1, 64>}, {pipeline_mode = #tpu.pipeline_mode<synchronous>, transform_indices = @transform_23, window_bounds = array<i64: 64, 32>}, {pipeline_mode = #tpu.pipeline_mode<synchronous>, transform_indices = @transform_24, window_bounds = array<i64: 1, 32>}, {transform_indices = @transform_25, window_bounds = array<i64: 1, 8, 32>}]} {
    %c0_i32 = arith.constant 0 : i32
    %0 = arith.cmpi eq, %arg1, %c0_i32 : i32
    %1 = arith.extui %0 : i1 to i32
    %c0_i32_0 = arith.constant 0 : i32
    %2 = arith.cmpi ne, %1, %c0_i32_0 : i32
    scf.if %2 {
      %c0_72 = arith.constant 0 : index
      %c0_73 = arith.constant 0 : index
      %c0_74 = arith.constant 0 : index
      %119 = vector.load %arg3[%c0_72, %c0_73, %c0_74] : memref<1x8x32xbf16, #tpu.memory_space<vmem>>, vector<1x8x32xbf16>
      %120 = vector.shape_cast %119 : vector<1x8x32xbf16> to vector<8x32xbf16>
      %c0_75 = arith.constant 0 : index
      %c0_76 = arith.constant 0 : index
      %c0_77 = arith.constant 0 : index
      %121 = vector.load %arg4[%c0_75, %c0_76, %c0_77] : memref<1x8x32xbf16, #tpu.memory_space<vmem>>, vector<1x8x32xbf16>
      %122 = vector.shape_cast %121 : vector<1x8x32xbf16> to vector<8x32xbf16>
      %c0_78 = arith.constant 0 : index
      %c0_79 = arith.constant 0 : index
      %123 = vector.load %arg9[%c0_78, %c0_79] : memref<32x32xbf16, #tpu.memory_space<vmem>>, vector<32x32xbf16>
      %cst_80 = arith.constant dense<0.000000e+00> : vector<8x32xf32>
      %124 = tpu.matmul %120, %123, %cst_80 {dimension_numbers = #tpu.dot_dimension_numbers<[1], [0], [0], [1], [0, 0, 1, 1], [], []>} : vector<8x32xbf16>, vector<32x32xbf16>, vector<8x32xf32> -> vector<8x32xf32>
      %c0_81 = arith.constant 0 : index
      %c0_82 = arith.constant 0 : index
      %125 = vector.load %arg10[%c0_81, %c0_82] : memref<1x32xf32, #tpu.memory_space<vmem>>, vector<1x32xf32>
      %126 = vector.broadcast %125 : vector<1x32xf32> to vector<8x32xf32>
      %127 = arith.addf %124, %126 : vector<8x32xf32>
      %128 = vector.shape_cast %127 : vector<8x32xf32> to vector<8x4x8xf32>
      %129 = tpu.transpose %128, [1, 0, 2] : vector<8x4x8xf32> -> vector<4x8x8xf32>
      %130 = arith.truncf %129 : vector<4x8x8xf32> to vector<4x8x8xbf16>
      %c0_83 = arith.constant 0 : index
      %c0_84 = arith.constant 0 : index
      %c0_85 = arith.constant 0 : index
      %131 = vector.load %arg28[%c0_83, %c0_84, %c0_85] : memref<4x8x8xbf16, #tpu.memory_space<vmem>>, vector<4x8x8xbf16>
      tpu.vector_store %arg28[%c0_83, %c0_84, %c0_85], %130 {strides = array<i32>} : memref<4x8x8xbf16, #tpu.memory_space<vmem>>, vector<4x8x8xbf16>,
      %c0_86 = arith.constant 0 : index
      %c0_87 = arith.constant 0 : index
      %132 = vector.load %arg11[%c0_86, %c0_87] : memref<32x32xbf16, #tpu.memory_space<vmem>>, vector<32x32xbf16>
      %cst_88 = arith.constant dense<0.000000e+00> : vector<8x32xf32>
      %133 = tpu.matmul %120, %132, %cst_88 {dimension_numbers = #tpu.dot_dimension_numbers<[1], [0], [0], [1], [0, 0, 1, 1], [], []>} : vector<8x32xbf16>, vector<32x32xbf16>, vector<8x32xf32> -> vector<8x32xf32>
      %c0_89 = arith.constant 0 : index
      %c0_90 = arith.constant 0 : index
      %134 = vector.load %arg12[%c0_89, %c0_90] : memref<1x32xf32, #tpu.memory_space<vmem>>, vector<1x32xf32>
      %135 = vector.broadcast %134 : vector<1x32xf32> to vector<8x32xf32>
      %136 = arith.addf %133, %135 : vector<8x32xf32>
      %137 = vector.shape_cast %136 : vector<8x32xf32> to vector<8x4x8xf32>
      %138 = tpu.transpose %137, [1, 0, 2] : vector<8x4x8xf32> -> vector<4x8x8xf32>
      %139 = arith.truncf %138 : vector<4x8x8xf32> to vector<4x8x8xbf16>
      %c0_91 = arith.constant 0 : index
      %c0_92 = arith.constant 0 : index
      %c0_93 = arith.constant 0 : index
      %140 = vector.load %arg29[%c0_91, %c0_92, %c0_93] : memref<4x8x8xbf16, #tpu.memory_space<vmem>>, vector<4x8x8xbf16>
      tpu.vector_store %arg29[%c0_91, %c0_92, %c0_93], %139 {strides = array<i32>} : memref<4x8x8xbf16, #tpu.memory_space<vmem>>, vector<4x8x8xbf16>,
      %c0_94 = arith.constant 0 : index
      %c0_95 = arith.constant 0 : index
      %141 = vector.load %arg17[%c0_94, %c0_95] : memref<32x32xbf16, #tpu.memory_space<vmem>>, vector<32x32xbf16>
      %cst_96 = arith.constant dense<0.000000e+00> : vector<8x32xf32>
      %142 = tpu.matmul %122, %141, %cst_96 {dimension_numbers = #tpu.dot_dimension_numbers<[1], [0], [0], [1], [0, 0, 1, 1], [], []>} : vector<8x32xbf16>, vector<32x32xbf16>, vector<8x32xf32> -> vector<8x32xf32>
      %c0_97 = arith.constant 0 : index
      %c0_98 = arith.constant 0 : index
      %143 = vector.load %arg18[%c0_97, %c0_98] : memref<1x32xf32, #tpu.memory_space<vmem>>, vector<1x32xf32>
      %144 = vector.broadcast %143 : vector<1x32xf32> to vector<8x32xf32>
      %145 = arith.addf %142, %144 : vector<8x32xf32>
      %146 = vector.shape_cast %145 : vector<8x32xf32> to vector<8x4x8xf32>
      %147 = tpu.transpose %146, [1, 0, 2] : vector<8x4x8xf32> -> vector<4x8x8xf32>
      %148 = arith.truncf %147 : vector<4x8x8xf32> to vector<4x8x8xbf16>
      %c0_99 = arith.constant 0 : index
      %c0_100 = arith.constant 0 : index
      %c0_101 = arith.constant 0 : index
      %149 = vector.load %arg30[%c0_99, %c0_100, %c0_101] : memref<4x8x8xbf16, #tpu.memory_space<vmem>>, vector<4x8x8xbf16>
      tpu.vector_store %arg30[%c0_99, %c0_100, %c0_101], %148 {strides = array<i32>} : memref<4x8x8xbf16, #tpu.memory_space<vmem>>, vector<4x8x8xbf16>,
      %c0_102 = arith.constant 0 : index
      %c0_103 = arith.constant 0 : index
      %150 = vector.load %arg19[%c0_102, %c0_103] : memref<32x32xbf16, #tpu.memory_space<vmem>>, vector<32x32xbf16>
      %cst_104 = arith.constant dense<0.000000e+00> : vector<8x32xf32>
      %151 = tpu.matmul %122, %150, %cst_104 {dimension_numbers = #tpu.dot_dimension_numbers<[1], [0], [0], [1], [0, 0, 1, 1], [], []>} : vector<8x32xbf16>, vector<32x32xbf16>, vector<8x32xf32> -> vector<8x32xf32>
      %c0_105 = arith.constant 0 : index
      %c0_106 = arith.constant 0 : index
      %152 = vector.load %arg20[%c0_105, %c0_106] : memref<1x32xf32, #tpu.memory_space<vmem>>, vector<1x32xf32>
      %153 = vector.broadcast %152 : vector<1x32xf32> to vector<8x32xf32>
      %154 = arith.addf %151, %153 : vector<8x32xf32>
      %155 = vector.shape_cast %154 : vector<8x32xf32> to vector<8x4x8xf32>
      %156 = tpu.transpose %155, [1, 0, 2] : vector<8x4x8xf32> -> vector<4x8x8xf32>
      %157 = arith.truncf %156 : vector<4x8x8xf32> to vector<4x8x8xbf16>
      %c0_107 = arith.constant 0 : index
      %c0_108 = arith.constant 0 : index
      %c0_109 = arith.constant 0 : index
      %158 = vector.load %arg31[%c0_107, %c0_108, %c0_109] : memref<4x8x8xbf16, #tpu.memory_space<vmem>>, vector<4x8x8xbf16>
      tpu.vector_store %arg31[%c0_107, %c0_108, %c0_109], %157 {strides = array<i32>} : memref<4x8x8xbf16, #tpu.memory_space<vmem>>, vector<4x8x8xbf16>,
    } else {
    }
    %c0 = arith.constant 0 : index
    %c0_1 = arith.constant 0 : index
    %c0_2 = arith.constant 0 : index
    %3 = vector.load %arg2[%c0, %c0_1, %c0_2] : memref<1x8x32xf32, #tpu.memory_space<vmem>>, vector<1x8x32xf32>
    %4 = vector.shape_cast %3 : vector<1x8x32xf32> to vector<8x32xf32>
    %c0_3 = arith.constant 0 : index
    %c0_4 = arith.constant 0 : index
    %c0_5 = arith.constant 0 : index
    %c0_6 = arith.constant 0 : index
    %5 = vector.load %arg5[%c0_3, %c0_4, %c0_5, %c0_6] : memref<1x1x8x8xi8, #tpu.memory_space<vmem>>, vector<1x1x8x8xi8>
    %6 = vector.shape_cast %5 : vector<1x1x8x8xi8> to vector<8x8xi8>
    %7 = arith.extsi %6 : vector<8x8xi8> to vector<8x8xi32>
    %c0_i32_7 = arith.constant 0 : i32
    %8 = vector.broadcast %c0_i32_7 : i32 to vector<8x8xi32>
    %9 = arith.cmpi eq, %7, %8 : vector<8x8xi32>
    %c0_8 = arith.constant 0 : index
    %c0_9 = arith.constant 0 : index
    %c0_10 = arith.constant 0 : index
    %c0_11 = arith.constant 0 : index
    %10 = vector.load %arg6[%c0_8, %c0_9, %c0_10, %c0_11] : memref<1x1x8x8xi8, #tpu.memory_space<vmem>>, vector<1x1x8x8xi8>
    %11 = vector.shape_cast %10 : vector<1x1x8x8xi8> to vector<8x8xi8>
    %12 = arith.extsi %11 : vector<8x8xi8> to vector<8x8xi32>
    %c0_i32_12 = arith.constant 0 : i32
    %13 = vector.broadcast %c0_i32_12 : i32 to vector<8x8xi32>
    %14 = arith.cmpi eq, %12, %13 : vector<8x8xi32>
    %15 = arith.truncf %4 : vector<8x32xf32> to vector<8x32xbf16>
    %c0_13 = arith.constant 0 : index
    %c0_14 = arith.constant 0 : index
    %16 = vector.load %arg7[%c0_13, %c0_14] : memref<32x32xbf16, #tpu.memory_space<vmem>>, vector<32x32xbf16>
    %cst = arith.constant dense<0.000000e+00> : vector<8x32xf32>
    %17 = tpu.matmul %15, %16, %cst {dimension_numbers = #tpu.dot_dimension_numbers<[1], [0], [0], [1], [0, 0, 1, 1], [], []>} : vector<8x32xbf16>, vector<32x32xbf16>, vector<8x32xf32> -> vector<8x32xf32>
    %c0_15 = arith.constant 0 : index
    %c0_16 = arith.constant 0 : index
    %18 = vector.load %arg8[%c0_15, %c0_16] : memref<1x32xf32, #tpu.memory_space<vmem>>, vector<1x32xf32>
    %19 = vector.broadcast %18 : vector<1x32xf32> to vector<8x32xf32>
    %20 = arith.addf %17, %19 : vector<8x32xf32>
    %cst_17 = arith.constant 0.353553385 : f32
    %21 = vector.broadcast %cst_17 : f32 to vector<8x32xf32>
    %22 = arith.mulf %20, %21 : vector<8x32xf32>
    %23 = vector.shape_cast %22 : vector<8x32xf32> to vector<8x4x8xf32>
    %24 = tpu.transpose %23, [1, 0, 2] : vector<8x4x8xf32> -> vector<4x8x8xf32>
    %25 = arith.truncf %24 : vector<4x8x8xf32> to vector<4x8x8xbf16>
    %c0_18 = arith.constant 0 : index
    %c0_19 = arith.constant 0 : index
    %c0_20 = arith.constant 0 : index
    %26 = vector.load %arg28[%c0_18, %c0_19, %c0_20] : memref<4x8x8xbf16, #tpu.memory_space<vmem>>, vector<4x8x8xbf16>
    "tpu.trace_start"() <{level = 10 : i32, message = "hqd,hkd->hqk"}> : () -> ()
    %cst_21 = arith.constant dense<0.000000e+00> : vector<4x8x8xf32>
    %27 = tpu.matmul %25, %26, %cst_21 {dimension_numbers = #tpu.dot_dimension_numbers<[2], [2], [1], [1], [0, 0, 0, 1, 1, 1], [0], [0]>} : vector<4x8x8xbf16>, vector<4x8x8xbf16>, vector<4x8x8xf32> -> vector<4x8x8xf32>
    "tpu.trace_stop"() : () -> ()
    %28 = vector.shape_cast %9 : vector<8x8xi1> to vector<1x8x8xi1>
    %cst_22 = arith.constant -9.99999971E-10 : f32
    %29 = vector.shape_cast %28 : vector<1x8x8xi1> to vector<1x8x8xi1>
    %30 = vector.broadcast %29 : vector<1x8x8xi1> to vector<4x8x8xi1>
    %31 = vector.broadcast %cst_22 : f32 to vector<4x8x8xf32>
    %32 = arith.select %30, %31, %27 : vector<4x8x8xi1>, vector<4x8x8xf32>
    %cst_23 = arith.constant dense<0xFF800000> : vector<4x8xf32>
    %33 = vector.multi_reduction <maximumf>, %32, %cst_23 [2] : vector<4x8x8xf32> to vector<4x8xf32>
    %34 = vector.shape_cast %33 : vector<4x8xf32> to vector<4x8x1xf32>
    %35 = vector.broadcast %34 : vector<4x8x1xf32> to vector<4x8x8xf32>
    %36 = arith.subf %32, %35 : vector<4x8x8xf32>
    %37 = math.exp %36 : vector<4x8x8xf32>
    %cst_24 = arith.constant dense<0.000000e+00> : vector<4x8xf32>
    %38 = vector.multi_reduction <add>, %37, %cst_24 [2] : vector<4x8x8xf32> to vector<4x8xf32>
    %39 = vector.shape_cast %38 : vector<4x8xf32> to vector<4x8x1xf32>
    %40 = tpu.reciprocal %39 {approx = true} : vector<4x8x1xf32> -> vector<4x8x1xf32>
    %41 = vector.broadcast %40 : vector<4x8x1xf32> to vector<4x8x8xf32>
    %42 = arith.mulf %37, %41 : vector<4x8x8xf32>
    %43 = arith.truncf %42 : vector<4x8x8xf32> to vector<4x8x8xbf16>
    %c0_25 = arith.constant 0 : index
    %c0_26 = arith.constant 0 : index
    %c0_27 = arith.constant 0 : index
    %44 = vector.load %arg29[%c0_25, %c0_26, %c0_27] : memref<4x8x8xbf16, #tpu.memory_space<vmem>>, vector<4x8x8xbf16>
    "tpu.trace_start"() <{level = 10 : i32, message = "hqk,hkd->qhd"}> : () -> ()
    %cst_28 = arith.constant dense<0.000000e+00> : vector<4x8x8xf32>
    %45 = tpu.matmul %44, %43, %cst_28 {dimension_numbers = #tpu.dot_dimension_numbers<[1], [2], [2], [1], [0, 0, 0, 2, 1, 1], [0], [0]>} : vector<4x8x8xbf16>, vector<4x8x8xbf16>, vector<4x8x8xf32> -> vector<4x8x8xf32>
    %46 = tpu.transpose %45, [2, 0, 1] : vector<4x8x8xf32> -> vector<8x4x8xf32>
    "tpu.trace_stop"() : () -> ()
    %47 = vector.shape_cast %46 : vector<8x4x8xf32> to vector<8x32xf32>
    %48 = arith.truncf %47 : vector<8x32xf32> to vector<8x32xbf16>
    %c0_29 = arith.constant 0 : index
    %c0_30 = arith.constant 0 : index
    %49 = vector.load %arg13[%c0_29, %c0_30] : memref<32x32xbf16, #tpu.memory_space<vmem>>, vector<32x32xbf16>
    %cst_31 = arith.constant dense<0.000000e+00> : vector<8x32xf32>
    %50 = tpu.matmul %48, %49, %cst_31 {dimension_numbers = #tpu.dot_dimension_numbers<[1], [0], [0], [1], [0, 0, 1, 1], [], []>} : vector<8x32xbf16>, vector<32x32xbf16>, vector<8x32xf32> -> vector<8x32xf32>
    %c0_32 = arith.constant 0 : index
    %c0_33 = arith.constant 0 : index
    %51 = vector.load %arg14[%c0_32, %c0_33] : memref<1x32xf32, #tpu.memory_space<vmem>>, vector<1x32xf32>
    %52 = vector.broadcast %51 : vector<1x32xf32> to vector<8x32xf32>
    %53 = arith.addf %50, %52 : vector<8x32xf32>
    %54 = arith.addf %4, %53 : vector<8x32xf32>
    %55 = arith.truncf %54 : vector<8x32xf32> to vector<8x32xbf16>
    %c0_34 = arith.constant 0 : index
    %c0_35 = arith.constant 0 : index
    %56 = vector.load %arg15[%c0_34, %c0_35] : memref<32x32xbf16, #tpu.memory_space<vmem>>, vector<32x32xbf16>
    %cst_36 = arith.constant dense<0.000000e+00> : vector<8x32xf32>
    %57 = tpu.matmul %55, %56, %cst_36 {dimension_numbers = #tpu.dot_dimension_numbers<[1], [0], [0], [1], [0, 0, 1, 1], [], []>} : vector<8x32xbf16>, vector<32x32xbf16>, vector<8x32xf32> -> vector<8x32xf32>
    %c0_37 = arith.constant 0 : index
    %c0_38 = arith.constant 0 : index
    %58 = vector.load %arg16[%c0_37, %c0_38] : memref<1x32xf32, #tpu.memory_space<vmem>>, vector<1x32xf32>
    %59 = vector.broadcast %58 : vector<1x32xf32> to vector<8x32xf32>
    %60 = arith.addf %57, %59 : vector<8x32xf32>
    %cst_39 = arith.constant 0.353553385 : f32
    %61 = vector.broadcast %cst_39 : f32 to vector<8x32xf32>
    %62 = arith.mulf %60, %61 : vector<8x32xf32>
    %63 = vector.shape_cast %62 : vector<8x32xf32> to vector<8x4x8xf32>
    %64 = tpu.transpose %63, [1, 0, 2] : vector<8x4x8xf32> -> vector<4x8x8xf32>
    %65 = arith.truncf %64 : vector<4x8x8xf32> to vector<4x8x8xbf16>
    %c0_40 = arith.constant 0 : index
    %c0_41 = arith.constant 0 : index
    %c0_42 = arith.constant 0 : index
    %66 = vector.load %arg30[%c0_40, %c0_41, %c0_42] : memref<4x8x8xbf16, #tpu.memory_space<vmem>>, vector<4x8x8xbf16>
    "tpu.trace_start"() <{level = 10 : i32, message = "hqd,hkd->hqk"}> : () -> ()
    %cst_43 = arith.constant dense<0.000000e+00> : vector<4x8x8xf32>
    %67 = tpu.matmul %65, %66, %cst_43 {dimension_numbers = #tpu.dot_dimension_numbers<[2], [2], [1], [1], [0, 0, 0, 1, 1, 1], [0], [0]>} : vector<4x8x8xbf16>, vector<4x8x8xbf16>, vector<4x8x8xf32> -> vector<4x8x8xf32>
    "tpu.trace_stop"() : () -> ()
    %68 = vector.shape_cast %14 : vector<8x8xi1> to vector<1x8x8xi1>
    %cst_44 = arith.constant -9.99999971E-10 : f32
    %69 = vector.shape_cast %68 : vector<1x8x8xi1> to vector<1x8x8xi1>
    %70 = vector.broadcast %69 : vector<1x8x8xi1> to vector<4x8x8xi1>
    %71 = vector.broadcast %cst_44 : f32 to vector<4x8x8xf32>
    %72 = arith.select %70, %71, %67 : vector<4x8x8xi1>, vector<4x8x8xf32>
    %cst_45 = arith.constant dense<0xFF800000> : vector<4x8xf32>
    %73 = vector.multi_reduction <maximumf>, %72, %cst_45 [2] : vector<4x8x8xf32> to vector<4x8xf32>
    %74 = vector.shape_cast %73 : vector<4x8xf32> to vector<4x8x1xf32>
    %75 = vector.broadcast %74 : vector<4x8x1xf32> to vector<4x8x8xf32>
    %76 = arith.subf %72, %75 : vector<4x8x8xf32>
    %77 = math.exp %76 : vector<4x8x8xf32>
    %cst_46 = arith.constant dense<0.000000e+00> : vector<4x8xf32>
    %78 = vector.multi_reduction <add>, %77, %cst_46 [2] : vector<4x8x8xf32> to vector<4x8xf32>
    %79 = vector.shape_cast %78 : vector<4x8xf32> to vector<4x8x1xf32>
    %80 = tpu.reciprocal %79 {approx = true} : vector<4x8x1xf32> -> vector<4x8x1xf32>
    %81 = vector.broadcast %80 : vector<4x8x1xf32> to vector<4x8x8xf32>
    %82 = arith.mulf %77, %81 : vector<4x8x8xf32>
    %83 = arith.truncf %82 : vector<4x8x8xf32> to vector<4x8x8xbf16>
    %c0_47 = arith.constant 0 : index
    %c0_48 = arith.constant 0 : index
    %c0_49 = arith.constant 0 : index
    %84 = vector.load %arg31[%c0_47, %c0_48, %c0_49] : memref<4x8x8xbf16, #tpu.memory_space<vmem>>, vector<4x8x8xbf16>
    "tpu.trace_start"() <{level = 10 : i32, message = "hqk,hkd->qhd"}> : () -> ()
    %cst_50 = arith.constant dense<0.000000e+00> : vector<4x8x8xf32>
    %85 = tpu.matmul %84, %83, %cst_50 {dimension_numbers = #tpu.dot_dimension_numbers<[1], [2], [2], [1], [0, 0, 0, 2, 1, 1], [0], [0]>} : vector<4x8x8xbf16>, vector<4x8x8xbf16>, vector<4x8x8xf32> -> vector<4x8x8xf32>
    %86 = tpu.transpose %85, [2, 0, 1] : vector<4x8x8xf32> -> vector<8x4x8xf32>
    "tpu.trace_stop"() : () -> ()
    %87 = vector.shape_cast %86 : vector<8x4x8xf32> to vector<8x32xf32>
    %88 = arith.truncf %87 : vector<8x32xf32> to vector<8x32xbf16>
    %c0_51 = arith.constant 0 : index
    %c0_52 = arith.constant 0 : index
    %89 = vector.load %arg21[%c0_51, %c0_52] : memref<32x32xbf16, #tpu.memory_space<vmem>>, vector<32x32xbf16>
    %cst_53 = arith.constant dense<0.000000e+00> : vector<8x32xf32>
    %90 = tpu.matmul %88, %89, %cst_53 {dimension_numbers = #tpu.dot_dimension_numbers<[1], [0], [0], [1], [0, 0, 1, 1], [], []>} : vector<8x32xbf16>, vector<32x32xbf16>, vector<8x32xf32> -> vector<8x32xf32>
    %c0_54 = arith.constant 0 : index
    %c0_55 = arith.constant 0 : index
    %91 = vector.load %arg22[%c0_54, %c0_55] : memref<1x32xf32, #tpu.memory_space<vmem>>, vector<1x32xf32>
    %92 = vector.broadcast %91 : vector<1x32xf32> to vector<8x32xf32>
    %93 = arith.addf %90, %92 : vector<8x32xf32>
    %94 = arith.addf %54, %93 : vector<8x32xf32>
    %95 = arith.truncf %94 : vector<8x32xf32> to vector<8x32xbf16>
    %c0_56 = arith.constant 0 : index
    %c0_57 = arith.constant 0 : index
    %96 = vector.load %arg23[%c0_56, %c0_57] : memref<32x64xbf16, #tpu.memory_space<vmem>>, vector<32x64xbf16>
    %cst_58 = arith.constant dense<0.000000e+00> : vector<8x64xf32>
    %97 = tpu.matmul %95, %96, %cst_58 {dimension_numbers = #tpu.dot_dimension_numbers<[1], [0], [0], [1], [0, 0, 1, 1], [], []>} : vector<8x32xbf16>, vector<32x64xbf16>, vector<8x64xf32> -> vector<8x64xf32>
    %c0_59 = arith.constant 0 : index
    %c0_60 = arith.constant 0 : index
    %98 = vector.load %arg24[%c0_59, %c0_60] : memref<1x64xf32, #tpu.memory_space<vmem>>, vector<1x64xf32>
    %99 = vector.broadcast %98 : vector<1x64xf32> to vector<8x64xf32>
    %100 = arith.addf %97, %99 : vector<8x64xf32>
    %cst_61 = arith.constant 5.000000e-01 : f32
    %101 = vector.broadcast %cst_61 : f32 to vector<8x64xf32>
    %102 = arith.mulf %101, %100 : vector<8x64xf32>
    %cst_62 = arith.constant 0.707106769 : f32
    %103 = vector.broadcast %cst_62 : f32 to vector<8x64xf32>
    %104 = arith.mulf %100, %103 : vector<8x64xf32>
    %105 = math.erf %104 : vector<8x64xf32>
    %cst_63 = arith.constant 1.000000e+00 : f32
    %106 = vector.broadcast %cst_63 : f32 to vector<8x64xf32>
    %107 = arith.addf %106, %105 : vector<8x64xf32>
    %108 = arith.mulf %102, %107 : vector<8x64xf32>
    %109 = arith.truncf %108 : vector<8x64xf32> to vector<8x64xbf16>
    %c0_64 = arith.constant 0 : index
    %c0_65 = arith.constant 0 : index
    %110 = vector.load %arg25[%c0_64, %c0_65] : memref<64x32xbf16, #tpu.memory_space<vmem>>, vector<64x32xbf16>
    %cst_66 = arith.constant dense<0.000000e+00> : vector<8x32xf32>
    %111 = tpu.matmul %109, %110, %cst_66 {dimension_numbers = #tpu.dot_dimension_numbers<[1], [0], [0], [1], [0, 0, 1, 1], [], []>} : vector<8x64xbf16>, vector<64x32xbf16>, vector<8x32xf32> -> vector<8x32xf32>
    %c0_67 = arith.constant 0 : index
    %c0_68 = arith.constant 0 : index
    %112 = vector.load %arg26[%c0_67, %c0_68] : memref<1x32xf32, #tpu.memory_space<vmem>>, vector<1x32xf32>
    %113 = vector.broadcast %112 : vector<1x32xf32> to vector<8x32xf32>
    %114 = arith.addf %111, %113 : vector<8x32xf32>
    %115 = arith.addf %114, %94 : vector<8x32xf32>
    %c0_69 = arith.constant 0 : index
    %c0_70 = arith.constant 0 : index
    %c0_71 = arith.constant 0 : index
    %116 = vector.load %arg27[%c0_69, %c0_70, %c0_71] : memref<1x8x32xf32, #tpu.memory_space<vmem>>, vector<1x8x32xf32>
    %117 = vector.shape_cast %116 : vector<1x8x32xf32> to vector<8x32xf32>
    %118 = vector.shape_cast %115 : vector<8x32xf32> to vector<1x8x32xf32>
    tpu.vector_store %arg27[%c0_69, %c0_70, %c0_71], %118 {strides = array<i32>} : memref<1x8x32xf32, #tpu.memory_space<vmem>>, vector<1x8x32xf32>,
    return
  }
  func.func @transform_0(%arg0: i32, %arg1: i32) -> (i32, i32, i32) {
    %c0_i32 = arith.constant 0 : i32
    %c0_i32_0 = arith.constant 0 : i32
    return %arg0, %arg1, %c0_i32 : i32, i32, i32
  }
  func.func @transform_1(%arg0: i32, %arg1: i32) -> (i32, i32, i32) {
    %c0_i32 = arith.constant 0 : i32
    %c0_i32_0 = arith.constant 0 : i32
    %c0_i32_1 = arith.constant 0 : i32
    return %arg0, %c0_i32, %c0_i32_0 : i32, i32, i32
  }
  func.func @transform_2(%arg0: i32, %arg1: i32) -> (i32, i32, i32) {
    %c0_i32 = arith.constant 0 : i32
    %c0_i32_0 = arith.constant 0 : i32
    %c0_i32_1 = arith.constant 0 : i32
    return %arg0, %c0_i32, %c0_i32_0 : i32, i32, i32
  }
  func.func @transform_3(%arg0: i32, %arg1: i32) -> (i32, i32, i32, i32) {
    %c0_i32 = arith.constant 0 : i32
    %c0_i32_0 = arith.constant 0 : i32
    %c0_i32_1 = arith.constant 0 : i32
    return %arg0, %c0_i32, %arg1, %c0_i32_0 : i32, i32, i32, i32
  }
  func.func @transform_4(%arg0: i32, %arg1: i32) -> (i32, i32, i32, i32) {
    %c0_i32 = arith.constant 0 : i32
    %c0_i32_0 = arith.constant 0 : i32
    %c0_i32_1 = arith.constant 0 : i32
    return %arg0, %c0_i32, %arg1, %c0_i32_0 : i32, i32, i32, i32
  }
  func.func @transform_5(%arg0: i32, %arg1: i32) -> (i32, i32) {
    %c0_i32 = arith.constant 0 : i32
    %c0_i32_0 = arith.constant 0 : i32
    %c0_i32_1 = arith.constant 0 : i32
    return %c0_i32, %c0_i32_0 : i32, i32
  }
  func.func @transform_6(%arg0: i32, %arg1: i32) -> (i32, i32) {
    %c0_i32 = arith.constant 0 : i32
    %c0_i32_0 = arith.constant 0 : i32
    %c0_i32_1 = arith.constant 0 : i32
    return %c0_i32, %c0_i32_0 : i32, i32
  }
  func.func @transform_7(%arg0: i32, %arg1: i32) -> (i32, i32) {
    %c0_i32 = arith.constant 0 : i32
    %c0_i32_0 = arith.constant 0 : i32
    %c0_i32_1 = arith.constant 0 : i32
    return %c0_i32, %c0_i32_0 : i32, i32
  }
  func.func @transform_8(%arg0: i32, %arg1: i32) -> (i32, i32) {
    %c0_i32 = arith.constant 0 : i32
    %c0_i32_0 = arith.constant 0 : i32
    %c0_i32_1 = arith.constant 0 : i32
    return %c0_i32, %c0_i32_0 : i32, i32
  }
  func.func @transform_9(%arg0: i32, %arg1: i32) -> (i32, i32) {
    %c0_i32 = arith.constant 0 : i32
    %c0_i32_0 = arith.constant 0 : i32
    %c0_i32_1 = arith.constant 0 : i32
    return %c0_i32, %c0_i32_0 : i32, i32
  }
  func.func @transform_10(%arg0: i32, %arg1: i32) -> (i32, i32) {
    %c0_i32 = arith.constant 0 : i32
    %c0_i32_0 = arith.constant 0 : i32
    %c0_i32_1 = arith.constant 0 : i32
    return %c0_i32, %c0_i32_0 : i32, i32
  }
  func.func @transform_11(%arg0: i32, %arg1: i32) -> (i32, i32) {
    %c0_i32 = arith.constant 0 : i32
    %c0_i32_0 = arith.constant 0 : i32
    %c0_i32_1 = arith.constant 0 : i32
    return %c0_i32, %c0_i32_0 : i32, i32
  }
  func.func @transform_12(%arg0: i32, %arg1: i32) -> (i32, i32) {
    %c0_i32 = arith.constant 0 : i32
    %c0_i32_0 = arith.constant 0 : i32
    %c0_i32_1 = arith.constant 0 : i32
    return %c0_i32, %c0_i32_0 : i32, i32
  }
  func.func @transform_13(%arg0: i32, %arg1: i32) -> (i32, i32) {
    %c0_i32 = arith.constant 0 : i32
    %c0_i32_0 = arith.constant 0 : i32
    %c0_i32_1 = arith.constant 0 : i32
    return %c0_i32, %c0_i32_0 : i32, i32
  }
  func.func @transform_14(%arg0: i32, %arg1: i32) -> (i32, i32) {
    %c0_i32 = arith.constant 0 : i32
    %c0_i32_0 = arith.constant 0 : i32
    %c0_i32_1 = arith.constant 0 : i32
    return %c0_i32, %c0_i32_0 : i32, i32
  }
  func.func @transform_15(%arg0: i32, %arg1: i32) -> (i32, i32) {
    %c0_i32 = arith.constant 0 : i32
    %c0_i32_0 = arith.constant 0 : i32
    %c0_i32_1 = arith.constant 0 : i32
    return %c0_i32, %c0_i32_0 : i32, i32
  }
  func.func @transform_16(%arg0: i32, %arg1: i32) -> (i32, i32) {
    %c0_i32 = arith.constant 0 : i32
    %c0_i32_0 = arith.constant 0 : i32
    %c0_i32_1 = arith.constant 0 : i32
    return %c0_i32, %c0_i32_0 : i32, i32
  }
  func.func @transform_17(%arg0: i32, %arg1: i32) -> (i32, i32) {
    %c0_i32 = arith.constant 0 : i32
    %c0_i32_0 = arith.constant 0 : i32
    %c0_i32_1 = arith.constant 0 : i32
    return %c0_i32, %c0_i32_0 : i32, i32
  }
  func.func @transform_18(%arg0: i32, %arg1: i32) -> (i32, i32) {
    %c0_i32 = arith.constant 0 : i32
    %c0_i32_0 = arith.constant 0 : i32
    %c0_i32_1 = arith.constant 0 : i32
    return %c0_i32, %c0_i32_0 : i32, i32
  }
  func.func @transform_19(%arg0: i32, %arg1: i32) -> (i32, i32) {
    %c0_i32 = arith.constant 0 : i32
    %c0_i32_0 = arith.constant 0 : i32
    %c0_i32_1 = arith.constant 0 : i32
    return %c0_i32, %c0_i32_0 : i32, i32
  }
  func.func @transform_20(%arg0: i32, %arg1: i32) -> (i32, i32) {
    %c0_i32 = arith.constant 0 : i32
    %c0_i32_0 = arith.constant 0 : i32
    %c0_i32_1 = arith.constant 0 : i32
    return %c0_i32, %c0_i32_0 : i32, i32
  }
  func.func @transform_21(%arg0: i32, %arg1: i32) -> (i32, i32) {
    %c0_i32 = arith.constant 0 : i32
    %c0_i32_0 = arith.constant 0 : i32
    %c0_i32_1 = arith.constant 0 : i32
    return %c0_i32, %c0_i32_0 : i32, i32
  }
  func.func @transform_22(%arg0: i32, %arg1: i32) -> (i32, i32) {
    %c0_i32 = arith.constant 0 : i32
    %c0_i32_0 = arith.constant 0 : i32
    %c0_i32_1 = arith.constant 0 : i32
    return %c0_i32, %c0_i32_0 : i32, i32
  }
  func.func @transform_23(%arg0: i32, %arg1: i32) -> (i32, i32) {
    %c0_i32 = arith.constant 0 : i32
    %c0_i32_0 = arith.constant 0 : i32
    %c0_i32_1 = arith.constant 0 : i32
    return %c0_i32, %c0_i32_0 : i32, i32
  }
  func.func @transform_24(%arg0: i32, %arg1: i32) -> (i32, i32) {
    %c0_i32 = arith.constant 0 : i32
    %c0_i32_0 = arith.constant 0 : i32
    %c0_i32_1 = arith.constant 0 : i32
    return %c0_i32, %c0_i32_0 : i32, i32
  }
  func.func @transform_25(%arg0: i32, %arg1: i32) -> (i32, i32, i32) {
    %c0_i32 = arith.constant 0 : i32
    %c0_i32_0 = arith.constant 0 : i32
    return %arg0, %arg1, %c0_i32 : i32, i32, i32
  }
}

</mosaic_0001>

<bundles_post_ra>
// kernel: tpu_custom_call.1
= control target key start
LH: loop header
LB: loop body
LE: loop exit
PB: predicated region body
PF: predicated region fallthrough
CT: control target
= control target key end

     0   :  { %s6660_s0 = inlined_call_operand.vmem [shape: f32[2,8,32], index: 0, kind: input, shape index: {}]   ;;  %s6661_s1 = inlined_call_operand.hbm [shape: bf16[2,8,32], index: 1, kind: input, shape index: {}]   ;;  %s6662_s2 = inlined_call_operand.hbm [shape: bf16[2,8,32], index: 2, kind: input, shape index: {}]   ;;  %s6663_s3 = inlined_call_operand.hbm [shape: s8[2,1,8,8], index: 3, kind: input, shape index: {}]   ;;  %s6664_s4 = inlined_call_operand.hbm [shape: s8[2,1,8,8], index: 4, kind: input, shape index: {}]   ;;  %s6665_s5 = inlined_call_operand.vmem [shape: bf16[32,32], index: 5, kind: input, shape index: {}]   ;;  %s6666_s6 = inlined_call_operand.hbm [shape: f32[1,32], index: 6, kind: input, shape index: {}]   ;;  %s6667_s7 = inlined_call_operand.vmem [shape: bf16[32,32], index: 7, kind: input, shape index: {}]   ;;  %s6668_s8 = inlined_call_operand.hbm [shape: f32[1,32], index: 8, kind: input, shape index: {}]   ;;  %s6669_s9 = inlined_call_operand.vmem [shape: bf16[32,32], index: 9, kind: input, shape index: {}]   ;;  %s6670_s10 = inlined_call_operand.hbm [shape: f32[1,32], index: 10, kind: input, shape index: {}]   ;;  %s6671_s11 = inlined_call_operand.hbm [shape: bf16[32,32], index: 11, kind: input, shape index: {}]   ;;  %s6672_s12 = inlined_call_operand.hbm [shape: f32[1,32], index: 12, kind: input, shape index: {}]   ;;  %s6673_s13 = inlined_call_operand.hbm [shape: bf16[32,32], index: 13, kind: input, shape index: {}]   ;;  %s6674_s14 = inlined_call_operand.hbm [shape: f32[1,32], index: 14, kind: input, shape index: {}]   ;;  %s6675_s15 = inlined_call_operand.hbm [shape: bf16[32,32], index: 15, kind: input, shape index: {}]   ;;  %s6676_s16 = inlined_call_operand.hbm [shape: f32[1,32], index: 16, kind: input, shape index: {}]   ;;  %s6677_s17 = inlined_call_operand.hbm [shape: bf16[32,32], index: 17, kind: input, shape index: {}]   ;;  %s6678_s18 = inlined_call_operand.hbm [shape: f32[1,32], index: 18, kind: input, shape index: {}]   ;;  %s6679_s19 = inlined_call_operand.vmem [shape: bf16[32,32], index: 19, kind: input, shape index: {}]   ;;  %s6680_s20 = inlined_call_operand.vmem [shape: f32[1,32], index: 20, kind: input, shape index: {}]   ;;  %s6681_s21 = inlined_call_operand.hbm [shape: bf16[32,64], index: 21, kind: input, shape index: {}]   ;;  %s6682_s22 = inlined_call_operand.vmem [shape: f32[1,64], index: 22, kind: input, shape index: {}]   ;;  %s6683_s23 = inlined_call_operand.vmem [shape: bf16[64,32], index: 23, kind: input, shape index: {}]   ;;  %s6684_s24 = inlined_call_operand.vmem [shape: f32[1,32], index: 24, kind: input, shape index: {}]   ;;  %s6685_s25 = inlined_call_operand.hbm [shape: f32[2,8,32], index: 25, kind: output, shape index: {}]  }
   0x1   :  { %6713 = sst [smem:[#allocation49_spill]] %s6660_s0 }
   0x2   :  { %6714 = sst [smem:[#allocation50_spill]] %s6661_s1 }
   0x3   :  { %6715 = sst [smem:[#allocation51_spill]] %s6662_s2 }
   0x4   :  { %6716 = sst [smem:[#allocation52_spill]] %s6663_s3 }
   0x5   :  { %6717 = sst [smem:[#allocation53_spill]] %s6664_s4 }
   0x6   :  { %6718 = sst [smem:[#allocation54_spill]] %s6665_s5 }
   0x7   :  { %6719 = sst [smem:[#allocation55_spill]] %s6666_s6 }
   0x8   :  { %6720 = sst [smem:[#allocation56_spill]] %s6667_s7 }
   0x9   :  { %6721 = sst [smem:[#allocation57_spill]] %s6668_s8 }
   0xa   :  { %6722 = sst [smem:[#allocation58_spill]] %s6669_s9 }
   0xb   :  { %6723 = sst [smem:[#allocation59_spill]] %s6671_s11 }
   0xc   :  { %6724 = sst [smem:[#allocation60_spill]] %s6673_s13 }
   0xd   :  { %6725 = sst [smem:[#allocation61_spill]] %s6675_s15 }
   0xe   :  { %6726 = sst [smem:[#allocation62_spill]] %s6677_s17 }
   0xf   :  { %6727 = sst [smem:[#allocation63_spill]] %s6679_s19 }
  0x10   :  { %6728 = sst [smem:[#allocation64_spill]] %s6680_s20 }
  0x11   :  { %6729 = sst [smem:[#allocation65_spill]] %s6682_s22 }
  0x12   :  { %6730 = sst [smem:[#allocation66_spill]] %s6683_s23 }
  0x13   :  { %6731 = sst [smem:[#allocation67_spill]] %s6684_s24 }
  0x14   :  { %6732 = sst [smem:[#allocation68_spill]] %s6685_s25 }
  0x15   :  { %30 = vsyncpa [#allocation7], 0 }
  0x16   :  { %31 = vsyncpa [#allocation10], 0 }
  0x17   :  { %32 = vsyncpa [#allocation15], 0 }
  0x18   :  { %33 = vsyncpa [#allocation18], 0 }
  0x19   :  { %34 = vsyncpa [#allocation21], 0 }
  0x1a   :  { %35 = vsyncpa [#allocation24], 0 }
  0x1b   :  { %36 = vsyncpa [#allocation27], 0 }
  0x1c   :  { %37 = vsyncpa [#allocation30], 0 }
  0x1d   :  { %38 = vsyncpa [#allocation8], 0 }
  0x1e   :  { %40 = vsyncpa [#allocation8 + $0x1], 0  ;;  %s5828_s29 = smov 0   ;;  %s5830_s2 = smov 0  }
  0x1f   :  { %s5832_s6 = smov 0   ;;  %s5834_s30 = smov 0  }
  0x20   :  { %s5836_s7 = smov 0   ;;  %s5838_s3 = smov 0  }
  0x21 LB: > { %6733 = sst [smem:[#allocation43_spill]] %s5647_s29  ;;  %s5859_s26 = sadd.s32 4294967295, %s5667_s3   ;;  %s5667_s3 = sphi %s5838_s3, %s46_s3   ;;  %s5663_s7 = sphi %s5836_s7, %s6810_s7   ;;  %s5659_s30 = sphi %s5834_s30, %s6809_s30   ;;  %s5655_s6 = sphi %s5832_s6, %s6808_s6   ;;  %s5651_s2 = sphi %s5830_s2, %s6807_s2   ;;  %s5647_s29 = sphi %s5828_s29, %s6806_s29  }
  0x22   : > { %6734 = sst [smem:[#allocation44_spill]] %s5651_s2  ;;  %s4498_s1 = sadd.s32 4294967294, %s5667_s3  }
  0x23   : > { %6735 = sst [smem:[#allocation45_spill]] %s5659_s30  ;;  %p106_p0 = scmp.ne.s32.totalorder %s5651_s2, %s5647_s29 }
  0x24   : > { %6736 = sst [smem:[#allocation46_spill]] %s5859_s26  ;;  %p6703_p1 = scmp.eq.s32.totalorder %s5859_s26, 0 }
  0x25   : > { %p154_p2 = scmp.ne.s32.totalorder %s5655_s6, %s5651_s2  ;;  %p155_p3 = scmp.eq.s32.totalorder %s5667_s3, 0 }
  0x26   : > { %p634_p4 = scmp.eq.s32.totalorder %s5859_s26, 1  ;;  %p5872_p5 = por %p6703_p1, %p106_p0 }
  0x27   : > { %p640_p6 = scmp.eq.s32.totalorder %s4498_s1, 1  ;;  %p5876_p7 = por %p155_p3, %p154_p2 }
  0x28   : > { %s6737_s27 = scalar_select %p5872_p5, 1, 0 }
  0x29   : > { %s6738_s4 = scalar_select %p5876_p7, 1, 0 }
  0x2a   : > { %p5880_p8 = por %p634_p4, %p154_p2  ;;  %p5884_p9 = por %p640_p6, %p106_p0 }
  0x2b   : > { %p4499_p10 = scmp.ge.s32.totalorder %s5667_s3, 1  ;;  %p647_p11 = scmp.lt.s32.totalorder %s5667_s3, 3 }
  0x2c   : > { %s6739_s28 = scalar_select %p5880_p8, 1, 0 }
  0x2d   : > { %s6741_s9 = scalar_select %p5884_p9, 1, 0 }
  0x2e   : > { %6740 = sst [smem:[#allocation47_spill]] %s6739_s28  ;;  %s4500_s5 = sshll.u32 %s5659_s30, 6 }
  0x2f   : > { %6742 = sst [smem:[#allocation48_spill]] %s6741_s9  ;;  %p5896_p12 = pnand %p4499_p10, %p647_p11 }
  0x30   : > { %s6743_s29 = sld [smem:[#allocation50_spill]]  ;;  %s5669_s28 = smov [#allocation6]  }
  0x31   : > { %s6745_s24 = scalar_select %p5896_p12, 1, 0 }
  0x32   : > { %s662_s22 = sshll.u32 %s5669_s28, 4  ;;  %p4916_p13 = pneg %p5896_p12  ;;  %s663_s22 = int_to_ptr.vmem [resolvable:$true] %s662_s22 }
  0x33   : > { %s6746_s20 = sld [smem:[#allocation51_spill]]  ;;  %s5670_s28 = smov [#allocation9]  }
  0x34   : > { %p5910_p2 = pnand %p4916_p13, %p5872_p5  ;;  %p5916_p3 = pnand %p4916_p13, %p6703_p1 }
  0x35   : > { %s675_s19 = sshll.u32 %s5670_s28, 4  ;;  %s676_s19 = int_to_ptr.vmem [resolvable:$true] %s675_s19 }
  0x36   : > { %s6744_s25 = smov %s6743_s29  ;;  %s5894_s1 = scalar_lea.hbm %s6743_s29, %s4500_s5 }
  0x37   : > { %s6748_s0 = scalar_select %p5916_p3, 1, 0 }
  0x38   : > { %s5127_s30 = scalar_lea.hbm %s5894_s1, 64  ;;  %p5129_p6 = pneg %p5910_p2 }
  0x39   : > { %s5906_s8 = scalar_lea.hbm %s6746_s20, %s4500_s5  ;;  %p5128_p4 = scmp.ne.s32.totalorder %s5894_s1, %s5127_s30 }
  0x3a   : > { %s5132_s5 = scalar_lea.hbm %s6744_s25, 128  ;;  %p5133_p13 = scmp.lt.s32.totalorder %s5894_s1, %s6744_s25 }
  0x3b   : > { %p5130_p10 = pnand %p5129_p6, %p5128_p4  ;;  %p5134_p0 = scmp.lt.s32.totalorder %s5132_s5, %s5127_s30 }
  0x3d   : > { %p5131_p11 = pneg %p5130_p10  ;;  %p5135_p1 = por %p5134_p0, %p5133_p13 }
  0x3f   : > { %p5136_p9 = pnand %p5135_p1, %p5131_p11 }
  0x41   : > { %5139 = shalt.err (!%p5136_p9)
}
  0x42   : > { %s5140_s28 = scalar_lea.vmem %s663_s22, 64  ;;  %p5148_p10 = scmp.lt.s32.totalorder %s663_s22, %s663_s22 }
  0x43   : > { %p5141_p8 = scmp.ne.s32.totalorder %s663_s22, %s5140_s28  ;;  %p5149_p12 = scmp.lt.s32.totalorder %s5140_s28, %s5140_s28 }
  0x45   : > { %p5143_p5 = pnand %p5141_p8, %p5129_p6  ;;  %p5150_p7 = por %p5149_p12, %p5148_p10 }
  0x47   : > { %p5144_p4 = pneg %p5143_p5 }
  0x49   : > { %p5151_p3 = pnand %p5150_p7, %p5144_p4 }
  0x4b   : > { %5154 = shalt.err (!%p5151_p3)
}
  0x4c   : > { %4919 = dma.hbm_to_vmem [thread:$0]  (!%p5910_p2), %s5894_s1, 64, %s663_s22, [#allocation7]  }
  0x4d   : > { %s5671_s2 = smov [#allocation14]   ;;  %s5155_s26 = scalar_lea.hbm %s5906_s8, 64 }
  0x4e   : > { %s703_s30 = sshll.u32 %s5671_s2, 4  ;;  %p5156_p1 = scmp.ne.s32.totalorder %s5906_s8, %s5155_s26  ;;  %s704_s30 = int_to_ptr.vmem [resolvable:$true] %s703_s30 }
  0x4f   : > { %s5160_s5 = scalar_lea.hbm %s6746_s20, 128  ;;  %p5161_p7 = scmp.lt.s32.totalorder %s5906_s8, %s6746_s20 }
  0x50   : > { %p5158_p5 = pnand %p5156_p1, %p5129_p6  ;;  %p5162_p9 = scmp.lt.s32.totalorder %s5160_s5, %s5155_s26 }
  0x52   : > { %p5159_p8 = pneg %p5158_p5  ;;  %p5163_p12 = por %p5162_p9, %p5161_p7 }
  0x54   : > { %p5164_p0 = pnand %p5163_p12, %p5159_p8 }
  0x56   : > { %5167 = shalt.err (!%p5164_p0)
}
  0x57   : > { %s5168_s22 = scalar_lea.vmem %s676_s19, 64  ;;  %p5176_p4 = scmp.lt.s32.totalorder %s676_s19, %s676_s19 }
  0x58   : > { %p5169_p3 = scmp.ne.s32.totalorder %s676_s19, %s5168_s22  ;;  %p5177_p10 = scmp.lt.s32.totalorder %s5168_s22, %s5168_s22 }
  0x5a   : > { %p5171_p11 = pnand %p5169_p3, %p5129_p6  ;;  %p5178_p1 = por %p5177_p10, %p5176_p4 }
  0x5c   : > { %p5172_p13 = pneg %p5171_p11 }
  0x5e   : > { %p5179_p5 = pnand %p5178_p1, %p5172_p13 }
  0x60   : > { %5182 = shalt.err (!%p5179_p5)
}
  0x61   : > { %4922 = dma.hbm_to_vmem [thread:$0]  (!%p5910_p2), %s5906_s8, 64, %s676_s19, [#allocation10]  }
  0x62   : > { %p6749_p8 = scmp.ne.s32.totalorder %s6748_s0, 0  ;;  %s5194_s1 = scalar_lea.vmem %s704_s30, 16 }
  0x63   : > { %p5195_p6 = scmp.ne.s32.totalorder %s704_s30, %s5194_s1  ;;  %s5201_s2 = scalar_lea.vmem %s704_s30, 32 }
  0x64   : > { %p5960_p7 = pneg %p6749_p8  ;;  %p5202_p0 = scmp.lt.s32.totalorder %s704_s30, %s704_s30 }
  0x65   : > { %p5203_p3 = scmp.lt.s32.totalorder %s5201_s2, %s5194_s1 }
  0x66   : > { %p5197_p9 = pnand %p5195_p6, %p5960_p7 }
  0x67   : > { %p5204_p11 = por %p5203_p3, %p5202_p0 }
  0x68   : > { %p5198_p12 = pneg %p5197_p9 }
  0x6a   : > { %p5205_p13 = pnand %p5204_p11, %p5198_p12 }
  0x6c   : > { %5208 = shalt.err (!%p5205_p13)
}
  0x6d   : > { %s6751_s29 = sld [smem:[#allocation57_spill]]  ;;  %s5672_s26 = smov [#allocation17]  }
  0x6e   : > { %s727_s23 = sshll.u32 %s5672_s26, 4  ;;  %s728_s23 = int_to_ptr.vmem [resolvable:$true] %s727_s23 }
  0x6f   : > { %s5220_s9 = scalar_lea.vmem %s728_s23, 256  ;;  %p5228_p1 = scmp.lt.s32.totalorder %s728_s23, %s728_s23 }
  0x70   : > { %p5221_p2 = scmp.ne.s32.totalorder %s728_s23, %s5220_s9  ;;  %p5229_p5 = scmp.lt.s32.totalorder %s5220_s9, %s5220_s9 }
  0x72   : > { %p5223_p4 = pnand %p5221_p2, %p5960_p7  ;;  %p5230_p6 = por %p5229_p5, %p5228_p1 }
  0x73   : > { %4928 = dma.hbm_to_vmem [thread:$0]  (!%p6749_p8), %s6751_s29, 16, %s704_s30, [#allocation15]  }
  0x74   : > { %p5224_p10 = pneg %p5223_p4 }
  0x76   : > { %p5231_p9 = pnand %p5230_p6, %p5224_p10 }
  0x78   : > { %5234 = shalt.err (!%p5231_p9)
}
  0x79   : > { %s6710_s5 = smov 64   ;;  %s6711_s28 = smov 4  }
  0x7a   : > { %s6752_s11 = sld [smem:[#allocation59_spill]]  ;;  %s5675_s1 = smov [#allocation20]  }
  0x7b   : > { %s751_s2 = sshll.u32 %s5675_s1, 4  ;;  %s5676_s19 = smov [#allocation23]   ;;  %s752_s2 = int_to_ptr.vmem [resolvable:$true] %s751_s2 }
  0x7c   : > { %s775_s8 = sshll.u32 %s5676_s19, 4  ;;  %s5246_s29 = scalar_lea.vmem %s752_s2, 256  ;;  %s776_s8 = int_to_ptr.vmem [resolvable:$true] %s775_s8 }
  0x7d   : > { %p5247_p12 = scmp.ne.s32.totalorder %s752_s2, %s5246_s29  ;;  %p5254_p11 = scmp.lt.s32.totalorder %s752_s2, %s752_s2 }
  0x7e   : > { %p5255_p13 = scmp.lt.s32.totalorder %s5246_s29, %s5246_s29 }
  0x7f   : > { %p5249_p0 = pnand %p5247_p12, %p5960_p7 }
  0x80   : > { %4934 = dma.hbm_to_vmem [thread:$0]  (!%p6749_p8), %s6752_s11, 256, %s728_s23, [#allocation18], %s6710_s5, %s6710_s5, %s6711_s28  }
  0x81   : > { %p5250_p3 = pneg %p5249_p0  ;;  %p5256_p2 = por %p5255_p13, %p5254_p11 }
  0x83   : > { %p5257_p4 = pnand %p5256_p2, %p5250_p3 }
  0x85   : > { %5260 = shalt.err (!%p5257_p4)
}
  0x86   : > { %s6753_s13 = sld [smem:[#allocation60_spill]]  ;;  %s5272_s9 = scalar_lea.vmem %s776_s8, 256 }
  0x87   : > { %p5273_p10 = scmp.ne.s32.totalorder %s776_s8, %s5272_s9  ;;  %p5280_p6 = scmp.lt.s32.totalorder %s776_s8, %s776_s8 }
  0x88   : > { %p5281_p9 = scmp.lt.s32.totalorder %s5272_s9, %s5272_s9 }
  0x89   : > { %p5275_p1 = pnand %p5273_p10, %p5960_p7 }
  0x8a   : > { %p5282_p12 = por %p5281_p9, %p5280_p6 }
  0x8b   : > { %p5276_p5 = pneg %p5275_p1 }
  0x8c   : > { %4940 = dma.hbm_to_vmem [thread:$0]  (!%p6749_p8), %s6753_s13, 256, %s752_s2, [#allocation21], %s6710_s5, %s6710_s5, %s6711_s28  }
  0x8d   : > { %p5283_p0 = pnand %p5282_p12, %p5276_p5 }
  0x8f   : > { %5286 = shalt.err (!%p5283_p0)
}
  0x90   : > { %s6754_s15 = sld [smem:[#allocation61_spill]]  ;;  %s5677_s1 = smov [#allocation26]  }
  0x91   : > { %s799_s2 = sshll.u32 %s5677_s1, 4  ;;  %s58_s19 = sadd.s32 1, %s5663_s7  ;;  %s800_s2 = int_to_ptr.vmem [resolvable:$true] %s799_s2 }
  0x92   : > { %s5298_s29 = scalar_lea.vmem %s800_s2, 256  ;;  %p5306_p2 = scmp.lt.s32.totalorder %s800_s2, %s800_s2 }
  0x93   : > { %p5299_p3 = scmp.ne.s32.totalorder %s800_s2, %s5298_s29  ;;  %p5307_p4 = scmp.lt.s32.totalorder %s5298_s29, %s5298_s29 }
  0x95   : > { %p5301_p11 = pnand %p5299_p3, %p5960_p7  ;;  %p5308_p10 = por %p5307_p4, %p5306_p2 }
  0x96   : > { %4946 = dma.hbm_to_vmem [thread:$0]  (!%p6749_p8), %s6754_s15, 256, %s776_s8, [#allocation24], %s6710_s5, %s6710_s5, %s6711_s28  }
  0x97   : > { %p5302_p13 = pneg %p5301_p11 }
  0x99   : > { %p5309_p1 = pnand %p5308_p10, %p5302_p13 }
  0x9b   : > { %5312 = shalt.err (!%p5309_p1)
}
  0x9c   : > { %s6755_s17 = sld [smem:[#allocation62_spill]]  ;;  %p60_p5 = scmp.ge.s32.totalorder %s58_s19, 2 }
  0x9d   : > { %p4982_p6 = scmp.lt.s32.totalorder %s5667_s3, 2  ;;  %s862_s23 = sand.u32 1, %s5667_s3  }
  0x9e   : > { %s864_s9 = sand.u32 1, %s5655_s6   ;;  %s6812_s19 = smov (%p60_p5, %s58_s19), 0 }
  0x9f   : > { %s6017_s30 = sshll.u32 %s864_s9, 1  ;;  %s90_s22 = ssub.s32 %s5663_s7, %s6812_s19 }
  0xa0   : > { %p91_p9 = scmp.eq.s32.totalorder %s90_s22, 0  ;;  %s4516_s1 = sshll.u32 %s5663_s7, 5 }
  0xa1   : > { %s6756_s26 = sld [smem:[#allocation52_spill]]  ;;  %s866_s13 = scalar_lea.vmem [#allocation11], %s6017_s30 }
  0xa2   : > { %4952 = dma.hbm_to_vmem [thread:$0]  (!%p6749_p8), %s6755_s17, 256, %s800_s2, [#allocation27], %s6710_s5, %s6710_s5, %s6711_s28  }
  0xa3   : > { %s874_s2 = sshll.u32 %s866_s13, 4  ;;  %s6757_s5 = sadd.s32 1, %s5655_s6  ;;  %s875_s2 = int_to_ptr.vmem [resolvable:$true] %s874_s2 }
  0xa4   : > { %s6031_s28 = scalar_select %p91_p9, %s5655_s6, %s6757_s5  }
  0xa5   : > { %p6758_p12 = scmp.ne.s32.totalorder %s6738_s4, 0  ;;  %s5678_s22 = smov [#allocation13]  }
  0xa6   : > { %s689_s15 = sshll.u32 %s5678_s22, 4  ;;  %s6041_s17 = scalar_lea.sflag [#allocation7], %s862_s23  ;;  %s690_s15 = int_to_ptr.vmem [resolvable:$true] %s689_s15 }
  0xa7   : > { %s872_s11 = scalar_lea.hbm %s6756_s26, %s4516_s1  ;;  %p6037_p0 = pnand %p4982_p6, %p6758_p12 }
  0xa8   : > { %s5326_s29 = scalar_lea.vmem %s875_s2, 32  ;;  %s5679_s13 = smov [#allocation11]  }
  0xa9   : > { %p6712_p3 = pneg %p6037_p0  ;;  %p5327_p11 = scmp.ne.s32.totalorder %s875_s2, %s5326_s29 }
  0xaa   : > { %s5331_s4 = sshll.u32 %s5679_s13, 4  ;;  %s5332_s4 = int_to_ptr.vmem [resolvable:$false] %s5331_s4 }
  0xab   : > { %p5329_p13 = pnand %p5327_p11, %p6712_p3  ;;  %s5333_s5 = scalar_lea.vmem %s5332_s4, 64 }
  0xac   : > { %p5334_p4 = scmp.lt.s32.totalorder %s875_s2, %s5332_s4  ;;  %p5335_p10 = scmp.lt.s32.totalorder %s5333_s5, %s5326_s29 }
  0xad   : > { %p5330_p2 = pneg %p5329_p13 }
  0xae   : > { %p5336_p1 = por %p5335_p10, %p5334_p4 }
  0xb0   : > { %p5337_p5 = pnand %p5336_p1, %p5330_p2 }
  0xb2   : > { %5340 = shalt.err (!%p5337_p5)
}
  0xb3   : > { %4962 = dma.hbm_to_vmem [thread:$0]  (!%p6037_p0), %s872_s11, 32, %s875_s2, %s6041_s17  }
  0xb4   : > { %s5680_s23 = smov [#allocation16]   ;;  %s5352_s26 = scalar_lea.vmem %s690_s15, 16 }
  0xb5   : > { %s717_s8 = sshll.u32 %s5680_s23, 4  ;;  %p5353_p6 = scmp.ne.s32.totalorder %s690_s15, %s5352_s26  ;;  %s718_s8 = int_to_ptr.vmem [resolvable:$true] %s717_s8 }
  0xb6   : > { %s5359_s22 = scalar_lea.vmem %s690_s15, 32  ;;  %p5360_p11 = scmp.lt.s32.totalorder %s690_s15, %s690_s15 }
  0xb7   : > { %p5355_p9 = pnand %p5353_p6, %p5960_p7  ;;  %p5361_p13 = scmp.lt.s32.totalorder %s5359_s22, %s5352_s26 }
  0xb9   : > { %p5356_p12 = pneg %p5355_p9  ;;  %p5362_p3 = por %p5361_p13, %p5360_p11 }
  0xbb   : > { %p5363_p4 = pnand %p5362_p3, %p5356_p12 }
  0xbd   : > { %5366 = shalt.err (!%p5363_p4)
}
  0xbe   : > { %s6760_s4 = sld [smem:[#allocation55_spill]]  ;;  %s5378_s11 = scalar_lea.vmem %s718_s8, 16 }
  0xbf   : > { %p5379_p2 = scmp.ne.s32.totalorder %s718_s8, %s5378_s11  ;;  %s5385_s2 = scalar_lea.vmem %s718_s8, 32 }
  0xc0   : > { %p5386_p5 = scmp.lt.s32.totalorder %s718_s8, %s718_s8  ;;  %p5387_p6 = scmp.lt.s32.totalorder %s5385_s2, %s5378_s11 }
  0xc1   : > { %p5381_p10 = pnand %p5379_p2, %p5960_p7 }
  0xc2   : > { %p5388_p9 = por %p5387_p6, %p5386_p5 }
  0xc3   : > { %p5382_p1 = pneg %p5381_p10 }
  0xc4   : > { %4925 = dma.hbm_to_vmem [thread:$0]  (!%p6749_p8), %s6760_s4, 16, %s690_s15, [#allocation10]  }
  0xc5   : > { %p5389_p11 = pnand %p5388_p9, %p5382_p1 }
  0xc7   : > { %5392 = shalt.err (!%p5389_p11)
}
  0xc8   : > { %4931 = dma.hbm_to_vmem [thread:$0]  (!%p6749_p8), %s6670_s10, 16, %s718_s8, [#allocation15]  }
  0xc9   : > { %s5681_s15 = smov [#allocation19]   ;;  %s5682_s22 = smov [#allocation22]  }
  0xca   : > { %s741_s26 = sshll.u32 %s5681_s15, 4  ;;  %s765_s29 = sshll.u32 %s5682_s22, 4  ;;  %s742_s26 = int_to_ptr.vmem [resolvable:$true] %s741_s26  ;;  %s766_s29 = int_to_ptr.vmem [resolvable:$true] %s765_s29 }
  0xcb   : > { %s5404_s13 = scalar_lea.vmem %s742_s26, 16  ;;  %s5411_s4 = scalar_lea.vmem %s742_s26, 32 }
  0xcc   : > { %p5405_p3 = scmp.ne.s32.totalorder %s742_s26, %s5404_s13  ;;  %p5412_p4 = scmp.lt.s32.totalorder %s742_s26, %s742_s26 }
  0xcd   : > { %p5413_p2 = scmp.lt.s32.totalorder %s5411_s4, %s5404_s13 }
  0xce   : > { %p5407_p12 = pnand %p5405_p3, %p5960_p7 }
  0xcf   : > { %p5414_p10 = por %p5413_p2, %p5412_p4 }
  0xd0   : > { %p5408_p13 = pneg %p5407_p12 }
  0xd2   : > { %p5415_p1 = pnand %p5414_p10, %p5408_p13 }
  0xd4   : > { %5418 = shalt.err (!%p5415_p1)
}
  0xd5   : > { %4937 = dma.hbm_to_vmem [thread:$0]  (!%p6749_p8), %s6672_s12, 16, %s742_s26, [#allocation18]  }
  0xd6   : > { %s5430_s2 = scalar_lea.vmem %s766_s29, 16  ;;  %s5437_s5 = scalar_lea.vmem %s766_s29, 32 }
  0xd7   : > { %p5431_p5 = scmp.ne.s32.totalorder %s766_s29, %s5430_s2  ;;  %p5438_p11 = scmp.lt.s32.totalorder %s766_s29, %s766_s29 }
  0xd8   : > { %p5439_p3 = scmp.lt.s32.totalorder %s5437_s5, %s5430_s2 }
  0xd9   : > { %p5433_p6 = pnand %p5431_p5, %p5960_p7 }
  0xda   : > { %p5440_p12 = por %p5439_p3, %p5438_p11 }
  0xdb   : > { %p5434_p9 = pneg %p5433_p6 }
  0xdd   : > { %p5441_p4 = pnand %p5440_p12, %p5434_p9 }
  0xdf   : > { %5444 = shalt.err (!%p5441_p4)
}
  0xe0   : > { %4943 = dma.hbm_to_vmem [thread:$0]  (!%p6749_p8), %s6674_s14, 16, %s766_s29, [#allocation21]  }
  0xe1   : > { %s5683_s26 = smov [#allocation25]   ;;  %s5684_s13 = smov [#allocation28]  }
  0xe2   : > { %s789_s22 = sshll.u32 %s5683_s26, 4  ;;  %s813_s4 = sshll.u32 %s5684_s13, 4  ;;  %s790_s22 = int_to_ptr.vmem [resolvable:$true] %s789_s22  ;;  %s814_s4 = int_to_ptr.vmem [resolvable:$true] %s813_s4 }
  0xe3   : > { %s5456_s11 = scalar_lea.vmem %s790_s22, 16  ;;  %s5463_s8 = scalar_lea.vmem %s790_s22, 32 }
  0xe4   : > { %p5457_p13 = scmp.ne.s32.totalorder %s790_s22, %s5456_s11  ;;  %p5464_p1 = scmp.lt.s32.totalorder %s790_s22, %s790_s22 }
  0xe5   : > { %p5465_p5 = scmp.lt.s32.totalorder %s5463_s8, %s5456_s11 }
  0xe6   : > { %p5459_p2 = pnand %p5457_p13, %p5960_p7 }
  0xe7   : > { %p5466_p6 = por %p5465_p5, %p5464_p1 }
  0xe8   : > { %p5460_p10 = pneg %p5459_p2 }
  0xea   : > { %p5467_p9 = pnand %p5466_p6, %p5460_p10 }
  0xec   : > { %5470 = shalt.err (!%p5467_p9)
}
  0xed   : > { %4949 = dma.hbm_to_vmem [thread:$0]  (!%p6749_p8), %s6676_s16, 16, %s790_s22, [#allocation24]  }
  0xee   : > { %s5482_s5 = scalar_lea.vmem %s814_s4, 16  ;;  %s5489_s23 = scalar_lea.vmem %s814_s4, 32 }
  0xef   : > { %p5483_p11 = scmp.ne.s32.totalorder %s814_s4, %s5482_s5  ;;  %p5490_p4 = scmp.lt.s32.totalorder %s814_s4, %s814_s4 }
  0xf0   : > { %p5491_p13 = scmp.lt.s32.totalorder %s5489_s23, %s5482_s5 }
  0xf1   : > { %p5485_p3 = pnand %p5483_p11, %p5960_p7 }
  0xf2   : > { %p5492_p2 = por %p5491_p13, %p5490_p4 }
  0xf3   : > { %p5486_p12 = pneg %p5485_p3 }
  0xf5   : > { %p5493_p1 = pnand %p5492_p2, %p5486_p12 }
  0xf7   : > { %5496 = shalt.err (!%p5493_p1)
}
  0xf8   : > { %4955 = dma.hbm_to_vmem [thread:$0]  (!%p6749_p8), %s6678_s18, 16, %s814_s4, [#allocation27]  }
  0xf9   : > { %s5685_s22 = smov [#allocation29]   ;;  %s6761_s2 = sld [smem:[#allocation53_spill]] }
  0xfa   : > { %s829_s13 = sshll.u32 %s5685_s22, 4  ;;  %s830_s13 = int_to_ptr.vmem [resolvable:$true] %s829_s13 }
  0xfb   : > { %s5508_s5 = scalar_lea.vmem %s830_s13, 256  ;;  %p5516_p9 = scmp.lt.s32.totalorder %s830_s13, %s830_s13 }
  0xfc   : > { %p5509_p10 = scmp.ne.s32.totalorder %s830_s13, %s5508_s5  ;;  %p5517_p11 = scmp.lt.s32.totalorder %s5508_s5, %s5508_s5 }
  0xfe   : > { %p5511_p5 = pnand %p5509_p10, %p5960_p7  ;;  %p5518_p3 = por %p5517_p11, %p5516_p9 }
  0xff   : > { %s891_s29 = scalar_lea.hbm %s6761_s2, %s4516_s1 }
 0x100   : > { %p5512_p6 = pneg %p5511_p5 }
 0x102   : > { %p5519_p12 = pnand %p5518_p3, %p5512_p6 }
 0x104   : > { %5522 = shalt.err (!%p5519_p12)
}
 0x105   : > { %s6762_s4 = smov 4   ;;  %s6763_s23 = smov 64  }
 0x106   : > { %4958 = dma.hbm_to_vmem [thread:$0]  (!%p6749_p8), %s6681_s21, 256, %s830_s13, [#allocation30], %s6763_s23, %s6763_s23, %s6762_s4  }
 0x107   : > { %s885_s1 = scalar_lea.vmem [#allocation12], %s6017_s30  ;;  %p6764_p4 = pneg %p6037_p0 }
 0x108   : > { %s893_s25 = sshll.u32 %s885_s1, 4  ;;  %s5686_s11 = smov [#allocation12]   ;;  %s894_s25 = int_to_ptr.vmem [resolvable:$true] %s893_s25 }
 0x109   : > { %s5536_s22 = scalar_lea.vmem %s894_s25, 32  ;;  %s5541_s0 = sshll.u32 %s5686_s11, 4  ;;  %s5542_s0 = int_to_ptr.vmem [resolvable:$false] %s5541_s0 }
 0x10a   : > { %p5537_p7 = scmp.ne.s32.totalorder %s894_s25, %s5536_s22  ;;  %s5543_s8 = scalar_lea.vmem %s5542_s0, 64 }
 0x10b   : > { %p5544_p1 = scmp.lt.s32.totalorder %s894_s25, %s5542_s0  ;;  %p5545_p10 = scmp.lt.s32.totalorder %s5543_s8, %s5536_s22 }
 0x10c   : > { %p5539_p13 = pnand %p5537_p7, %p6764_p4 }
 0x10d   : > { %p5546_p5 = por %p5545_p10, %p5544_p1 }
 0x10e   : > { %p5540_p2 = pneg %p5539_p13 }
 0x110   : > { %p5547_p6 = pnand %p5546_p5, %p5540_p2 }
 0x112   : > { %5550 = shalt.err (!%p5547_p6)
}
 0x113   : > { %4965 = dma.hbm_to_vmem [thread:$0]  (!%p6037_p0), %s891_s29, 32, %s894_s25, %s6041_s17  }
 0x114   : > { %p6765_p8 = scmp.ne.s32.totalorder %s6745_s24, 0 }
 0x115   : > { %p6766_p9 = scmp.ne.s32.totalorder (!%p6765_p8), %s6737_s27, 0 }
 0x116   : > { %902 = sbr.rel (%p6765_p8) target bundleno = 3822 (0xeee), region = 120 }
 0x11b   : > { %5602 = dma.done.wait (%p6766_p9), [#allocation7], 64  }
 0x11c   : > { %5604 = vsyncadd (%p6766_p9), [#allocation7], 4294967232 }
 0x11d   : > { %5606 = dma.done.wait (%p6766_p9), [#allocation10], 64  }
 0x11e   : > { %5608 = vsyncadd (%p6766_p9), [#allocation10], 4294967232  ;;  %s6767_s30 = sld [smem:[#allocation46_spill]] }
 0x11f   : > { %s6768_s13 = sld [smem:[#allocation44_spill]] }
 0x124   : > { %s912_s9 = sand.u32 1, %s6767_s30  }
 0x125   : > { %s6127_s17 = sand.u32 1, %s6768_s13   ;;  %s913_s2 = scalar_lea.sflag [#allocation7], %s912_s9 }
 0x126   : > { %s4520_s24 = sshll.u32 %s6127_s17, 1 }
 0x127   : > { %s6130_s29 = scalar_lea.vmem [#allocation11], %s4520_s24 }
 0x128   : > { %5610 = dma.done.wait (%p6766_p9), %s913_s2, 64  }
 0x129   : > { %5612 = vsyncadd (%p6766_p9), %s913_s2, 4294967232  ;;  %s6136_s5 = scalar_lea.vmem [#allocation12], %s4520_s24  ;;  %p6769_p0 = scmp.eq.s32.totalorder %s6767_s30, 0 }
 0x12b   : > { %5614 = dma.done.wait (%p6769_p0), [#allocation10], 16   ;;  %p6770_p11 = pmov %p6769_p0 }
 0x12c   : > { %p6771_p3 = pmov %p6769_p0 }
 0x12d   : > { %5616 = vsyncadd (%p6770_p11), [#allocation10], 4294967280 }
 0x12e   : > { %5618 = dma.done.wait (%p6771_p3), [#allocation15], 32   ;;  %p6772_p12 = pmov %p6769_p0 }
 0x12f   : > { %p6773_p7 = pmov %p6769_p0 }
 0x130   : > { %5620 = vsyncadd (%p6772_p12), [#allocation15], 4294967264 }
 0x131   : > { %5622 = dma.done.wait (%p6773_p7), [#allocation18], 272   ;;  %p6774_p4 = pmov %p6769_p0 }
 0x132   : > { %p6775_p13 = pmov %p6769_p0 }
 0x133   : > { %5624 = vsyncadd (%p6774_p4), [#allocation18], 4294967024 }
 0x134   : > { %5626 = dma.done.wait (%p6775_p13), [#allocation21], 272   ;;  %p6776_p2 = pmov %p6769_p0 }
 0x135   : > { %p6777_p1 = pmov %p6769_p0 }
 0x136   : > { %5628 = vsyncadd (%p6776_p2), [#allocation21], 4294967024 }
 0x137   : > { %5630 = dma.done.wait (%p6777_p1), [#allocation24], 272   ;;  %p6778_p10 = pmov %p6769_p0 }
 0x138   : > { %p6779_p5 = pmov %p6769_p0 }
 0x139   : > { %5632 = vsyncadd (%p6778_p10), [#allocation24], 4294967024 }
 0x13a   : > { %5634 = dma.done.wait (%p6779_p5), [#allocation27], 272   ;;  %p6780_p6 = pmov %p6769_p0 }
 0x13b   : > { %p6781_p8 = pmov %p6769_p0 }
 0x13c   : > { %5636 = vsyncadd (%p6780_p6), [#allocation27], 4294967024 }
 0x13d   : > { %5638 = dma.done.wait (%p6781_p8), [#allocation30], 256   ;;  %p6782_p9 = pmov %p6769_p0 }
 0x13e   : > { %s6783_s27 = sld [smem:[#allocation45_spill]]  ;;  %v5687_v0 = vmov 0.0   ;;  %vm5688_vm0 = vmmov 0   ;;  %v1064_v3 = vld [vmem:[#allocation6] sm:$0xf]  ;;  %vm1089_vm1 = vcmask 261120   ;;  %v1148_v34 = vlaneseq }
 0x13f   : > { %5640 = vsyncadd (%p6782_p9), [#allocation30], 4294967040  ;;  %4678 = vmatprep.subr.bf16.mxu0 %v5687_v0  ;;  %4682 = vmatprep.mubr.msk.bf16.mxu0 %vm5688_vm0, %v5687_v0  ;;  %s6784_s15 = sld [smem:[#allocation56_spill]]  ;;  %v5073_v4 = vld [vmem:[#allocation23 + $0x8] sm:$0xff]   ;;  %v5074_v5 = vld [vmem:[#allocation23] sm:$0xff]   ;;  %s5691_s30 = smov 112  }
 0x140   : > { %4686 = vmatprep.subr.bf16.mxu1 %v5687_v0  ;;  %4690 = vmatprep.mubr.msk.bf16.mxu1 %vm5688_vm0, %v5687_v0  ;;  %v1065_v6 = vld [vmem:[#allocation9] sm:$0xf]  ;;  %s6785_s8 = sld [smem:[#allocation54_spill]]  ;;  %v4536_v11 = vld [vmem:[#allocation14] ss:$0 sm:$0xff]  ;;  %v5079_v21 = vld [vmem:[#allocation26 + $0x8] sm:$0xff]  }
 0x141   : > { %s6786_s9 = sld [smem:[#allocation49_spill]]  ;;  %v4560_v24 = vld [vmem:[#allocation13] ss:$0 sm:$0xff]  ;;  %v5692_v32 = vmov 1983009808   ;;  %v1149_v38 = vshrl.u32 %v1148_v34, 7 }
 0x142   : > { %s6787_s1 = sld [smem:[#allocation58_spill]]  ;;  %v5080_v25 = vld [vmem:[#allocation26] sm:$0xff]   ;;  %v1146_v33 = vunpack.c.l.s4 %v5692_v32  ;;  %v5693_v35 = vmov 1934713408   ;;  %vm1283_vm2 = vcmask 60416   ;;  %vm2172_vm3 = vcmask 64512  }
 0x143   : > { %v1178_v36 = vunpack.c.l.s4 %v5693_v35  ;;  %s5695_s13 = smov 8   ;;  %vm2940_vm5 = vcmask 130048   ;;  %vm2942_vm6 = vcmask 195584   ;;  %s6792_s2 = sld [smem:[#allocation63_spill]]  ;;  %vm4183_vm8 = vcmask 523264  }
 0x144   : > { %p1052_p0 = scmp.lt.s32.totalorder %s6783_s27, 1  ;;  %v1147_v37 = vunpack.c.0.s8 %v1146_v33  ;;  %s6794_s11 = sld [smem:[#allocation64_spill]] }
 0x145   : > { %v5071_v1 = vld [vmem:[%s6784_s15 + $0x8] sm:$0xff]   ;;  %v5072_v2 = vld [vmem:[%s6784_s15] sm:$0xff]   ;;  %v1179_v41 = vunpack.c.0.s8 %v1178_v36  ;;  %s4534_s0 = sshll.u32 %s6127_s17, 3 }
 0x146   : > { %4679 = vmatpush3.bf16.msra.mxu0 %v5071_v1  ;;  %s1053_s25 = scalar_select %p1052_p0, %s6783_s27, 1  ;;  %v5075_v7 = vld [vmem:[%s6785_s8 + $0x8] sm:$0xff]   ;;  %v5076_v8 = vld [vmem:[%s6785_s8] sm:$0xff]   ;;  %v6237_v42 = vsub.s32 %v1147_v37, %v1149_v38 }
 0x147   : > { %4680 = vmatprep.subr.bf16.mxu0 %v5687_v0  ;;  %v6239_v48 = vsub.s32 %v1179_v41, %v1149_v38 }
 0x148   : > { %s4535_s22 = sshll.u32 %s1053_s25, 3  ;;  %v5077_v14 = vld [vmem:[%s6787_s1 + $0x8] sm:$0xff]   ;;  %s5689_s25 = smov 104   ;;  %v5078_v17 = vld [vmem:[%s6787_s1] sm:$0xff]  }
 0x149   : > { %s1058_s24 = scalar_lea.vmem %s6786_s9, %s4535_s22  ;;  %s5690_s22 = smov 120   ;;  %4687 = vmatpush3.bf16.msra.mxu1 %v5077_v14 }
 0x14a   : > { %4681 = vmatpush3.bf16.msra.mxu0 %v5072_v2  ;;  %v6199_v9 = vld [vmem:[%s1058_s24] sm:$0xff]  ;;  %4688 = vmatprep.subr.bf16.mxu1 %v5687_v0  ;;  %s5696_s9 = smov 24   ;;  %s6793_s4 = smov %s6792_s2 }
 0x14b   : > { %4694 = vmatprep.subr.bf16.mxu0 %v5687_v0  ;;  %v1949_v10 = vpack.c.bf16 %v6199_v9, %v6199_v9  ;;  %s4611_s24 = sshll.u32 %s6783_s27, 7  ;;  %s4230_s27 = scalar_lea.sflag [#allocation8], %s6127_s17 }
 0x14d   : > { %4683 = vmatmul.mubr.msk.bf16.vlgmr.msra.gmra.mxu0 %vm1089_vm1, %v1064_v3  ;;  %4689 = vmatpush3.bf16.msra.mxu1 %v5078_v17 }
 0x14e   : > { %4695 = vmatpush3.bf16.msra.mxu0 %v5073_v4  ;;  %4698 = vmatprep.mubr.msk.bf16.mxu0 %vm5688_vm0, %v5687_v0 }
 0x14f   : > { %4696 = vmatprep.subr.bf16.mxu0 %v5687_v0  ;;  %4702 = vmatprep.subr.bf16.mxu1 %v5687_v0 }
 0x150   : > { %4691 = vmatmul.mubr.msk.bf16.vlgmr.msra.gmra.mxu1 %vm1089_vm1, %v1064_v3 }
 0x151   : > { %4703 = vmatpush3.bf16.msra.mxu1 %v5079_v21  ;;  %4706 = vmatprep.mubr.msk.bf16.mxu1 %vm5688_vm0, %v5687_v0 }
 0x152   : > { %4697 = vmatpush3.bf16.msra.mxu0 %v5074_v5  ;;  %4704 = vmatprep.subr.bf16.mxu1 %v5687_v0 }
 0x153   : > { %4710 = vmatprep.subr.bf16.mxu0 %v5687_v0 }
 0x155   : > { %4699 = vmatmul.mubr.msk.bf16.vlgmr.msra.gmra.mxu0 %vm1089_vm1, %v1065_v6  ;;  %4705 = vmatpush3.bf16.msra.mxu1 %v5080_v25 }
 0x156   : > { %4711 = vmatpush3.bf16.msra.mxu0 %v5075_v7  ;;  %4714 = vmatprep.mubr.msk.bf16.mxu0 %vm5688_vm0, %v5687_v0 }
 0x157   : > { %4712 = vmatprep.subr.bf16.mxu0 %v5687_v0  ;;  %4718 = vmatprep.subr.bf16.mxu1 %v5687_v0 }
 0x158   : > { %4707 = vmatmul.mubr.msk.bf16.vlgmr.msra.gmra.mxu1 %vm1089_vm1, %v1065_v6 }
 0x159   : > { %4720 = vmatprep.mubr.msk.bf16.mxu1 %vm5688_vm0, %v5687_v0 }
 0x15a   : > { %4713 = vmatpush3.bf16.msra.mxu0 %v5076_v8 }
 0x15b   : > { %4724 = vmatprep.subr.bf16.mxu0 %v5687_v0 }
 0x15d   : > { %4715 = vmatmul.mubr.msk.bf16.vlgmr.msra.gmra.mxu0 %vm1089_vm1, %v1949_v10 }
 0x15e   : > { %4726 = vmatprep.mubr.msk.bf16.mxu0 %vm5688_vm0, %v5687_v0 }
 0x20d   : > { %v1127_v12 = vpop.f32.mrf.mxu0 }
 0x20e   : > { %v1128_v13 = vadd.f32 %v4536_v11, %v1127_v12 }
 0x20f   : > { %v4684_v15 = vpop.f32.mrf.mxu0 }
 0x210   : > { %1140 = vrot.lane.b32.xlu1 %v1128_v13, %s5689_s25  ;;  %1134 = vrot.lane.b32.xlu0 %v1128_v13, %s5690_s22 }
 0x211   : > { %v1130_v16 = vpop.f32.mrf.mxu0 }
 0x213   : > { %v4685_v18 = vpop.f32.mrf.mxu0 }
 0x214   : > { %1137 = vrot.lane.b32.xlu0 %v1128_v13, %s5691_s30 }
 0x215   : > { %v6218_v19 = vpop.f32.mrf.mxu0 }
 0x217   : > { %v4700_v20 = vpop.f32.mrf.mxu0 }
 0x219   : > { %v1568_v22 = vpop.f32.mrf.mxu0 }
 0x21b   : > { %v4701_v23 = vpop.f32.mrf.mxu0 }
 0x21d   : > { %v2011_v26 = vpop.f32.mrf.mxu0 }
 0x21e   : > { %v2012_v27 = vadd.f32 %v4560_v24, %v2011_v26 }
 0x21f   : > { %v4716_v28 = vpop.f32.mrf.mxu0 }
 0x220   : > { %v6226_v29 = vmul.f32 0.35355338, %v2012_v27 }
 0x221   : > { %v2014_v30 = vpop.f32.mrf.mxu0 }
 0x222   : > { %2022 = vrot.lane.b32.xlu0 %v6226_v29, %s5691_s30  ;;  %2019 = vrot.lane.b32.xlu1 %v6226_v29, %s5690_s22 }
 0x223   : > { %v4717_v31 = vpop.f32.mrf.mxu0 }
 0x226   : > { %2025 = vrot.lane.b32.xlu1 %v6226_v29, %s5689_s25 }
 0x282   : > { %v1141_v39 = vpop.permute.xlu1 %1140  ;;  %v1135_v40 = vpop.permute.xlu0 %1134 }
 0x283   : > { %v1159_v43 = vcombine.low %v1135_v40, %v1141_v39  ;;  %v1160_v44 = vcombine.high %v1135_v40, %v1141_v39 }
 0x285   : > { %v1167_v49 = vrot.slane %v1159_v43, %v6237_v42  ;;  %v1174_v50 = vrot.slane %v1160_v44, %v6237_v42 }
 0x286   : > { %v1138_v45 = vpop.permute.xlu0 %1137 }
 0x287   : > { %v1143_v46 = vcombine.low %v1128_v13, %v1138_v45  ;;  %v1144_v47 = vcombine.high %v1128_v13, %v1138_v45 }
 0x289   : > { %v1151_v51 = vrot.slane %v1143_v46, %v6237_v42  ;;  %v1158_v52 = vrot.slane %v1144_v47, %v6237_v42 }
 0x28b   : > { %v1175_v53 = vcombine.low %v1151_v51, %v1167_v49  ;;  %v1176_v54 = vcombine.high %v1151_v51, %v1167_v49  ;;  %v1191_v55 = vcombine.low %v1158_v52, %v1174_v50  ;;  %v1192_v56 = vcombine.high %v1158_v52, %v1174_v50 }
 0x28d   : > { %v1183_v57 = vrot.slane %v1175_v53, %v6239_v48  ;;  %v1190_v58 = vrot.slane %v1176_v54, %v6239_v48  ;;  %v1199_v59 = vrot.slane %v1191_v55, %v6239_v48  ;;  %v1206_v60 = vrot.slane %v1192_v56, %v6239_v48 }
 0x28f   : > { %v1211_v61 = vcombine.low %v1183_v57, %v1190_v58  ;;  %v4540_v62 = vcombine.high %v1183_v57, %v1190_v58  ;;  %v1227_v63 = vcombine.low %v1199_v59, %v1206_v60  ;;  %v4541_v1 = vcombine.high %v1199_v59, %v1206_v60 }
 0x291   : > { %v1218_v2 = vrot.slane %v1211_v61, %v6237_v42  ;;  %v1226_v3 = vrot.slane %v4540_v62, %v6237_v42  ;;  %v1234_v4 = vrot.slane %v1227_v63, %v6237_v42  ;;  %v1242_v5 = vrot.slane %v4541_v1, %v6237_v42 }
 0x293   : > { %v1243_v6 = vcombine.low %v1218_v2, %v1226_v3  ;;  %v1244_v7 = vcombine.high %v1218_v2, %v1226_v3  ;;  %v1259_v8 = vcombine.low %v1234_v4, %v1242_v5  ;;  %v1260_v10 = vcombine.high %v1234_v4, %v1242_v5 }
 0x294   : > { %v2020_v11 = vpop.permute.xlu1 %2019  ;;  %v2023_v16 = vpop.permute.xlu0 %2022 }
 0x295   : > { %v1251_v12 = vrot.slane %v1243_v6, %v6239_v48  ;;  %v1258_v13 = vrot.slane %v1244_v7, %v6239_v48  ;;  %v1267_v14 = vrot.slane %v1259_v8, %v6239_v48  ;;  %v1274_v15 = vrot.slane %v1260_v10, %v6239_v48 }
 0x296   : > { %v2028_v22 = vcombine.low %v6226_v29, %v2023_v16  ;;  %v2029_v23 = vcombine.high %v6226_v29, %v2023_v16 }
 0x297   : > { %v1275_v17 = vcombine.low %v1251_v12, %v1267_v14  ;;  %v1276_v18 = vcombine.high %v1251_v12, %v1267_v14  ;;  %v1277_v20 = vcombine.low %v1258_v13, %v1274_v15  ;;  %v1278_v21 = vcombine.high %v1258_v13, %v1274_v15  ;;  %v1345_v15 = vpop.f32.mrf.mxu1 }
 0x298   : > { %v2026_v24 = vpop.permute.xlu1 %2025  ;;  %v2036_v32 = vrot.slane %v2028_v22, %v6237_v42  ;;  %v2043_v33 = vrot.slane %v2029_v23, %v6237_v42 }
 0x299   : > { %v1279_v25 = vpack.c.bf16 %v1275_v17, %v1275_v17  ;;  %v1280_v26 = vpack.c.bf16 %v1276_v18, %v1276_v18  ;;  %v1281_v27 = vpack.c.bf16 %v1277_v20, %v1277_v20  ;;  %v1282_v28 = vpack.c.bf16 %v1278_v21, %v1278_v21  ;;  %v4692_v16 = vpop.f32.mrf.mxu1 }
 0x29a   : > { %v2044_v30 = vcombine.low %v2020_v11, %v2026_v24  ;;  %v2045_v31 = vcombine.high %v2020_v11, %v2026_v24  ;;  %v1943_v24 = vld [vmem:[%s6130_s29] sm:$0x3]  ;;  %s5694_s29 = smov 16  }
 0x29b   : > { %1284 = vst.msk [vmem:[#allocation2] sm:$0xf] %vm1283_vm2, %v1279_v25  ;;  %1285 = vst.msk [vmem:[#allocation2 + $0x4] sm:$0xf] %vm1283_vm2, %v1280_v26  ;;  %v1348_v17 = vpop.f32.mrf.mxu1  ;;  %v1944_v25 = vunpack.c.0.s8 %v1943_v24 }
 0x29c   : > { %1286 = vst.msk [vmem:[#allocation2 + $0x8] sm:$0xf] %vm1283_vm2, %v1281_v27  ;;  %1287 = vst.msk [vmem:[#allocation2 + $0xc] sm:$0xf] %vm1283_vm2, %v1282_v28  ;;  %v2052_v29 = vrot.slane %v2044_v30, %v6237_v42  ;;  %v2059_v34 = vrot.slane %v2045_v31, %v6237_v42 }
 0x29d   : > { %v4693_v18 = vpop.f32.mrf.mxu1  ;;  %vm6302_vm4 = vcmp.eq.s32.totalorder %v1944_v25, 0 }
 0x29e   : > { %v2060_v35 = vcombine.low %v2036_v32, %v2052_v29  ;;  %v2061_v36 = vcombine.high %v2036_v32, %v2052_v29  ;;  %v2076_v37 = vcombine.low %v2043_v33, %v2059_v34  ;;  %v2077_v38 = vcombine.high %v2043_v33, %v2059_v34 }
 0x29f   : > { %v6299_v20 = vpop.f32.mrf.mxu1 }
 0x2a0   : > { %v2068_v39 = vrot.slane %v2060_v35, %v6239_v48  ;;  %v2075_v40 = vrot.slane %v2061_v36, %v6239_v48  ;;  %v2084_v41 = vrot.slane %v2076_v37, %v6239_v48  ;;  %v2091_v43 = vrot.slane %v2077_v38, %v6239_v48 }
 0x2a1   : > { %v4708_v21 = vpop.f32.mrf.mxu1 }
 0x2a2   : > { %v2096_v44 = vcombine.low %v2068_v39, %v2075_v40  ;;  %v4564_v45 = vcombine.high %v2068_v39, %v2075_v40  ;;  %v2112_v46 = vcombine.low %v2084_v41, %v2091_v43  ;;  %v4565_v47 = vcombine.high %v2084_v41, %v2091_v43  ;;  %v2168_v49 = vld [vmem:[#allocation2] sm:$0xf]  ;;  %v2169_v50 = vld [vmem:[#allocation2 + $0x4] sm:$0xf] }
 0x2a3   : > { %v2177_v51 = vsel %vm2172_vm3, %v2168_v49, 0  ;;  %v2223_v52 = vsel %vm2172_vm3, %v2169_v50, 0  ;;  %v2170_v2 = vld [vmem:[#allocation2 + $0x8] sm:$0xf]  ;;  %v2171_v3 = vld [vmem:[#allocation2 + $0xc] sm:$0xf]  ;;  %v1785_v22 = vpop.f32.mrf.mxu1 }
 0x2a4   : > { %v2103_v53 = vrot.slane %v2096_v44, %v6237_v42  ;;  %v2111_v54 = vrot.slane %v4564_v45, %v6237_v42  ;;  %v2119_v55 = vrot.slane %v2112_v46, %v6237_v42  ;;  %v2127_v56 = vrot.slane %v4565_v47, %v6237_v42  ;;  %4719 = vmatpush3.bf16.xpose.msra.mxu1 %v2177_v51 }
 0x2a5   : > { %4725 = vmatpush3.bf16.xpose.msra.mxu0 %v2223_v52  ;;  %4730 = vmatprep.subr.bf16.mxu1 %v5687_v0  ;;  %v2269_v8 = vsel %vm2172_vm3, %v2170_v2, 0  ;;  %v2315_v10 = vsel %vm2172_vm3, %v2171_v3, 0  ;;  %v4709_v23 = vpop.f32.mrf.mxu1 }
 0x2a6   : > { %v2128_v57 = vcombine.low %v2103_v53, %v2111_v54  ;;  %v2144_v58 = vcombine.low %v2119_v55, %v2127_v56  ;;  %4736 = vmatprep.subr.bf16.mxu0 %v5687_v0  ;;  %v2129_v59 = vcombine.high %v2103_v53, %v2111_v54  ;;  %v2145_v60 = vcombine.high %v2119_v55, %v2127_v56  ;;  %v4542_v53 = vld [vmem:[#allocation16] ss:$0 sm:$0xff] }
 0x2a7   : > { %v1346_v54 = vadd.f32 %v4542_v53, %v1345_v15 }
 0x2a8   : > { %v2136_v61 = vrot.slane %v2128_v57, %v6239_v48  ;;  %v2152_v62 = vrot.slane %v2144_v58, %v6239_v48  ;;  %v2143_v6 = vrot.slane %v2129_v59, %v6239_v48  ;;  %v2159_v7 = vrot.slane %v2145_v60, %v6239_v48 }
 0x2aa   : > { %v2160_v63 = vcombine.low %v2136_v61, %v2152_v62  ;;  %v2161_v1 = vcombine.high %v2136_v61, %v2152_v62  ;;  %v2162_v11 = vcombine.low %v2143_v6, %v2159_v7  ;;  %v2163_v12 = vcombine.high %v2143_v6, %v2159_v7 }
 0x2ac   : > { %v2164_v4 = vpack.c.bf16 %v2160_v63, %v2160_v63  ;;  %v2165_v5 = vpack.c.bf16 %v2161_v1, %v2161_v1  ;;  %v2166_v13 = vpack.c.bf16 %v2162_v11, %v2162_v11  ;;  %v2167_v14 = vpack.c.bf16 %v2163_v12, %v2163_v12 }
 0x2ae   : > { %4721 = vmatmul.mubr.msk.bf16.vlgmr.msra.gmra.mxu1 %vm2172_vm3, %v2164_v4  ;;  %4727 = vmatmul.mubr.msk.bf16.vlgmr.msra.gmra.mxu0 %vm2172_vm3, %v2165_v5 }
 0x2af   : > { %4731 = vmatpush3.bf16.xpose.msra.mxu1 %v2269_v8  ;;  %4737 = vmatpush3.bf16.xpose.msra.mxu0 %v2315_v10 }
 0x2b0   : > { %4732 = vmatprep.mubr.msk.bf16.mxu1 %vm5688_vm0, %v5687_v0  ;;  %4738 = vmatprep.mubr.msk.bf16.mxu0 %vm5688_vm0, %v5687_v0 }
 0x2b1   : > { %4742 = vmatprep.subr.bf16.mxu1 %v5687_v0  ;;  %4748 = vmatprep.subr.bf16.mxu0 %v5687_v0 }
 0x2b6   : > { %4733 = vmatmul.mubr.msk.bf16.vlgmr.msra.gmra.mxu1 %vm2172_vm3, %v2166_v13  ;;  %4739 = vmatmul.mubr.msk.bf16.vlgmr.msra.gmra.mxu0 %vm2172_vm3, %v2167_v14 }
 0x2b7   : > { %4744 = vmatprep.mubr.msk.bf16.mxu1 %vm5688_vm0, %v5687_v0  ;;  %4750 = vmatprep.mubr.msk.bf16.mxu0 %vm5688_vm0, %v5687_v0 }
 0x36e   : > { %v2213_v27 = vpop.f32.mrf.mxu1  ;;  %v2259_v28 = vpop.f32.mrf.mxu0 }
 0x36f   : > { %v2359_v30 = vsel %vm6302_vm4, -1e-09, %v2213_v27  ;;  %v2360_v31 = vsel %vm6302_vm4, -1e-09, %v2259_v28 }
 0x370   : > { %v4722_v32 = vpop.f32.mrf.mxu1  ;;  %v4728_v33 = vpop.f32.mrf.mxu0  ;;  %v2363_v29 = vsel %vm2172_vm3, %v2359_v30, -inf  ;;  %v2366_v34 = vsel %vm2172_vm3, %v2360_v31, -inf }
 0x371   : > { %2364 = vmax.xlane.f32.xlu0 %v2363_v29  ;;  %2367 = vmax.xlane.f32.xlu1 %v2366_v34 }
 0x372   : > { %v2216_v35 = vpop.f32.mrf.mxu1  ;;  %v2262_v36 = vpop.f32.mrf.mxu0 }
 0x374   : > { %v4723_v37 = vpop.f32.mrf.mxu1  ;;  %v4729_v38 = vpop.f32.mrf.mxu0 }
 0x376   : > { %v2305_v39 = vpop.f32.mrf.mxu1  ;;  %v2351_v40 = vpop.f32.mrf.mxu0 }
 0x377   : > { %v2361_v41 = vsel %vm6302_vm4, -1e-09, %v2305_v39  ;;  %v2362_v46 = vsel %vm6302_vm4, -1e-09, %v2351_v40 }
 0x378   : > { %v4734_v43 = vpop.f32.mrf.mxu1  ;;  %v4740_v44 = vpop.f32.mrf.mxu0  ;;  %v2369_v45 = vsel %vm2172_vm3, %v2361_v41, -inf  ;;  %v2372_v52 = vsel %vm2172_vm3, %v2362_v46, -inf }
 0x379   : > { %2370 = vmax.xlane.f32.xlu0 %v2369_v45 }
 0x37a   : > { %v2308_v47 = vpop.f32.mrf.mxu1  ;;  %v2354_v49 = vpop.f32.mrf.mxu0 }
 0x37c   : > { %v4735_v50 = vpop.f32.mrf.mxu1  ;;  %v4741_v51 = vpop.f32.mrf.mxu0 }
 0x37d   : > { %2373 = vmax.xlane.f32.xlu0 %v2372_v52 }
 0x382   : > { %1352 = vrot.lane.b32.xlu1 %v1346_v54, %s5690_s22 }
 0x386   : > { %1358 = vrot.lane.b32.xlu1 %v1346_v54, %s5689_s25 }
 0x393   : > { %1355 = vrot.lane.b32.xlu0 %v1346_v54, %s5691_s30 }
 0x3fa   : > { %v2365_v55 = vpop.xlane.xlu0 %2364  ;;  %v2368_v56 = vpop.xlane.xlu1 %2367 }
 0x3fb   : > { %v2375_v57 = vsub.f32 %v2359_v30, %v2365_v55  ;;  %v2376_v58 = vsub.f32 %v2360_v31, %v2368_v56 }
 0x3fd   : > { %v2379_v59 = vmul.f32 1.442695, %v2375_v57  ;;  %v2381_v60 = vmul.f32 1.442695, %v2376_v58 }
 0x3fe   : > { %v1353_v61 = vpop.permute.xlu1 %1352 }
 0x3ff   : > { %5093 = vpow2.f32 %v2379_v59 }
 0x400   : > { %5095 = vpow2.f32 %v2381_v60 }
 0x402   : > { %v2371_v62 = vpop.xlane.xlu0 %2370  ;;  %v1359_v2 = vpop.permute.xlu1 %1358 }
 0x403   : > { %v2377_v63 = vsub.f32 %v2361_v41, %v2371_v62  ;;  %v1377_v5 = vcombine.low %v1353_v61, %v1359_v2  ;;  %v1378_v6 = vcombine.high %v1353_v61, %v1359_v2 }
 0x405   : > { %v2383_v1 = vmul.f32 1.442695, %v2377_v63  ;;  %v1385_v13 = vrot.slane %v1377_v5, %v6237_v42  ;;  %v1392_v15 = vrot.slane %v1378_v6, %v6237_v42 }
 0x406   : > { %v2374_v3 = vpop.xlane.xlu0 %2373 }
 0x407   : > { %5097 = vpow2.f32 %v2383_v1  ;;  %v2378_v4 = vsub.f32 %v2362_v46, %v2374_v3 }
 0x409   : > { %v2385_v7 = vmul.f32 1.442695, %v2378_v4 }
 0x40a   : > { %v1356_v8 = vpop.permute.xlu0 %1355 }
 0x40b   : > { %5099 = vpow2.f32 %v2385_v7  ;;  %v1361_v10 = vcombine.low %v1346_v54, %v1356_v8  ;;  %v1362_v11 = vcombine.high %v1346_v54, %v1356_v8 }
 0x40c   : > { %v6321_v12 = vpop.eup %5093 }
 0x40d   : > { %v6324_v14 = vpop.eup %5095  ;;  %v1369_v16 = vrot.slane %v1361_v10, %v6237_v42  ;;  %v1376_v17 = vrot.slane %v1362_v11, %v6237_v42  ;;  %v2387_v18 = vsel %vm2172_vm3, %v6321_v12, 0.0 }
 0x40e   : > { %2388 = vadd.xlane.f32.xlu1 %v2387_v18  ;;  %v2390_v21 = vsel %vm2172_vm3, %v6324_v14, 0.0 }
 0x40f   : > { %v1393_v22 = vcombine.low %v1369_v16, %v1385_v13  ;;  %v1394_v23 = vcombine.high %v1369_v16, %v1385_v13  ;;  %v1409_v24 = vcombine.low %v1376_v17, %v1392_v15  ;;  %v1410_v25 = vcombine.high %v1376_v17, %v1392_v15  ;;  %2391 = vadd.xlane.f32.xlu0 %v2390_v21 }
 0x411   : > { %v1401_v26 = vrot.slane %v1393_v22, %v6239_v48  ;;  %v1408_v27 = vrot.slane %v1394_v23, %v6239_v48  ;;  %v1417_v28 = vrot.slane %v1409_v24, %v6239_v48  ;;  %v1424_v30 = vrot.slane %v1410_v25, %v6239_v48 }
 0x413   : > { %v1429_v31 = vcombine.low %v1401_v26, %v1408_v27  ;;  %v4546_v32 = vcombine.high %v1401_v26, %v1408_v27  ;;  %v1445_v33 = vcombine.low %v1417_v28, %v1424_v30  ;;  %v4547_v29 = vcombine.high %v1417_v28, %v1424_v30 }
 0x414   : > { %v5098_v34 = vpop.eup %5097 }
 0x415   : > { %v1436_v35 = vrot.slane %v1429_v31, %v6237_v42  ;;  %v1444_v36 = vrot.slane %v4546_v32, %v6237_v42  ;;  %v1452_v37 = vrot.slane %v1445_v33, %v6237_v42  ;;  %v1460_v38 = vrot.slane %v4547_v29, %v6237_v42 }
 0x416   : > { %v2393_v39 = vsel %vm2172_vm3, %v5098_v34, 0.0 }
 0x417   : > { %v1461_v40 = vcombine.low %v1436_v35, %v1444_v36  ;;  %v1462_v41 = vcombine.high %v1436_v35, %v1444_v36  ;;  %v1477_v43 = vcombine.low %v1452_v37, %v1460_v38  ;;  %v1478_v44 = vcombine.high %v1452_v37, %v1460_v38  ;;  %2394 = vadd.xlane.f32.xlu0 %v2393_v39 }
 0x418   : > { %v5100_v45 = vpop.eup %5099 }
 0x419   : > { %v1469_v46 = vrot.slane %v1461_v40, %v6239_v48  ;;  %v1476_v47 = vrot.slane %v1462_v41, %v6239_v48  ;;  %v1485_v49 = vrot.slane %v1477_v43, %v6239_v48  ;;  %v1492_v50 = vrot.slane %v1478_v44, %v6239_v48 }
 0x41a   : > { %v2396_v51 = vsel %vm2172_vm3, %v5100_v45, 0.0 }
 0x41b   : > { %v1493_v52 = vcombine.low %v1469_v46, %v1485_v49  ;;  %v1494_v53 = vcombine.high %v1469_v46, %v1485_v49  ;;  %v1495_v54 = vcombine.low %v1476_v47, %v1492_v50  ;;  %v1496_v55 = vcombine.high %v1476_v47, %v1492_v50  ;;  %2397 = vadd.xlane.f32.xlu1 %v2396_v51 }
 0x41d   : > { %v1497_v56 = vpack.c.bf16 %v1493_v52, %v1493_v52  ;;  %v1498_v57 = vpack.c.bf16 %v1494_v53, %v1494_v53  ;;  %v1499_v58 = vpack.c.bf16 %v1495_v54, %v1495_v54  ;;  %v1500_v59 = vpack.c.bf16 %v1496_v55, %v1496_v55 }
 0x41f   : > { %1501 = vst.msk [vmem:[#allocation3] sm:$0xf] %vm1283_vm2, %v1497_v56  ;;  %1502 = vst.msk [vmem:[#allocation3 + $0x4] sm:$0xf] %vm1283_vm2, %v1498_v57 }
 0x420   : > { %1503 = vst.msk [vmem:[#allocation3 + $0x8] sm:$0xf] %vm1283_vm2, %v1499_v58  ;;  %1504 = vst.msk [vmem:[#allocation3 + $0xc] sm:$0xf] %vm1283_vm2, %v1500_v59  ;;  %v5081_v58 = vld [vmem:[#allocation17 + $0x8] sm:$0xff]  }
 0x426   : > { %v2411_v60 = vld [vmem:[#allocation3] sm:$0xf]  ;;  %v2412_v61 = vld [vmem:[#allocation3 + $0x4] sm:$0xf] }
 0x427   : > { %v2413_v62 = vld [vmem:[#allocation3 + $0x8] sm:$0xf]  ;;  %v2414_v63 = vld [vmem:[#allocation3 + $0xc] sm:$0xf] }
 0x444   : > { %2415 = vxpose.xlu0.c.b16.start.end [1/1] (short) (narrow) %v2411_v60, 16 }
 0x448   : > { %2477 = vxpose.xlu1.c.b16.start.end [1/1] (short) (narrow) %v2412_v61, 16  ;;  %2539 = vxpose.xlu0.c.b16.start.end [1/1] (short) (narrow) %v2413_v62, 16 }
 0x44c   : > { %2601 = vxpose.xlu1.c.b16.start.end [1/1] (short) (narrow) %v2414_v63, 16 }
 0x497   : > { %v2389_v1 = vpop.xlane.xlu1 %2388 }
 0x498   : > { %5101 = vrcp.f32 %v2389_v1  ;;  %v2392_v2 = vpop.xlane.xlu0 %2391 }
 0x499   : > { %5103 = vrcp.f32 %v2392_v2 }
 0x4a0   : > { %v2395_v3 = vpop.xlane.xlu0 %2394 }
 0x4a1   : > { %5105 = vrcp.f32 %v2395_v3 }
 0x4a4   : > { %v2398_v4 = vpop.xlane.xlu1 %2397 }
 0x4a5   : > { %v5102_v5 = vpop.eup %5101  ;;  %5107 = vrcp.f32 %v2398_v4  ;;  %v5082_v4 = vld [vmem:[#allocation17] sm:$0xff]  }
 0x4a6   : > { %v5104_v6 = vpop.eup %5103  ;;  %v2403_v7 = vmul.f32 %v5102_v5, %v6321_v12  ;;  %v2423_v17 = vpop.trf.xlu0 }
 0x4a7   : > { %v2404_v8 = vmul.f32 %v5104_v6, %v6324_v14 }
 0x4a8   : > { %v2407_v10 = vpack.c.bf16 %v2403_v7, %v2403_v7 }
 0x4a9   : > { %v2408_v11 = vpack.c.bf16 %v2404_v8, %v2404_v8 }
 0x4aa   : > { %v2435_v13 = vsel %vm2172_vm3, %v2407_v10, 0  ;;  %v2485_v21 = vpop.trf.xlu1  ;;  %v2547_v26 = vpop.trf.xlu0 }
 0x4ab   : > { %4743 = vmatpush3.bf16.xpose.msra.mxu1 %v2435_v13  ;;  %v2497_v15 = vsel %vm2172_vm3, %v2408_v11, 0 }
 0x4ac   : > { %4749 = vmatpush3.bf16.xpose.msra.mxu0 %v2497_v15  ;;  %4754 = vmatprep.subr.bf16.mxu1 %v5687_v0 }
 0x4ad   : > { %4760 = vmatprep.subr.bf16.mxu0 %v5687_v0 }
 0x4ae   : > { %v5106_v16 = vpop.eup %5105  ;;  %v2609_v27 = vpop.trf.xlu1 }
 0x4af   : > { %v2405_v18 = vmul.f32 %v5106_v16, %v5098_v34 }
 0x4b1   : > { %v2409_v22 = vpack.c.bf16 %v2405_v18, %v2405_v18 }
 0x4b2   : > { %v5108_v12 = vpop.eup %5107  ;;  %4745 = vmatmul.mubr.msk.bf16.vlgmr.msra.gmra.mxu1 %vm2172_vm3, %v2423_v17 }
 0x4b3   : > { %4751 = vmatmul.mubr.msk.bf16.vlgmr.msra.gmra.mxu0 %vm2172_vm3, %v2485_v21  ;;  %v2559_v14 = vsel %vm2172_vm3, %v2409_v22, 0  ;;  %v2406_v23 = vmul.f32 %v5108_v12, %v5100_v45  ;;  %4756 = vmatprep.mubr.msk.bf16.mxu1 %vm5688_vm0, %v5687_v0 }
 0x4b4   : > { %4755 = vmatpush3.bf16.xpose.msra.mxu1 %v2559_v14  ;;  %4762 = vmatprep.mubr.msk.bf16.mxu0 %vm5688_vm0, %v5687_v0 }
 0x4b5   : > { %v2410_v24 = vpack.c.bf16 %v2406_v23, %v2406_v23  ;;  %4766 = vmatprep.subr.bf16.mxu1 %v5687_v0 }
 0x4b7   : > { %v2621_v25 = vsel %vm2172_vm3, %v2410_v24, 0 }
 0x4b8   : > { %4761 = vmatpush3.bf16.xpose.msra.mxu0 %v2621_v25 }
 0x4b9   : > { %4774 = vmatprep.subr.bf16.mxu0 %v5687_v0 }
 0x4bb   : > { %4757 = vmatmul.mubr.msk.bf16.vlgmr.msra.gmra.mxu1 %vm2172_vm3, %v2547_v26 }
 0x4bc   : > { %4770 = vmatprep.mubr.msk.bf16.mxu1 %vm5688_vm0, %v5687_v0  ;;  %4767 = vmatpush3.bf16.msra.mxu1 %v5081_v58 }
 0x4bd   : > { %4768 = vmatprep.subr.bf16.mxu1 %v5687_v0 }
 0x4bf   : > { %4763 = vmatmul.mubr.msk.bf16.vlgmr.msra.gmra.mxu0 %vm2172_vm3, %v2609_v27  ;;  %v4548_v27 = vld [vmem:[#allocation25] ss:$0 sm:$0xff] }
 0x4c0   : > { %4778 = vmatprep.mubr.msk.bf16.mxu0 %vm5688_vm0, %v5687_v0  ;;  %4769 = vmatpush3.bf16.msra.mxu1 %v5082_v4 }
 0x4c1   : > { %4782 = vmatprep.subr.bf16.mxu1 %v5687_v0 }
 0x572   : > { %v2471_v28 = vpop.f32.mrf.mxu1 }
 0x573   : > { %v2533_v30 = vpop.f32.mrf.mxu0  ;;  %2663 = vxpose.xlu0.b32.start.end [1/1] (short) (narrow) %v2471_v28, 8  ;;  %v1566_v28 = vadd.f32 %v4548_v27, %v6218_v19 }
 0x574   : > { %v4746_v31 = vpop.f32.mrf.mxu1  ;;  %2695 = vxpose.xlu1.b32.start.end [1/1] (short) (narrow) %v2533_v30, 8 }
 0x575   : > { %v4752_v32 = vpop.f32.mrf.mxu0  ;;  %v5083_v31 = vld [vmem:[#allocation20 + $0x8] sm:$0xff]  }
 0x576   : > { %v2474_v33 = vpop.f32.mrf.mxu1  ;;  %4775 = vmatpush3.bf16.msra.mxu0 %v5083_v31 }
 0x577   : > { %v2536_v29 = vpop.f32.mrf.mxu0  ;;  %4776 = vmatprep.subr.bf16.mxu0 %v5687_v0 }
 0x578   : > { %v4747_v34 = vpop.f32.mrf.mxu1 }
 0x579   : > { %v4753_v35 = vpop.f32.mrf.mxu0 }
 0x57b   : > { %v2595_v36 = vpop.f32.mrf.mxu1 }
 0x57c   : > { %2727 = vxpose.xlu0.b32.start.end [1/1] (short) (narrow) %v2595_v36, 8 }
 0x57d   : > { %v4758_v37 = vpop.f32.mrf.mxu1 }
 0x57f   : > { %v2598_v38 = vpop.f32.mrf.mxu1  ;;  %v2657_v39 = vpop.f32.mrf.mxu0 }
 0x580   : > { %2759 = vxpose.xlu0.b32.start.end [1/1] (short) (narrow) %v2657_v39, 8 }
 0x581   : > { %v4759_v40 = vpop.f32.mrf.mxu1  ;;  %v4764_v41 = vpop.f32.mrf.mxu0 }
 0x583   : > { %v2660_v43 = vpop.f32.mrf.mxu0 }
 0x585   : > { %v4765_v44 = vpop.f32.mrf.mxu0 }
 0x5ef   : > { %v2679_v45 = vpop.trf.xlu0 }
 0x5f0   : > { %v2711_v47 = vpop.trf.xlu1 }
 0x5f8   : > { %v2743_v46 = vpop.trf.xlu0 }
 0x5f9   : > { %v2791_v49 = vcombine.low %v2679_v45, %v2743_v46  ;;  %v2792_v50 = vcombine.high %v2679_v45, %v2743_v46 }
 0x5fb   : > { %v2799_v54 = vrot.slane %v2791_v49, %v6237_v42  ;;  %v2806_v55 = vrot.slane %v2792_v50, %v6237_v42 }
 0x5fc   : > { %v2775_v51 = vpop.trf.xlu0 }
 0x5fd   : > { %v2807_v52 = vcombine.low %v2711_v47, %v2775_v51  ;;  %v2808_v53 = vcombine.high %v2711_v47, %v2775_v51 }
 0x5ff   : > { %v2815_v56 = vrot.slane %v2807_v52, %v6237_v42  ;;  %v2822_v57 = vrot.slane %v2808_v53, %v6237_v42 }
 0x601   : > { %v2823_v59 = vcombine.low %v2799_v54, %v2815_v56  ;;  %v2824_v60 = vcombine.high %v2799_v54, %v2815_v56  ;;  %v2839_v61 = vcombine.low %v2806_v55, %v2822_v57  ;;  %v2840_v62 = vcombine.high %v2806_v55, %v2822_v57 }
 0x603   : > { %v2831_v63 = vrot.slane %v2823_v59, %v6239_v48  ;;  %v2838_v1 = vrot.slane %v2824_v60, %v6239_v48  ;;  %v2847_v2 = vrot.slane %v2839_v61, %v6239_v48  ;;  %v2854_v3 = vrot.slane %v2840_v62, %v6239_v48 }
 0x605   : > { %v2859_v5 = vcombine.low %v2831_v63, %v2838_v1  ;;  %v4574_v6 = vcombine.high %v2831_v63, %v2838_v1  ;;  %v2875_v7 = vcombine.low %v2847_v2, %v2854_v3  ;;  %v4575_v8 = vcombine.high %v2847_v2, %v2854_v3 }
 0x607   : > { %v2866_v10 = vrot.slane %v2859_v5, %v6237_v42  ;;  %v2874_v11 = vrot.slane %v4574_v6, %v6237_v42  ;;  %v2882_v13 = vrot.slane %v2875_v7, %v6237_v42  ;;  %v2890_v15 = vrot.slane %v4575_v8, %v6237_v42 }
 0x609   : > { %v2892_v16 = vcombine.high %v2866_v10, %v2874_v11  ;;  %v2908_v17 = vcombine.high %v2882_v13, %v2890_v15  ;;  %v2891_v18 = vcombine.low %v2866_v10, %v2874_v11  ;;  %v2907_v21 = vcombine.low %v2882_v13, %v2890_v15 }
 0x60b   : > { %v2906_v22 = vrot.slane %v2892_v16, %v6239_v48  ;;  %v2922_v12 = vrot.slane %v2908_v17, %v6239_v48  ;;  %v2899_v14 = vrot.slane %v2891_v18, %v6239_v48  ;;  %v2915_v23 = vrot.slane %v2907_v21, %v6239_v48 }
 0x60d   : > { %v2925_v24 = vcombine.low %v2906_v22, %v2922_v12  ;;  %v2924_v25 = vcombine.high %v2899_v14, %v2915_v23  ;;  %v2923_v26 = vcombine.low %v2899_v14, %v2915_v23  ;;  %v2926_v30 = vcombine.high %v2906_v22, %v2922_v12 }
 0x60f   : > { %2932 = vrot.lane.b32.xlu0 %v2925_v24, %s5694_s29  ;;  %2928 = vrot.lane.b32.xlu1 %v2924_v25, %s5695_s13  ;;  %v5084_v24 = vld [vmem:[#allocation20] sm:$0xff]   ;;  %v4576_v25 = vld [vmem:[#allocation19] ss:$0 sm:$0xff] }
 0x610   : > { %4777 = vmatpush3.bf16.msra.mxu0 %v5084_v24 }
 0x611   : > { %4788 = vmatprep.subr.bf16.mxu0 %v5687_v0 }
 0x613   : > { %1578 = vrot.lane.b32.xlu0 %v1566_v28, %s5689_s25  ;;  %2936 = vrot.lane.b32.xlu1 %v2926_v30, %s5696_s9 }
 0x617   : > { %1572 = vrot.lane.b32.xlu1 %v1566_v28, %s5690_s22 }
 0x61b   : > { %1575 = vrot.lane.b32.xlu1 %v1566_v28, %s5691_s30 }
 0x681   : > { %v2929_v32 = vpop.permute.xlu1 %2928  ;;  %v2933_v33 = vpop.permute.xlu0 %2932 }
 0x682   : > { %v2939_v29 = vsel %vm2172_vm3, %v2923_v26, %v2929_v32 }
 0x683   : > { %v2941_v34 = vsel %vm2940_vm5, %v2939_v29, %v2933_v33 }
 0x685   : > { %v2937_v19 = vpop.permute.xlu1 %2936  ;;  %v1579_v38 = vpop.permute.xlu0 %1578 }
 0x686   : > { %v2943_v35 = vsel %vm2942_vm6, %v2941_v34, %v2937_v19  ;;  %v4580_v34 = vld [vmem:[#allocation22] ss:$0 sm:$0xff] }
 0x687   : > { %v2944_v36 = vpack.c.bf16 %v2943_v35, %v2943_v35 }
 0x689   : > { %v1573_v37 = vpop.permute.xlu1 %1572  ;;  %4771 = vmatmul.mubr.msk.bf16.vlgmr.msra.gmra.mxu1 %vm1089_vm1, %v2944_v36 }
 0x68a   : > { %4784 = vmatprep.mubr.msk.bf16.mxu1 %vm5688_vm0, %v5687_v0  ;;  %v1597_v39 = vcombine.low %v1573_v37, %v1579_v38  ;;  %v1598_v40 = vcombine.high %v1573_v37, %v1579_v38 }
 0x68c   : > { %v1605_v45 = vrot.slane %v1597_v39, %v6237_v42  ;;  %v1612_v46 = vrot.slane %v1598_v40, %v6237_v42 }
 0x68d   : > { %v1576_v41 = vpop.permute.xlu1 %1575 }
 0x68e   : > { %v1581_v43 = vcombine.low %v1566_v28, %v1576_v41  ;;  %v1582_v44 = vcombine.high %v1566_v28, %v1576_v41 }
 0x690   : > { %v1589_v47 = vrot.slane %v1581_v43, %v6237_v42  ;;  %v1596_v49 = vrot.slane %v1582_v44, %v6237_v42 }
 0x692   : > { %v1613_v50 = vcombine.low %v1589_v47, %v1605_v45  ;;  %v1614_v51 = vcombine.high %v1589_v47, %v1605_v45  ;;  %v1629_v52 = vcombine.low %v1596_v49, %v1612_v46  ;;  %v1630_v53 = vcombine.high %v1596_v49, %v1612_v46 }
 0x694   : > { %v1621_v54 = vrot.slane %v1613_v50, %v6239_v48  ;;  %v1628_v55 = vrot.slane %v1614_v51, %v6239_v48  ;;  %v1637_v56 = vrot.slane %v1629_v52, %v6239_v48  ;;  %v1644_v57 = vrot.slane %v1630_v53, %v6239_v48 }
 0x696   : > { %v1649_v58 = vcombine.low %v1621_v54, %v1628_v55  ;;  %v4552_v59 = vcombine.high %v1621_v54, %v1628_v55  ;;  %v1665_v60 = vcombine.low %v1637_v56, %v1644_v57  ;;  %v4553_v61 = vcombine.high %v1637_v56, %v1644_v57 }
 0x698   : > { %v1656_v62 = vrot.slane %v1649_v58, %v6237_v42  ;;  %v1664_v63 = vrot.slane %v4552_v59, %v6237_v42  ;;  %v1672_v1 = vrot.slane %v1665_v60, %v6237_v42  ;;  %v1680_v2 = vrot.slane %v4553_v61, %v6237_v42 }
 0x69a   : > { %v1681_v3 = vcombine.low %v1656_v62, %v1664_v63  ;;  %v1682_v4 = vcombine.high %v1656_v62, %v1664_v63  ;;  %v1697_v5 = vcombine.low %v1672_v1, %v1680_v2  ;;  %v1698_v6 = vcombine.high %v1672_v1, %v1680_v2 }
 0x69c   : > { %v1689_v7 = vrot.slane %v1681_v3, %v6239_v48  ;;  %v1696_v8 = vrot.slane %v1682_v4, %v6239_v48  ;;  %v1705_v10 = vrot.slane %v1697_v5, %v6239_v48  ;;  %v1712_v11 = vrot.slane %v1698_v6, %v6239_v48 }
 0x69e   : > { %v1713_v13 = vcombine.low %v1689_v7, %v1705_v10  ;;  %v1714_v15 = vcombine.high %v1689_v7, %v1705_v10  ;;  %v1715_v16 = vcombine.low %v1696_v8, %v1712_v11  ;;  %v1716_v17 = vcombine.high %v1696_v8, %v1712_v11 }
 0x6a0   : > { %v1717_v18 = vpack.c.bf16 %v1713_v13, %v1713_v13  ;;  %v1718_v21 = vpack.c.bf16 %v1714_v15, %v1714_v15  ;;  %v1719_v22 = vpack.c.bf16 %v1715_v16, %v1715_v16  ;;  %v1720_v12 = vpack.c.bf16 %v1716_v17, %v1716_v17 }
 0x6a2   : > { %1721 = vst.msk [vmem:[#allocation4] sm:$0xf] %vm1283_vm2, %v1717_v18  ;;  %1722 = vst.msk [vmem:[#allocation4 + $0x4] sm:$0xf] %vm1283_vm2, %v1718_v21 }
 0x6a3   : > { %1723 = vst.msk [vmem:[#allocation4 + $0x8] sm:$0xf] %vm1283_vm2, %v1719_v22  ;;  %1724 = vst.msk [vmem:[#allocation4 + $0xc] sm:$0xf] %vm1283_vm2, %v1720_v12 }
 0x6a9   : > { %v3230_v14 = vld [vmem:[#allocation4] sm:$0xf]  ;;  %v3231_v32 = vld [vmem:[#allocation4 + $0x4] sm:$0xf] }
 0x6aa   : > { %v3238_v23 = vsel %vm2172_vm3, %v3230_v14, 0  ;;  %v3284_v19 = vsel %vm2172_vm3, %v3231_v32, 0  ;;  %v3232_v17 = vld [vmem:[#allocation4 + $0x8] sm:$0xf]  ;;  %v3233_v18 = vld [vmem:[#allocation4 + $0xc] sm:$0xf] }
 0x6ab   : > { %4783 = vmatpush3.bf16.xpose.msra.mxu1 %v3238_v23  ;;  %v3330_v23 = vsel %vm2172_vm3, %v3232_v17, 0  ;;  %v3376_v24 = vsel %vm2172_vm3, %v3233_v18, 0 }
 0x6ac   : > { %4794 = vmatprep.subr.bf16.mxu1 %v5687_v0 }
 0x749   : > { %v3005_v26 = vpop.f32.mrf.mxu1 }
 0x74a   : > { %v3006_v27 = vadd.f32 %v4576_v25, %v3005_v26 }
 0x74b   : > { %v4772_v28 = vpop.f32.mrf.mxu1 }
 0x74c   : > { %v6429_v30 = vadd.f32 %v3006_v27, %v6199_v9 }
 0x74d   : > { %v3008_v31 = vpop.f32.mrf.mxu1 }
 0x74e   : > { %v3012_v33 = vpack.c.bf16 %v6429_v30, %v6429_v30  ;;  %v1946_v31 = vld [vmem:[%s6136_s5] sm:$0x3]  ;;  %s6799_s5 = sld [smem:[#allocation47_spill]] }
 0x74f   : > { %v4773_v29 = vpop.f32.mrf.mxu1  ;;  %v1947_v32 = vunpack.c.0.s8 %v1946_v31 }
 0x750   : > { %4779 = vmatmul.mubr.msk.bf16.vlgmr.msra.gmra.mxu0 %vm1089_vm1, %v3012_v33 }
 0x751   : > { %4789 = vmatpush3.bf16.xpose.msra.mxu0 %v3284_v19  ;;  %4790 = vmatprep.mubr.msk.bf16.mxu0 %vm5688_vm0, %v5687_v0  ;;  %vm6474_vm7 = vcmp.eq.s32.totalorder %v1947_v32, 0 }
 0x752   : > { %4800 = vmatprep.subr.bf16.mxu0 %v5687_v0 }
 0x754   : > { %p6801_p3 = scmp.ne.s32.totalorder %s6799_s5, 0 }
 0x810   : > { %v3073_v35 = vpop.f32.mrf.mxu0 }
 0x811   : > { %v3074_v9 = vadd.f32 %v4580_v34, %v3073_v35 }
 0x812   : > { %v4780_v36 = vpop.f32.mrf.mxu0 }
 0x813   : > { %v3079_v37 = vmul.f32 0.35355338, %v3074_v9 }
 0x814   : > { %v3076_v38 = vpop.f32.mrf.mxu0 }
 0x815   : > { %3084 = vrot.lane.b32.xlu0 %v3079_v37, %s5691_s30  ;;  %3081 = vrot.lane.b32.xlu1 %v3079_v37, %s5690_s22 }
 0x816   : > { %v4781_v39 = vpop.f32.mrf.mxu0 }
 0x819   : > { %3087 = vrot.lane.b32.xlu1 %v3079_v37, %s5689_s25 }
 0x887   : > { %v3085_v40 = vpop.permute.xlu0 %3084  ;;  %v3082_v41 = vpop.permute.xlu1 %3081 }
 0x888   : > { %v3090_v43 = vcombine.low %v3079_v37, %v3085_v40  ;;  %v3091_v44 = vcombine.high %v3079_v37, %v3085_v40 }
 0x88a   : > { %v3098_v49 = vrot.slane %v3090_v43, %v6237_v42  ;;  %v3105_v50 = vrot.slane %v3091_v44, %v6237_v42 }
 0x88b   : > { %v3088_v45 = vpop.permute.xlu1 %3087 }
 0x88c   : > { %v3106_v46 = vcombine.low %v3082_v41, %v3088_v45  ;;  %v3107_v47 = vcombine.high %v3082_v41, %v3088_v45 }
 0x88e   : > { %v3114_v51 = vrot.slane %v3106_v46, %v6237_v42  ;;  %v3121_v52 = vrot.slane %v3107_v47, %v6237_v42 }
 0x890   : > { %v3122_v53 = vcombine.low %v3098_v49, %v3114_v51  ;;  %v3123_v54 = vcombine.high %v3098_v49, %v3114_v51  ;;  %v3138_v55 = vcombine.low %v3105_v50, %v3121_v52  ;;  %v3139_v56 = vcombine.high %v3105_v50, %v3121_v52 }
 0x892   : > { %v3130_v57 = vrot.slane %v3122_v53, %v6239_v48  ;;  %v3137_v58 = vrot.slane %v3123_v54, %v6239_v48  ;;  %v3146_v59 = vrot.slane %v3138_v55, %v6239_v48  ;;  %v3153_v60 = vrot.slane %v3139_v56, %v6239_v48 }
 0x894   : > { %v3158_v61 = vcombine.low %v3130_v57, %v3137_v58  ;;  %v4584_v62 = vcombine.high %v3130_v57, %v3137_v58  ;;  %v3174_v63 = vcombine.low %v3146_v59, %v3153_v60  ;;  %v4585_v1 = vcombine.high %v3146_v59, %v3153_v60  ;;  %v4554_v57 = vld [vmem:[#allocation28] ss:$0 sm:$0xff] }
 0x895   : > { %v1783_v58 = vadd.f32 %v4554_v57, %v6299_v20 }
 0x896   : > { %v3165_v2 = vrot.slane %v3158_v61, %v6237_v42  ;;  %v3173_v3 = vrot.slane %v4584_v62, %v6237_v42  ;;  %v3181_v4 = vrot.slane %v3174_v63, %v6237_v42  ;;  %v3189_v5 = vrot.slane %v4585_v1, %v6237_v42 }
 0x898   : > { %v3190_v6 = vcombine.low %v3165_v2, %v3173_v3  ;;  %v3206_v7 = vcombine.low %v3181_v4, %v3189_v5  ;;  %v3191_v8 = vcombine.high %v3165_v2, %v3173_v3  ;;  %v3207_v10 = vcombine.high %v3181_v4, %v3189_v5 }
 0x89a   : > { %v3198_v11 = vrot.slane %v3190_v6, %v6239_v48  ;;  %v3214_v13 = vrot.slane %v3206_v7, %v6239_v48  ;;  %v3205_v12 = vrot.slane %v3191_v8, %v6239_v48  ;;  %v3221_v14 = vrot.slane %v3207_v10, %v6239_v48 }
 0x89c   : > { %v3222_v15 = vcombine.low %v3198_v11, %v3214_v13  ;;  %v3223_v16 = vcombine.high %v3198_v11, %v3214_v13  ;;  %v3224_v25 = vcombine.low %v3205_v12, %v3221_v14  ;;  %v3225_v26 = vcombine.high %v3205_v12, %v3221_v14 }
 0x89e   : > { %v3226_v21 = vpack.c.bf16 %v3222_v15, %v3222_v15  ;;  %v3227_v22 = vpack.c.bf16 %v3223_v16, %v3223_v16  ;;  %v3228_v27 = vpack.c.bf16 %v3224_v25, %v3224_v25  ;;  %v3229_v28 = vpack.c.bf16 %v3225_v26, %v3225_v26 }
 0x8a0   : > { %4785 = vmatmul.mubr.msk.bf16.vlgmr.msra.gmra.mxu1 %vm2172_vm3, %v3226_v21  ;;  %4791 = vmatmul.mubr.msk.bf16.vlgmr.msra.gmra.mxu0 %vm2172_vm3, %v3227_v22 }
 0x8a1   : > { %4795 = vmatpush3.bf16.xpose.msra.mxu1 %v3330_v23  ;;  %4801 = vmatpush3.bf16.xpose.msra.mxu0 %v3376_v24 }
 0x8a2   : > { %4796 = vmatprep.mubr.msk.bf16.mxu1 %vm5688_vm0, %v5687_v0  ;;  %4802 = vmatprep.mubr.msk.bf16.mxu0 %vm5688_vm0, %v5687_v0 }
 0x8a3   : > { %4806 = vmatprep.subr.bf16.mxu1 %v5687_v0  ;;  %4812 = vmatprep.subr.bf16.mxu0 %v5687_v0 }
 0x8a8   : > { %4797 = vmatmul.mubr.msk.bf16.vlgmr.msra.gmra.mxu1 %vm2172_vm3, %v3228_v27  ;;  %4803 = vmatmul.mubr.msk.bf16.vlgmr.msra.gmra.mxu0 %vm2172_vm3, %v3229_v28 }
 0x8a9   : > { %4808 = vmatprep.mubr.msk.bf16.mxu1 %vm5688_vm0, %v5687_v0  ;;  %4814 = vmatprep.mubr.msk.bf16.mxu0 %vm5688_vm0, %v5687_v0 }
 0x960   : > { %v3274_v29 = vpop.f32.mrf.mxu1  ;;  %v3320_v19 = vpop.f32.mrf.mxu0 }
 0x961   : > { %v3420_v34 = vsel %vm6474_vm7, -1e-09, %v3274_v29  ;;  %v3421_v35 = vsel %vm6474_vm7, -1e-09, %v3320_v19 }
 0x962   : > { %v4786_v9 = vpop.f32.mrf.mxu1  ;;  %v4792_v36 = vpop.f32.mrf.mxu0  ;;  %v3424_v37 = vsel %vm2172_vm3, %v3420_v34, -inf  ;;  %v3427_v38 = vsel %vm2172_vm3, %v3421_v35, -inf }
 0x963   : > { %3425 = vmax.xlane.f32.xlu0 %v3424_v37  ;;  %3428 = vmax.xlane.f32.xlu1 %v3427_v38 }
 0x964   : > { %v3277_v39 = vpop.f32.mrf.mxu1  ;;  %v3323_v40 = vpop.f32.mrf.mxu0 }
 0x966   : > { %v4787_v41 = vpop.f32.mrf.mxu1  ;;  %v4793_v43 = vpop.f32.mrf.mxu0 }
 0x968   : > { %v3366_v44 = vpop.f32.mrf.mxu1  ;;  %v3412_v45 = vpop.f32.mrf.mxu0 }
 0x969   : > { %v3422_v46 = vsel %vm6474_vm7, -1e-09, %v3366_v44  ;;  %v3423_v51 = vsel %vm6474_vm7, -1e-09, %v3412_v45 }
 0x96a   : > { %v4798_v47 = vpop.f32.mrf.mxu1  ;;  %v4804_v49 = vpop.f32.mrf.mxu0  ;;  %v3430_v50 = vsel %vm2172_vm3, %v3422_v46, -inf  ;;  %v3433_v56 = vsel %vm2172_vm3, %v3423_v51, -inf }
 0x96b   : > { %3431 = vmax.xlane.f32.xlu0 %v3430_v50 }
 0x96c   : > { %v3369_v52 = vpop.f32.mrf.mxu1  ;;  %v3415_v53 = vpop.f32.mrf.mxu0 }
 0x96e   : > { %v4799_v54 = vpop.f32.mrf.mxu1  ;;  %v4805_v55 = vpop.f32.mrf.mxu0 }
 0x96f   : > { %3434 = vmax.xlane.f32.xlu0 %v3433_v56 }
 0x974   : > { %1789 = vrot.lane.b32.xlu1 %v1783_v58, %s5690_s22  ;;  %s6800_s22 = sld [smem:[#allocation68_spill]] }
 0x978   : > { %1795 = vrot.lane.b32.xlu1 %v1783_v58, %s5689_s25 }
 0x985   : > { %1792 = vrot.lane.b32.xlu0 %v1783_v58, %s5691_s30  ;;  %s5697_s30 = smov [#allocation31]  }
 0x9ec   : > { %v3426_v59 = vpop.xlane.xlu0 %3425  ;;  %v3429_v60 = vpop.xlane.xlu1 %3428 }
 0x9ed   : > { %v3436_v61 = vsub.f32 %v3420_v34, %v3426_v59  ;;  %v3437_v62 = vsub.f32 %v3421_v35, %v3429_v60 }
 0x9ef   : > { %v3440_v63 = vmul.f32 1.442695, %v3436_v61  ;;  %v3442_v1 = vmul.f32 1.442695, %v3437_v62 }
 0x9f0   : > { %v1790_v2 = vpop.permute.xlu1 %1789 }
 0x9f1   : > { %5109 = vpow2.f32 %v3440_v63 }
 0x9f2   : > { %5111 = vpow2.f32 %v3442_v1 }
 0x9f4   : > { %v3432_v3 = vpop.xlane.xlu0 %3431  ;;  %v1796_v6 = vpop.permute.xlu1 %1795 }
 0x9f5   : > { %v3438_v4 = vsub.f32 %v3422_v46, %v3432_v3  ;;  %v1814_v8 = vcombine.low %v1790_v2, %v1796_v6  ;;  %v1815_v10 = vcombine.high %v1790_v2, %v1796_v6 }
 0x9f7   : > { %v3444_v5 = vmul.f32 1.442695, %v3438_v4  ;;  %v1822_v18 = vrot.slane %v1814_v8, %v6237_v42  ;;  %v1829_v22 = vrot.slane %v1815_v10, %v6237_v42 }
 0x9f8   : > { %v3435_v20 = vpop.xlane.xlu0 %3434 }
 0x9f9   : > { %5113 = vpow2.f32 %v3444_v5  ;;  %v3439_v7 = vsub.f32 %v3423_v51, %v3435_v20 }
 0x9fb   : > { %v3446_v11 = vmul.f32 1.442695, %v3439_v7 }
 0x9fc   : > { %v1793_v13 = vpop.permute.xlu0 %1792 }
 0x9fd   : > { %5115 = vpow2.f32 %v3446_v11  ;;  %v1798_v15 = vcombine.low %v1783_v58, %v1793_v13  ;;  %v1799_v16 = vcombine.high %v1783_v58, %v1793_v13 }
 0x9fe   : > { %v6494_v17 = vpop.eup %5109 }
 0x9ff   : > { %v6497_v21 = vpop.eup %5111  ;;  %v1806_v12 = vrot.slane %v1798_v15, %v6237_v42  ;;  %v1813_v14 = vrot.slane %v1799_v16, %v6237_v42  ;;  %v3448_v23 = vsel %vm2172_vm3, %v6494_v17, 0.0 }
 0xa00   : > { %3449 = vadd.xlane.f32.xlu1 %v3448_v23  ;;  %v3451_v24 = vsel %vm2172_vm3, %v6497_v21, 0.0 }
 0xa01   : > { %v1830_v25 = vcombine.low %v1806_v12, %v1822_v18  ;;  %v1831_v26 = vcombine.high %v1806_v12, %v1822_v18  ;;  %v1846_v27 = vcombine.low %v1813_v14, %v1829_v22  ;;  %v1847_v28 = vcombine.high %v1813_v14, %v1829_v22  ;;  %3452 = vadd.xlane.f32.xlu0 %v3451_v24 }
 0xa03   : > { %v1838_v31 = vrot.slane %v1830_v25, %v6239_v48  ;;  %v1845_v32 = vrot.slane %v1831_v26, %v6239_v48  ;;  %v1854_v33 = vrot.slane %v1846_v27, %v6239_v48  ;;  %v1861_v29 = vrot.slane %v1847_v28, %v6239_v48 }
 0xa05   : > { %v1866_v19 = vcombine.low %v1838_v31, %v1845_v32  ;;  %v4558_v34 = vcombine.high %v1838_v31, %v1845_v32  ;;  %v1882_v35 = vcombine.low %v1854_v33, %v1861_v29  ;;  %v4559_v9 = vcombine.high %v1854_v33, %v1861_v29 }
 0xa06   : > { %v5114_v36 = vpop.eup %5113 }
 0xa07   : > { %v1873_v37 = vrot.slane %v1866_v19, %v6237_v42  ;;  %v1881_v38 = vrot.slane %v4558_v34, %v6237_v42  ;;  %v1889_v39 = vrot.slane %v1882_v35, %v6237_v42  ;;  %v1897_v40 = vrot.slane %v4559_v9, %v6237_v42 }
 0xa08   : > { %v3454_v41 = vsel %vm2172_vm3, %v5114_v36, 0.0 }
 0xa09   : > { %v1898_v43 = vcombine.low %v1873_v37, %v1881_v38  ;;  %v1899_v44 = vcombine.high %v1873_v37, %v1881_v38  ;;  %v1914_v45 = vcombine.low %v1889_v39, %v1897_v40  ;;  %v1915_v46 = vcombine.high %v1889_v39, %v1897_v40  ;;  %3455 = vadd.xlane.f32.xlu0 %v3454_v41 }
 0xa0a   : > { %v5116_v47 = vpop.eup %5115 }
 0xa0b   : > { %v1906_v49 = vrot.slane %v1898_v43, %v6239_v48  ;;  %v1913_v50 = vrot.slane %v1899_v44, %v6239_v48  ;;  %v1922_v51 = vrot.slane %v1914_v45, %v6239_v48  ;;  %v1929_v52 = vrot.slane %v1915_v46, %v6239_v48 }
 0xa0c   : > { %v3457_v53 = vsel %vm2172_vm3, %v5116_v47, 0.0 }
 0xa0d   : > { %v1930_v54 = vcombine.low %v1906_v49, %v1922_v51  ;;  %v1931_v55 = vcombine.high %v1906_v49, %v1922_v51  ;;  %v1932_v56 = vcombine.low %v1913_v50, %v1929_v52  ;;  %v1933_v57 = vcombine.high %v1913_v50, %v1929_v52  ;;  %3458 = vadd.xlane.f32.xlu1 %v3457_v53 }
 0xa0f   : > { %v1934_v58 = vpack.c.bf16 %v1930_v54, %v1930_v54  ;;  %v1935_v59 = vpack.c.bf16 %v1931_v55, %v1931_v55  ;;  %v1936_v60 = vpack.c.bf16 %v1932_v56, %v1932_v56  ;;  %v1937_v61 = vpack.c.bf16 %v1933_v57, %v1933_v57 }
 0xa11   : > { %1938 = vst.msk [vmem:[#allocation5] sm:$0xf] %vm1283_vm2, %v1934_v58  ;;  %1939 = vst.msk [vmem:[#allocation5 + $0x4] sm:$0xf] %vm1283_vm2, %v1935_v59  ;;  %v5085_v58 = vld [vmem:[%s6792_s2 + $0x8] sm:$0xff]   ;;  %s1051_s2 = scalar_lea.vmem [#allocation31], %s4534_s0 }
 0xa12   : > { %1940 = vst.msk [vmem:[#allocation5 + $0x8] sm:$0xf] %vm1283_vm2, %v1936_v60  ;;  %1941 = vst.msk [vmem:[#allocation5 + $0xc] sm:$0xf] %vm1283_vm2, %v1937_v61  ;;  %s4244_s23 = sshll.u32 %s1051_s2, 4  ;;  %s6613_s23 = int_to_ptr.vmem [resolvable:$true] %s4244_s23 }
 0xa13   : > { %s5551_s0 = scalar_lea.vmem %s6613_s23, 128 }
 0xa14   : > { %p5552_p11 = scmp.ne.s32.totalorder %s6613_s23, %s5551_s0 }
 0xa16   : > { %p5553_p12 = pnand %p5552_p11, %p6801_p3 }
 0xa18   : > { %v3472_v62 = vld [vmem:[#allocation5] sm:$0xf]  ;;  %v3473_v63 = vld [vmem:[#allocation5 + $0x4] sm:$0xf]  ;;  %p5554_p7 = pneg %p5553_p12 }
 0xa19   : > { %v3474_v1 = vld [vmem:[#allocation5 + $0x8] sm:$0xf]  ;;  %v3475_v2 = vld [vmem:[#allocation5 + $0xc] sm:$0xf] }
 0xa36   : > { %3476 = vxpose.xlu0.c.b16.start.end [1/1] (short) (narrow) %v3472_v62, 16 }
 0xa3a   : > { %3538 = vxpose.xlu1.c.b16.start.end [1/1] (short) (narrow) %v3473_v63, 16  ;;  %3600 = vxpose.xlu0.c.b16.start.end [1/1] (short) (narrow) %v3474_v1, 16 }
 0xa3e   : > { %3662 = vxpose.xlu1.c.b16.start.end [1/1] (short) (narrow) %v3475_v2, 16 }
 0xa89   : > { %v3450_v3 = vpop.xlane.xlu1 %3449 }
 0xa8a   : > { %5117 = vrcp.f32 %v3450_v3  ;;  %v3453_v4 = vpop.xlane.xlu0 %3452 }
 0xa8b   : > { %5119 = vrcp.f32 %v3453_v4  ;;  %v5086_v4 = vld [vmem:[%s6793_s4] sm:$0xff]  }
 0xa92   : > { %v3456_v5 = vpop.xlane.xlu0 %3455 }
 0xa93   : > { %5121 = vrcp.f32 %v3456_v5 }
 0xa96   : > { %v3459_v6 = vpop.xlane.xlu1 %3458 }
 0xa97   : > { %v5118_v20 = vpop.eup %5117  ;;  %5123 = vrcp.f32 %v3459_v6 }
 0xa98   : > { %v5120_v7 = vpop.eup %5119  ;;  %v3464_v8 = vmul.f32 %v5118_v20, %v6494_v17  ;;  %v3484_v22 = vpop.trf.xlu0 }
 0xa99   : > { %v3465_v10 = vmul.f32 %v5120_v7, %v6497_v21 }
 0xa9a   : > { %v3468_v11 = vpack.c.bf16 %v3464_v8, %v3464_v8 }
 0xa9b   : > { %v3469_v13 = vpack.c.bf16 %v3465_v10, %v3465_v10 }
 0xa9c   : > { %v3496_v15 = vsel %vm2172_vm3, %v3468_v11, 0  ;;  %v3546_v14 = vpop.trf.xlu1  ;;  %v3608_v27 = vpop.trf.xlu0 }
 0xa9d   : > { %4807 = vmatpush3.bf16.xpose.msra.mxu1 %v3496_v15  ;;  %v3558_v16 = vsel %vm2172_vm3, %v3469_v13, 0 }
 0xa9e   : > { %4813 = vmatpush3.bf16.xpose.msra.mxu0 %v3558_v16  ;;  %4818 = vmatprep.subr.bf16.mxu1 %v5687_v0 }
 0xa9f   : > { %4824 = vmatprep.subr.bf16.mxu0 %v5687_v0 }
 0xaa0   : > { %v5122_v18 = vpop.eup %5121  ;;  %v3670_v28 = vpop.trf.xlu1 }
 0xaa1   : > { %v3466_v12 = vmul.f32 %v5122_v18, %v5114_v36 }
 0xaa3   : > { %v3470_v23 = vpack.c.bf16 %v3466_v12, %v3466_v12 }
 0xaa4   : > { %v5124_v17 = vpop.eup %5123  ;;  %4809 = vmatmul.mubr.msk.bf16.vlgmr.msra.gmra.mxu1 %vm2172_vm3, %v3484_v22 }
 0xaa5   : > { %4815 = vmatmul.mubr.msk.bf16.vlgmr.msra.gmra.mxu0 %vm2172_vm3, %v3546_v14  ;;  %v3620_v21 = vsel %vm2172_vm3, %v3470_v23, 0  ;;  %v3467_v24 = vmul.f32 %v5124_v17, %v5116_v47  ;;  %4820 = vmatprep.mubr.msk.bf16.mxu1 %vm5688_vm0, %v5687_v0 }
 0xaa6   : > { %4819 = vmatpush3.bf16.xpose.msra.mxu1 %v3620_v21  ;;  %4826 = vmatprep.mubr.msk.bf16.mxu0 %vm5688_vm0, %v5687_v0 }
 0xaa7   : > { %v3471_v25 = vpack.c.bf16 %v3467_v24, %v3467_v24  ;;  %4830 = vmatprep.subr.bf16.mxu1 %v5687_v0 }
 0xaa9   : > { %v3682_v26 = vsel %vm2172_vm3, %v3471_v25, 0 }
 0xaaa   : > { %4825 = vmatpush3.bf16.xpose.msra.mxu0 %v3682_v26 }
 0xaab   : > { %4838 = vmatprep.subr.bf16.mxu0 %v5687_v0 }
 0xaad   : > { %4821 = vmatmul.mubr.msk.bf16.vlgmr.msra.gmra.mxu1 %vm2172_vm3, %v3608_v27 }
 0xaae   : > { %4834 = vmatprep.mubr.msk.bf16.mxu1 %vm5688_vm0, %v5687_v0  ;;  %4831 = vmatpush3.bf16.msra.mxu1 %v5085_v58 }
 0xaaf   : > { %4832 = vmatprep.subr.bf16.mxu1 %v5687_v0 }
 0xab1   : > { %4827 = vmatmul.mubr.msk.bf16.vlgmr.msra.gmra.mxu0 %vm2172_vm3, %v3670_v28 }
 0xab2   : > { %4842 = vmatprep.mubr.msk.bf16.mxu0 %vm5688_vm0, %v5687_v0  ;;  %4833 = vmatpush3.bf16.msra.mxu1 %v5086_v4 }
 0xab3   : > { %4846 = vmatprep.subr.bf16.mxu1 %v5687_v0 }
 0xb64   : > { %v3532_v31 = vpop.f32.mrf.mxu1 }
 0xb65   : > { %v3594_v32 = vpop.f32.mrf.mxu0  ;;  %3724 = vxpose.xlu0.b32.start.end [1/1] (short) (narrow) %v3532_v31, 8 }
 0xb66   : > { %v4810_v33 = vpop.f32.mrf.mxu1  ;;  %3756 = vxpose.xlu1.b32.start.end [1/1] (short) (narrow) %v3594_v32, 8 }
 0xb67   : > { %v4816_v29 = vpop.f32.mrf.mxu0 }
 0xb68   : > { %v3535_v19 = vpop.f32.mrf.mxu1  ;;  %v5087_v29 = vld [vmem:[#allocation29 + $0x8] sm:$0xff]  }
 0xb69   : > { %v3597_v34 = vpop.f32.mrf.mxu0  ;;  %4839 = vmatpush3.bf16.msra.mxu0 %v5087_v29  ;;  %v5088_v19 = vld [vmem:[#allocation29] sm:$0xff]  }
 0xb6a   : > { %v4811_v35 = vpop.f32.mrf.mxu1  ;;  %4840 = vmatprep.subr.bf16.mxu0 %v5687_v0  ;;  %v4596_v34 = vld [vmem:[%s6794_s11] ss:$0 sm:$0xff]  ;;  %s6797_s11 = sld [smem:[#allocation65_spill]] }
 0xb6b   : > { %v4817_v9 = vpop.f32.mrf.mxu0 }
 0xb6d   : > { %v3656_v36 = vpop.f32.mrf.mxu1  ;;  %4841 = vmatpush3.bf16.msra.mxu0 %v5088_v19 }
 0xb6e   : > { %3788 = vxpose.xlu0.b32.start.end [1/1] (short) (narrow) %v3656_v36, 8 }
 0xb6f   : > { %v4822_v37 = vpop.f32.mrf.mxu1 }
 0xb71   : > { %v3659_v38 = vpop.f32.mrf.mxu1  ;;  %v3718_v39 = vpop.f32.mrf.mxu0 }
 0xb72   : > { %3820 = vxpose.xlu0.b32.start.end [1/1] (short) (narrow) %v3718_v39, 8 }
 0xb73   : > { %v4823_v40 = vpop.f32.mrf.mxu1  ;;  %v4828_v41 = vpop.f32.mrf.mxu0 }
 0xb75   : > { %v3721_v43 = vpop.f32.mrf.mxu0 }
 0xb77   : > { %v4829_v44 = vpop.f32.mrf.mxu0 }
 0xbe1   : > { %v3740_v45 = vpop.trf.xlu0 }
 0xbe2   : > { %v3772_v47 = vpop.trf.xlu1 }
 0xbea   : > { %v3804_v46 = vpop.trf.xlu0 }
 0xbeb   : > { %v3852_v49 = vcombine.low %v3740_v45, %v3804_v46  ;;  %v3853_v50 = vcombine.high %v3740_v45, %v3804_v46  ;;  %v4600_v45 = vld [vmem:[%s6797_s11] ss:$0 sm:$0xff]  ;;  %s6611_s11 = scalar_lea.hbm %s6800_s22, %s4611_s24 }
 0xbed   : > { %v3860_v54 = vrot.slane %v3852_v49, %v6237_v42  ;;  %v3867_v55 = vrot.slane %v3853_v50, %v6237_v42 }
 0xbee   : > { %v3836_v51 = vpop.trf.xlu0 }
 0xbef   : > { %v3868_v52 = vcombine.low %v3772_v47, %v3836_v51  ;;  %v3869_v53 = vcombine.high %v3772_v47, %v3836_v51 }
 0xbf1   : > { %v3876_v56 = vrot.slane %v3868_v52, %v6237_v42  ;;  %v3883_v57 = vrot.slane %v3869_v53, %v6237_v42 }
 0xbf3   : > { %v3884_v59 = vcombine.low %v3860_v54, %v3876_v56  ;;  %v3885_v60 = vcombine.high %v3860_v54, %v3876_v56  ;;  %v3900_v61 = vcombine.low %v3867_v55, %v3883_v57  ;;  %v3901_v62 = vcombine.high %v3867_v55, %v3883_v57 }
 0xbf5   : > { %v3892_v63 = vrot.slane %v3884_v59, %v6239_v48  ;;  %v3899_v1 = vrot.slane %v3885_v60, %v6239_v48  ;;  %v3908_v2 = vrot.slane %v3900_v61, %v6239_v48  ;;  %v3915_v3 = vrot.slane %v3901_v62, %v6239_v48 }
 0xbf7   : > { %v3920_v5 = vcombine.low %v3892_v63, %v3899_v1  ;;  %v4594_v6 = vcombine.high %v3892_v63, %v3899_v1  ;;  %v3936_v20 = vcombine.low %v3908_v2, %v3915_v3  ;;  %v4595_v7 = vcombine.high %v3908_v2, %v3915_v3 }
 0xbf9   : > { %v3927_v8 = vrot.slane %v3920_v5, %v6237_v42  ;;  %v3935_v10 = vrot.slane %v4594_v6, %v6237_v42  ;;  %v3943_v11 = vrot.slane %v3936_v20, %v6237_v42  ;;  %v3951_v13 = vrot.slane %v4595_v7, %v6237_v42 }
 0xbfb   : > { %v3953_v15 = vcombine.high %v3927_v8, %v3935_v10  ;;  %v3969_v16 = vcombine.high %v3943_v11, %v3951_v13  ;;  %v3952_v18 = vcombine.low %v3927_v8, %v3935_v10  ;;  %v3968_v22 = vcombine.low %v3943_v11, %v3951_v13 }
 0xbfd   : > { %v3967_v12 = vrot.slane %v3953_v15, %v6239_v48  ;;  %v3983_v14 = vrot.slane %v3969_v16, %v6239_v48  ;;  %v3960_v23 = vrot.slane %v3952_v18, %v6239_v48  ;;  %v3976_v17 = vrot.slane %v3968_v22, %v6239_v48 }
 0xbff   : > { %v3986_v21 = vcombine.low %v3967_v12, %v3983_v14  ;;  %v3985_v24 = vcombine.high %v3960_v23, %v3976_v17  ;;  %v3984_v25 = vcombine.low %v3960_v23, %v3976_v17  ;;  %v3987_v42 = vcombine.high %v3967_v12, %v3983_v14 }
 0xc01   : > { %3993 = vrot.lane.b32.xlu0 %v3986_v21, %s5694_s29  ;;  %3989 = vrot.lane.b32.xlu1 %v3985_v24, %s5695_s13  ;;  %s6795_s29 = sld [smem:[#allocation66_spill]] }
 0xc05   : > { %3997 = vrot.lane.b32.xlu1 %v3987_v42, %s5696_s9  ;;  %s6798_s9 = sld [smem:[#allocation67_spill]] }
 0xc07   : > { %s6796_s13 = smov %s6795_s29  ;;  %v5089_v41 = vld [vmem:[%s6795_s29 + $0x18] sm:$0xff]   ;;  %s5555_s29 = sshll.u32 %s5697_s30, 4  ;;  %s5556_s29 = int_to_ptr.vmem [resolvable:$false] %s5555_s29 }
 0xc08   : > { %v5090_v43 = vld [vmem:[%s6796_s13 + $0x10] sm:$0xff]   ;;  %v5092_v44 = vld [vmem:[%s6796_s13] sm:$0xff]   ;;  %p5558_p4 = scmp.lt.s32.totalorder %s6613_s23, %s5556_s29 }
 0xc0b   : > { %v4604_v57 = vld [vmem:[%s6798_s9] ss:$0 sm:$0xff]  ;;  %s5557_s9 = scalar_lea.vmem %s5556_s29, 256 }
 0xc0c   : > { %p5559_p13 = scmp.lt.s32.totalorder %s5557_s9, %s5551_s0 }
 0xc0e   : > { %p5560_p2 = por %p5559_p13, %p5558_p4 }
 0xc10   : > { %p5561_p1 = pnand %p5560_p2, %p5554_p7 }
 0xc73   : > { %v3990_v26 = vpop.permute.xlu1 %3989  ;;  %v3994_v27 = vpop.permute.xlu0 %3993 }
 0xc74   : > { %v4000_v28 = vsel %vm2172_vm3, %v3984_v25, %v3990_v26 }
 0xc75   : > { %v4001_v32 = vsel %vm2940_vm5, %v4000_v28, %v3994_v27 }
 0xc77   : > { %v3998_v31 = vpop.permute.xlu1 %3997 }
 0xc78   : > { %v4002_v33 = vsel %vm2942_vm6, %v4001_v32, %v3998_v31 }
 0xc79   : > { %v4003_v48 = vpack.c.bf16 %v4002_v33, %v4002_v33 }
 0xc7b   : > { %4835 = vmatmul.mubr.msk.bf16.vlgmr.msra.gmra.mxu1 %vm1089_vm1, %v4003_v48 }
 0xc7c   : > { %4854 = vmatprep.mubr.msk.bf16.mxu1 %vm5688_vm0, %v5687_v0  ;;  %4847 = vmatpush3.bf16.msra.mxu1 %v5089_v41 }
 0xc7d   : > { %4848 = vmatprep.subr.bf16.mxu1 %v5687_v0 }
 0xc80   : > { %4849 = vmatpush3.bf16.msra.mxu1 %v5090_v43 }
 0xc81   : > { %4850 = vmatprep.subr.bf16.mxu1 %v5687_v0 }
 0xd3b   : > { %v4064_v35 = vpop.f32.mrf.mxu1 }
 0xd3c   : > { %v4065_v9 = vadd.f32 %v4596_v34, %v4064_v35 }
 0xd3d   : > { %v4836_v36 = vpop.f32.mrf.mxu1 }
 0xd3e   : > { %v4070_v37 = vadd.f32 %v4065_v9, %v6429_v30  ;;  %v5091_v30 = vld [vmem:[%s6796_s13 + $0x8] sm:$0xff]  }
 0xd3f   : > { %v4067_v38 = vpop.f32.mrf.mxu1  ;;  %4851 = vmatpush3.bf16.msra.mxu1 %v5091_v30 }
 0xd40   : > { %v4071_v39 = vpack.c.bf16 %v4070_v37, %v4070_v37  ;;  %4852 = vmatprep.subr.bf16.mxu1 %v5687_v0 }
 0xd41   : > { %v4837_v40 = vpop.f32.mrf.mxu1 }
 0xd42   : > { %4843 = vmatmul.mubr.msk.bf16.vlgmr.msra.gmra.mxu0 %vm1089_vm1, %v4071_v39 }
 0xd43   : > { %4853 = vmatpush3.bf16.msra.mxu1 %v5092_v44 }
 0xe02   : > { %v4132_v46 = vpop.f32.mrf.mxu0 }
 0xe03   : > { %v4133_v47 = vadd.f32 %v4600_v45, %v4132_v46 }
 0xe04   : > { %v4844_v49 = vpop.f32.mrf.mxu0 }
 0xe05   : > { %v4139_v50 = vmul.f32 0.70710677, %v4133_v47  ;;  %v4138_v0 = vmul.f32 0.5, %v4133_v47 }
 0xe06   : > { %v4135_v51 = vpop.f32.mrf.mxu0 }
 0xe07   : > { %5125 = verf.f32 %v4139_v50 }
 0xe08   : > { %v4845_v52 = vpop.f32.mrf.mxu0 }
 0xe14   : > { %v5126_v53 = vpop.eup %5125 }
 0xe15   : > { %v4141_v54 = vadd.f32 1.0, %v5126_v53 }
 0xe17   : > { %v4142_v55 = vmul.f32 %v4141_v54, %v4138_v0 }
 0xe19   : > { %v4143_v56 = vpack.c.bf16 %v4142_v55, %v4142_v55 }
 0xe1b   : > { %4855 = vmatmul.mubr.msk.bf16.vlgmr.msra.gmra.mxu1 %vm4183_vm8, %v4143_v56 }
 0xedb   : > { %v4221_v58 = vpop.f32.mrf.mxu1 }
 0xedc   : > { %v4222_v59 = vadd.f32 %v4604_v57, %v4221_v58 }
 0xedd   : > { %v4856_v60 = vpop.f32.mrf.mxu1 }
 0xede   : > { %v4227_v61 = vadd.f32 %v4222_v59, %v4070_v37 }
 0xedf   : > { %v4224_v62 = vpop.f32.mrf.mxu1 }
 0xee0   : > { %4228 = vst.msk [vmem:[%s1051_s2] sm:$0xff] %vm1089_vm1, %v4227_v61 }
 0xee1   : > { %v4857_v63 = vpop.f32.mrf.mxu1 }
 0xee2   : > { %5564 = shalt.err (!%p5561_p1)
}
 0xee3   : > { %s5565_s24 = scalar_lea.hbm %s6611_s11, 128  ;;  %s5569_s26 = scalar_lea.hbm %s6800_s22, 256 }
 0xee4   : > { %p5566_p10 = scmp.ne.s32.totalorder %s6611_s11, %s5565_s24  ;;  %p5570_p8 = scmp.lt.s32.totalorder %s6611_s11, %s6800_s22 }
 0xee5   : > { %p5571_p9 = scmp.lt.s32.totalorder %s5569_s26, %s5565_s24 }
 0xee6   : > { %p5567_p5 = pnand %p5566_p10, %p6801_p3 }
 0xee7   : > { %p5572_p0 = por %p5571_p9, %p5570_p8 }
 0xee8   : > { %p5568_p6 = pneg %p5567_p5 }
 0xeea   : > { %p5573_p11 = pnand %p5572_p0, %p5568_p6 }
 0xeec   : > { %5576 = shalt.err (!%p5573_p11)
}
 0xeed   : > { %4914 = dma.vmem_to_hbm [thread:$0]  (%p6801_p3), %s6613_s23, 128, %s6611_s11, %s4230_s27  }
 0xeee PF: > { %s6802_s0 = sld [smem:[#allocation43_spill]]  ;;  %p6805_p7 = scmp.ge.s32.totalorder %s5667_s3, 2 }
 0xeef   : > { %s6803_s29 = sld [smem:[#allocation48_spill]] }
 0xef4   : > { %s4256_s9 = sand.u32 1, %s6802_s0  }
 0xef5   : > { %p6804_p12 = scmp.ne.s32.totalorder %s6803_s29, 0  ;;  %s4257_s17 = scalar_lea.sflag [#allocation8], %s4256_s9 }
 0xef7   : > { %p4967_p4 = pnand %p6805_p7, %p6804_p12 }
 0xef9   : > { %p4968_p13 = pneg %p4967_p4 }
 0xefb   : > { %5642 = dma.done.wait (%p4968_p13), %s4257_s17, 128  }
 0xefc   : > { %5644 = vsyncadd (%p4968_p13), %s4257_s17, 4294967168  ;;  %s46_s3 = sadd.s32 1, %s5667_s3   ;;  %s6806_s29 = sld [smem:[#allocation44_spill]] }
 0xefd   : > { %p43_p2 = scmp.ge.s32.totalorder %s46_s3, 4   ;;  %s6807_s2 = smov %s5655_s6 }
 0xefe   : > { %s6808_s6 = smov %s6031_s28  ;;  %s6809_s30 = smov %s5663_s7 }
 0xeff   : > { %s6810_s7 = smov %s6812_s19  ;;  %45 = sbr.rel (!%p43_p2) target bundleno = 33 (0x21), region = 240 }
 0xf04   :  { %4262 = vsyncpa [#allocation7], 1 }
 0xf05   :  { %4264 = vsyncpa [#allocation7 + $0x1], 1 }
 0xf06   :  { %4265 = vsyncpa [#allocation10], 1 }
 0xf07   :  { %4266 = vsyncpa [#allocation15], 1 }
 0xf08   :  { %4267 = vsyncpa [#allocation18], 1 }
 0xf09   :  { %4268 = vsyncpa [#allocation21], 1 }
 0xf0a   :  { %4269 = vsyncpa [#allocation24], 1 }
 0xf0b   :  { %4270 = vsyncpa [#allocation27], 1 }
 0xf0c   :  { %4271 = vsyncpa [#allocation30], 1 }
 0xf0d   :  { %4272 = vsyncpa [#allocation8], 1 }
 0xf0e   :  { %4274 = vsyncpa [#allocation8 + $0x1], 1 }

// kernel: tpu_custom_call.1
= control target key start
LH: loop header
LB: loop body
LE: loop exit
PB: predicated region body
PF: predicated region fallthrough
CT: control target
= control target key end

     0   :  { %s6708_s0 = inlined_call_operand.vmem [shape: f32[2,8,32], index: 0, kind: input, shape index: {}]   ;;  %s6709_s1 = inlined_call_operand.hbm [shape: bf16[2,8,32], index: 1, kind: input, shape index: {}]   ;;  %s6710_s2 = inlined_call_operand.hbm [shape: bf16[2,8,32], index: 2, kind: input, shape index: {}]   ;;  %s6711_s3 = inlined_call_operand.hbm [shape: s8[2,1,8,8], index: 3, kind: input, shape index: {}]   ;;  %s6712_s4 = inlined_call_operand.hbm [shape: s8[2,1,8,8], index: 4, kind: input, shape index: {}]   ;;  %s6713_s5 = inlined_call_operand.vmem [shape: bf16[32,32], index: 5, kind: input, shape index: {}]   ;;  %s6714_s6 = inlined_call_operand.hbm [shape: f32[1,32], index: 6, kind: input, shape index: {}]   ;;  %s6715_s7 = inlined_call_operand.vmem [shape: bf16[32,32], index: 7, kind: input, shape index: {}]   ;;  %s6716_s8 = inlined_call_operand.hbm [shape: f32[1,32], index: 8, kind: input, shape index: {}]   ;;  %s6717_s9 = inlined_call_operand.vmem [shape: bf16[32,32], index: 9, kind: input, shape index: {}]   ;;  %s6718_s10 = inlined_call_operand.hbm [shape: f32[1,32], index: 10, kind: input, shape index: {}]   ;;  %s6719_s11 = inlined_call_operand.hbm [shape: bf16[32,32], index: 11, kind: input, shape index: {}]   ;;  %s6720_s12 = inlined_call_operand.hbm [shape: f32[1,32], index: 12, kind: input, shape index: {}]   ;;  %s6721_s13 = inlined_call_operand.hbm [shape: bf16[32,32], index: 13, kind: input, shape index: {}]   ;;  %s6722_s14 = inlined_call_operand.hbm [shape: f32[1,32], index: 14, kind: input, shape index: {}]   ;;  %s6723_s15 = inlined_call_operand.hbm [shape: bf16[32,32], index: 15, kind: input, shape index: {}]   ;;  %s6724_s16 = inlined_call_operand.hbm [shape: f32[1,32], index: 16, kind: input, shape index: {}]   ;;  %s6725_s17 = inlined_call_operand.hbm [shape: bf16[32,32], index: 17, kind: input, shape index: {}]   ;;  %s6726_s18 = inlined_call_operand.hbm [shape: f32[1,32], index: 18, kind: input, shape index: {}]   ;;  %s6727_s19 = inlined_call_operand.vmem [shape: bf16[32,32], index: 19, kind: input, shape index: {}]   ;;  %s6728_s20 = inlined_call_operand.vmem [shape: f32[1,32], index: 20, kind: input, shape index: {}]   ;;  %s6729_s21 = inlined_call_operand.hbm [shape: bf16[32,64], index: 21, kind: input, shape index: {}]   ;;  %s6730_s22 = inlined_call_operand.vmem [shape: f32[1,64], index: 22, kind: input, shape index: {}]   ;;  %s6731_s23 = inlined_call_operand.vmem [shape: bf16[64,32], index: 23, kind: input, shape index: {}]   ;;  %s6732_s24 = inlined_call_operand.vmem [shape: f32[1,32], index: 24, kind: input, shape index: {}]   ;;  %s6733_s25 = inlined_call_operand.hbm [shape: f32[2,8,32], index: 25, kind: output, shape index: {}]  }
   0x1   :  { %6755 = sst [smem:[#allocation49_spill]] %s6708_s0 }
   0x2   :  { %6756 = sst [smem:[#allocation50_spill]] %s6709_s1 }
   0x3   :  { %6757 = sst [smem:[#allocation51_spill]] %s6710_s2 }
   0x4   :  { %6758 = sst [smem:[#allocation52_spill]] %s6711_s3 }
   0x5   :  { %6759 = sst [smem:[#allocation53_spill]] %s6712_s4 }
   0x6   :  { %6760 = sst [smem:[#allocation54_spill]] %s6713_s5 }
   0x7   :  { %6761 = sst [smem:[#allocation55_spill]] %s6714_s6 }
   0x8   :  { %6762 = sst [smem:[#allocation56_spill]] %s6715_s7 }
   0x9   :  { %6763 = sst [smem:[#allocation57_spill]] %s6716_s8 }
   0xa   :  { %6764 = sst [smem:[#allocation58_spill]] %s6717_s9 }
   0xb   :  { %6765 = sst [smem:[#allocation59_spill]] %s6718_s10 }
   0xc   :  { %6766 = sst [smem:[#allocation60_spill]] %s6719_s11 }
   0xd   :  { %6767 = sst [smem:[#allocation61_spill]] %s6720_s12 }
   0xe   :  { %6768 = sst [smem:[#allocation62_spill]] %s6721_s13 }
   0xf   :  { %6769 = sst [smem:[#allocation63_spill]] %s6723_s15 }
  0x10   :  { %6770 = sst [smem:[#allocation64_spill]] %s6725_s17 }
  0x11   :  { %6771 = sst [smem:[#allocation65_spill]] %s6727_s19 }
  0x12   :  { %6772 = sst [smem:[#allocation66_spill]] %s6728_s20 }
  0x13   :  { %6773 = sst [smem:[#allocation67_spill]] %s6730_s22 }
  0x14   :  { %6774 = sst [smem:[#allocation68_spill]] %s6731_s23 }
  0x15   :  { %6775 = sst [smem:[#allocation69_spill]] %s6732_s24 }
  0x16   :  { %6776 = sst [smem:[#allocation70_spill]] %s6733_s25 }
  0x17   :  { %30 = vsyncpa [#allocation7], 0 }
  0x18   :  { %32 = vsyncpa [#allocation7 + $0x1], 0 }
  0x19   :  { %33 = vsyncpa [#allocation10], 0 }
  0x1a   :  { %35 = vsyncpa [#allocation10 + $0x1], 0 }
  0x1b   :  { %36 = vsyncpa [#allocation13], 0 }
  0x1c   :  { %38 = vsyncpa [#allocation13 + $0x1], 0 }
  0x1d   :  { %39 = vsyncpa [#allocation16], 0 }
  0x1e   :  { %40 = vsyncpa [#allocation19], 0 }
  0x1f   :  { %41 = vsyncpa [#allocation22], 0 }
  0x20   :  { %42 = vsyncpa [#allocation25], 0 }
  0x21   :  { %43 = vsyncpa [#allocation28], 0 }
  0x22   :  { %44 = vsyncpa [#allocation31], 0 }
  0x23   :  { %45 = vsyncpa [#allocation8], 0 }
  0x24   :  { %47 = vsyncpa [#allocation8 + $0x1], 0  ;;  %s5890_s29 = smov 0   ;;  %s5892_s2 = smov 0  }
  0x25   :  { %s5894_s6 = smov 0   ;;  %s5896_s30 = smov 0  }
  0x26   :  { %s5898_s7 = smov 0   ;;  %s5900_s3 = smov 0  }
  0x27 LB: > { %6777 = sst [smem:[#allocation44_spill]] %s5709_s29  ;;  %s5921_s26 = sadd.s32 4294967295, %s5729_s3   ;;  %s5729_s3 = sphi %s5900_s3, %s53_s3   ;;  %s5725_s7 = sphi %s5898_s7, %s6853_s7   ;;  %s5721_s30 = sphi %s5896_s30, %s6852_s30   ;;  %s5717_s6 = sphi %s5894_s6, %s6848_s6   ;;  %s5713_s2 = sphi %s5892_s2, %s6851_s2   ;;  %s5709_s29 = sphi %s5890_s29, %s6850_s29  }
  0x28   : > { %6778 = sst [smem:[#allocation45_spill]] %s5717_s6  ;;  %p4559_p0 = scmp.ge.s32.totalorder %s5729_s3, 1 }
  0x29   : > { %p6739_p1 = scmp.eq.s32.totalorder %s5921_s26, 0  ;;  %p654_p2 = scmp.lt.s32.totalorder %s5729_s3, 3 }
  0x2a   : > { %s5731_s8 = smov [#allocation14]   ;;  %s5732_s4 = smov [#allocation15]  }
  0x2b   : > { %p5926_p3 = pnand %p4559_p0, %p654_p2  ;;  %s670_s27 = sshll.u32 %s5731_s8, 4  ;;  %s671_s27 = int_to_ptr.vmem [resolvable:$true] %s670_s27 }
  0x2c   : > { %s684_s28 = sshll.u32 %s5732_s4, 4  ;;  %s5733_s5 = smov [#allocation18]   ;;  %s685_s28 = int_to_ptr.vmem [resolvable:$true] %s684_s28 }
  0x2d   : > { %s6779_s1 = scalar_select %p5926_p3, 1, 0 }
  0x2e   : > { %p4980_p5 = pneg %p5926_p3  ;;  %s708_s0 = sshll.u32 %s5733_s5, 4  ;;  %s5939_s0 = int_to_ptr.vmem [resolvable:$true] %s708_s0 }
  0x2f   : > { %s5200_s25 = scalar_lea.vmem %s671_s27, 16  ;;  %s5207_s4 = scalar_lea.vmem %s671_s27, 32 }
  0x30   : > { %p5935_p6 = pnand %p4980_p5, %p6739_p1  ;;  %p5201_p8 = scmp.ne.s32.totalorder %s671_s27, %s5200_s25 }
  0x31   : > { %p5208_p11 = scmp.lt.s32.totalorder %s671_s27, %s671_s27  ;;  %p5209_p12 = scmp.lt.s32.totalorder %s5207_s4, %s5200_s25 }
  0x32   : > { %p5943_p7 = pneg %p5935_p6 }
  0x33   : > { %p5210_p13 = por %p5209_p12, %p5208_p11 }
  0x34   : > { %p5203_p9 = pnand %p5201_p8, %p5943_p7 }
  0x36   : > { %p5204_p10 = pneg %p5203_p9 }
  0x38   : > { %p5211_p0 = pnand %p5210_p13, %p5204_p10 }
  0x3a   : > { %5214 = shalt.err (!%p5211_p0)
}
  0x3b   : > { %s6782_s22 = sld [smem:[#allocation55_spill]]  ;;  %s5226_s23 = scalar_lea.vmem %s685_s28, 16 }
  0x3c   : > { %p5227_p2 = scmp.ne.s32.totalorder %s685_s28, %s5226_s23  ;;  %s5233_s20 = scalar_lea.vmem %s685_s28, 32 }
  0x3d   : > { %p5234_p8 = scmp.lt.s32.totalorder %s685_s28, %s685_s28  ;;  %p5235_p9 = scmp.lt.s32.totalorder %s5233_s20, %s5226_s23 }
  0x3e   : > { %p5229_p5 = pnand %p5227_p2, %p5943_p7 }
  0x3f   : > { %p5236_p1 = por %p5235_p9, %p5234_p8 }
  0x40   : > { %p5230_p4 = pneg %p5229_p5 }
  0x41   : > { %4983 = dma.hbm_to_vmem [thread:$0]  (!%p5935_p6), %s6782_s22, 16, %s671_s27, [#allocation13]  }
  0x42   : > { %p5237_p3 = pnand %p5236_p1, %p5230_p4 }
  0x44   : > { %5240 = shalt.err (!%p5237_p3)
}
  0x45   : > { %s6783_s19 = sld [smem:[#allocation57_spill]]  ;;  %s5252_s22 = scalar_lea.vmem %s5939_s0, 256 }
  0x46   : > { %p5253_p10 = scmp.ne.s32.totalorder %s5939_s0, %s5252_s22  ;;  %p5260_p13 = scmp.lt.s32.totalorder %s5939_s0, %s5939_s0 }
  0x47   : > { %p5261_p0 = scmp.lt.s32.totalorder %s5252_s22, %s5252_s22 }
  0x48   : > { %p5255_p11 = pnand %p5253_p10, %p5943_p7 }
  0x49   : > { %p5262_p1 = por %p5261_p0, %p5260_p13 }
  0x4a   : > { %p5256_p12 = pneg %p5255_p11 }
  0x4b   : > { %4986 = dma.hbm_to_vmem [thread:$0]  (!%p5935_p6), %s6783_s19, 16, %s685_s28, [#allocation16]  }
  0x4c   : > { %p5263_p3 = pnand %p5262_p1, %p5256_p12 }
  0x4e   : > { %5266 = shalt.err (!%p5263_p3)
}
  0x4f   : > { %s6742_s20 = smov 64   ;;  %s6743_s23 = smov 4  }
  0x50   : > { %s6784_s11 = sld [smem:[#allocation60_spill]]  ;;  %s5736_s27 = smov [#allocation21]  }
  0x51   : > { %s732_s28 = sshll.u32 %s5736_s27, 4  ;;  %s5737_s5 = smov [#allocation24]   ;;  %s733_s28 = int_to_ptr.vmem [resolvable:$true] %s732_s28 }
  0x52   : > { %s756_s25 = sshll.u32 %s5737_s5, 4  ;;  %s5278_s4 = scalar_lea.vmem %s733_s28, 256  ;;  %s757_s25 = int_to_ptr.vmem [resolvable:$true] %s756_s25 }
  0x53   : > { %p5279_p4 = scmp.ne.s32.totalorder %s733_s28, %s5278_s4  ;;  %p5286_p8 = scmp.lt.s32.totalorder %s733_s28, %s733_s28 }
  0x54   : > { %p5287_p9 = scmp.lt.s32.totalorder %s5278_s4, %s5278_s4 }
  0x55   : > { %p5281_p2 = pnand %p5279_p4, %p5943_p7 }
  0x56   : > { %4992 = dma.hbm_to_vmem [thread:$0]  (!%p5935_p6), %s6784_s11, 256, %s5939_s0, [#allocation19], %s6742_s20, %s6742_s20, %s6743_s23  }
  0x57   : > { %p5282_p5 = pneg %p5281_p2  ;;  %p5288_p10 = por %p5287_p9, %p5286_p8 }
  0x59   : > { %p5289_p11 = pnand %p5288_p10, %p5282_p5 }
  0x5b   : > { %5292 = shalt.err (!%p5289_p11)
}
  0x5c   : > { %s6785_s13 = sld [smem:[#allocation62_spill]]  ;;  %s5304_s19 = scalar_lea.vmem %s757_s25, 256 }
  0x5d   : > { %p5305_p12 = scmp.ne.s32.totalorder %s757_s25, %s5304_s19  ;;  %p5312_p1 = scmp.lt.s32.totalorder %s757_s25, %s757_s25 }
  0x5e   : > { %p5313_p3 = scmp.lt.s32.totalorder %s5304_s19, %s5304_s19 }
  0x5f   : > { %p5307_p13 = pnand %p5305_p12, %p5943_p7 }
  0x60   : > { %p5314_p4 = por %p5313_p3, %p5312_p1 }
  0x61   : > { %p5308_p0 = pneg %p5307_p13 }
  0x62   : > { %4998 = dma.hbm_to_vmem [thread:$0]  (!%p5935_p6), %s6785_s13, 256, %s733_s28, [#allocation22], %s6742_s20, %s6742_s20, %s6743_s23  }
  0x63   : > { %p5315_p2 = pnand %p5314_p4, %p5308_p0 }
  0x65   : > { %5318 = shalt.err (!%p5315_p2)
}
  0x66   : > { %s6786_s15 = sld [smem:[#allocation63_spill]]  ;;  %s5738_s28 = smov [#allocation27]  }
  0x67   : > { %s780_s5 = sshll.u32 %s5738_s28, 4  ;;  %s781_s5 = int_to_ptr.vmem [resolvable:$true] %s780_s5 }
  0x68   : > { %s5330_s4 = scalar_lea.vmem %s781_s5, 256  ;;  %p5338_p10 = scmp.lt.s32.totalorder %s781_s5, %s781_s5 }
  0x69   : > { %p5331_p5 = scmp.ne.s32.totalorder %s781_s5, %s5330_s4  ;;  %p5339_p11 = scmp.lt.s32.totalorder %s5330_s4, %s5330_s4 }
  0x6b   : > { %p5333_p8 = pnand %p5331_p5, %p5943_p7  ;;  %p5340_p12 = por %p5339_p11, %p5338_p10 }
  0x6c   : > { %5004 = dma.hbm_to_vmem [thread:$0]  (!%p5935_p6), %s6786_s15, 256, %s757_s25, [#allocation25], %s6742_s20, %s6742_s20, %s6743_s23  }
  0x6d   : > { %p5334_p9 = pneg %p5333_p8 }
  0x6f   : > { %p5341_p13 = pnand %p5340_p12, %p5334_p9 }
  0x71   : > { %5344 = shalt.err (!%p5341_p13)
}
  0x72   : > { %s6787_s17 = sld [smem:[#allocation64_spill]]  ;;  %s4558_s22 = sadd.s32 4294967294, %s5729_s3  }
  0x73   : > { %s65_s19 = sadd.s32 1, %s5725_s7  ;;  %s100_s24 = sadd.s32 1, %s5717_s6 }
  0x74   : > { %p67_p0 = scmp.ge.s32.totalorder %s65_s19, 2  ;;  %p107_p1 = scmp.ne.s32.totalorder %s5717_s6, %s5713_s2 }
  0x75   : > { %p108_p3 = scmp.eq.s32.totalorder %s5729_s3, 0  ;;  %p113_p2 = scmp.ne.s32.totalorder %s5713_s2, %s5709_s29 }
  0x76   : > { %s6855_s19 = smov (%p67_p0, %s65_s19), 0  ;;  %p641_p5 = scmp.eq.s32.totalorder %s5921_s26, 1 }
  0x77   : > { %6788 = sst [smem:[#allocation46_spill]] %s6855_s19  ;;  %p6014_p4 = por %p108_p3, %p107_p1 }
  0x78   : > { %5010 = dma.hbm_to_vmem [thread:$0]  (!%p5935_p6), %s6787_s17, 256, %s781_s5, [#allocation28], %s6742_s20, %s6742_s20, %s6743_s23  }
  0x79   : > { %s97_s28 = ssub.s32 %s5725_s7, %s6855_s19  ;;  %p6790_p9 = scmp.eq.s32.totalorder %s5921_s26, 0 }
  0x7a   : > { %p98_p8 = scmp.eq.s32.totalorder %s97_s28, 0  ;;  %p6029_p11 = por %p641_p5, %p107_p1 }
  0x7b   : > { %p6025_p10 = por %p6790_p9, %p113_p2  ;;  %p647_p12 = scmp.eq.s32.totalorder %s4558_s22, 1 }
  0x7c   : > { %s6792_s4 = scalar_select %p6029_p11, 1, 0 }
  0x7d   : > { %s6791_s5 = scalar_select %p6025_p10, 1, 0 }
  0x7e   : > { %s6034_s0 = scalar_select %p98_p8, %s5717_s6, %s100_s24  }
  0x7f   : > { %p6036_p13 = por %p647_p12, %p113_p2  ;;  %p5046_p0 = scmp.lt.s32.totalorder %s5729_s3, 2 }
  0x80   : > { %6793 = sst [smem:[#allocation47_spill]] %s6034_s0  ;;  %s6042_s20 = sand.u32 1, %s5717_s6  }
  0x81   : > { %s6794_s25 = scalar_select %p6036_p13, 1, 0 }
  0x82   : > { %s4574_s28 = sshll.u32 %s5725_s7, 6  ;;  %s6749_s23 = sshll.u32 %s6042_s20, 2 }
  0x83   : > { %6795 = sst [smem:[#allocation48_spill]] %s6794_s25  ;;  %p6048_p3 = pnand %p5046_p0, %p6014_p4 }
  0x84   : > { %s6748_s22 = sand.u32 1, %s5729_s3   ;;  %s6797_s15 = sld [smem:[#allocation51_spill]] }
  0x85   : > { %s6796_s11 = scalar_select %p6048_p3, 1, 0 }
  0x86   : > { %s865_s19 = scalar_lea.vmem [#allocation9], %s6749_s23  ;;  %s6062_s6 = scalar_lea.sflag [#allocation10], %s6748_s22 }
  0x87   : > { %s872_s0 = sshll.u32 %s865_s19, 4  ;;  %p6750_p1 = pneg %p6048_p3  ;;  %s873_s0 = int_to_ptr.vmem [resolvable:$true] %s872_s0 }
  0x88   : > { %s5358_s27 = scalar_lea.vmem %s873_s0, 64  ;;  %s5739_s25 = smov [#allocation9]  }
  0x89   : > { %p5359_p4 = scmp.ne.s32.totalorder %s873_s0, %s5358_s27  ;;  %s5363_s29 = sshll.u32 %s5739_s25, 4  ;;  %s5364_s29 = int_to_ptr.vmem [resolvable:$false] %s5363_s29 }
  0x8a   : > { %s870_s17 = scalar_lea.hbm %s6797_s15, %s4574_s28  ;;  %s5365_s13 = scalar_lea.vmem %s5364_s29, 128 }
  0x8b   : > { %p5361_p2 = pnand %p5359_p4, %p6750_p1  ;;  %p5366_p8 = scmp.lt.s32.totalorder %s873_s0, %s5364_s29 }
  0x8c   : > { %p5367_p9 = scmp.lt.s32.totalorder %s5365_s13, %s5358_s27 }
  0x8d   : > { %p5362_p5 = pneg %p5361_p2 }
  0x8e   : > { %p5368_p12 = por %p5367_p9, %p5366_p8 }
  0x90   : > { %p5369_p0 = pnand %p5368_p12, %p5362_p5 }
  0x92   : > { %5372 = shalt.err (!%p5369_p0)
}
  0x93   : > { %5023 = dma.hbm_to_vmem [thread:$0]  (!%p6048_p3), %s870_s17, 64, %s873_s0, %s6062_s6  }
  0x94   : > { %s5740_s15 = smov [#allocation17]   ;;  %s5741_s24 = smov [#allocation20]  }
  0x95   : > { %s698_s19 = sshll.u32 %s5740_s15, 4  ;;  %s722_s22 = sshll.u32 %s5741_s24, 4  ;;  %s699_s19 = int_to_ptr.vmem [resolvable:$true] %s698_s19  ;;  %s723_s22 = int_to_ptr.vmem [resolvable:$true] %s722_s22 }
  0x96   : > { %s5384_s23 = scalar_lea.vmem %s699_s19, 16  ;;  %s5391_s29 = scalar_lea.vmem %s699_s19, 32 }
  0x97   : > { %p5385_p4 = scmp.ne.s32.totalorder %s699_s19, %s5384_s23  ;;  %p5392_p8 = scmp.lt.s32.totalorder %s699_s19, %s699_s19 }
  0x98   : > { %p5393_p5 = scmp.lt.s32.totalorder %s5391_s29, %s5384_s23 }
  0x99   : > { %p5387_p2 = pnand %p5385_p4, %p5943_p7 }
  0x9a   : > { %p5394_p9 = por %p5393_p5, %p5392_p8 }
  0x9b   : > { %p5388_p1 = pneg %p5387_p2 }
  0x9d   : > { %p5395_p12 = pnand %p5394_p9, %p5388_p1 }
  0x9f   : > { %5398 = shalt.err (!%p5395_p12)
}
  0xa0   : > { %s6798_s10 = sld [smem:[#allocation59_spill]]  ;;  %s5410_s25 = scalar_lea.vmem %s723_s22, 16 }
  0xa1   : > { %p5411_p0 = scmp.ne.s32.totalorder %s723_s22, %s5410_s25  ;;  %s5417_s27 = scalar_lea.vmem %s723_s22, 32 }
  0xa2   : > { %p5418_p4 = scmp.lt.s32.totalorder %s723_s22, %s723_s22  ;;  %p5419_p2 = scmp.lt.s32.totalorder %s5417_s27, %s5410_s25 }
  0xa3   : > { %p5413_p13 = pnand %p5411_p0, %p5943_p7 }
  0xa4   : > { %p5420_p10 = por %p5419_p2, %p5418_p4 }
  0xa5   : > { %p5414_p11 = pneg %p5413_p13 }
  0xa6   : > { %4989 = dma.hbm_to_vmem [thread:$0]  (!%p5935_p6), %s6798_s10, 16, %s699_s19, [#allocation16]  }
  0xa7   : > { %p5421_p3 = pnand %p5420_p10, %p5414_p11 }
  0xa9   : > { %5424 = shalt.err (!%p5421_p3)
}
  0xaa   : > { %s6799_s12 = sld [smem:[#allocation61_spill]]  ;;  %s5742_s15 = smov [#allocation23]  }
  0xab   : > { %s746_s19 = sshll.u32 %s5742_s15, 4  ;;  %s5743_s24 = smov [#allocation26]   ;;  %s747_s19 = int_to_ptr.vmem [resolvable:$true] %s746_s19 }
  0xac   : > { %s770_s29 = sshll.u32 %s5743_s24, 4  ;;  %s5436_s17 = scalar_lea.vmem %s747_s19, 16  ;;  %s771_s29 = int_to_ptr.vmem [resolvable:$true] %s770_s29 }
  0xad   : > { %p5437_p13 = scmp.ne.s32.totalorder %s747_s19, %s5436_s17  ;;  %s5443_s0 = scalar_lea.vmem %s747_s19, 32 }
  0xae   : > { %p5444_p10 = scmp.lt.s32.totalorder %s747_s19, %s747_s19  ;;  %p5445_p11 = scmp.lt.s32.totalorder %s5443_s0, %s5436_s17 }
  0xaf   : > { %p5439_p1 = pnand %p5437_p13, %p5943_p7 }
  0xb0   : > { %4995 = dma.hbm_to_vmem [thread:$0]  (!%p5935_p6), %s6799_s12, 16, %s723_s22, [#allocation19]  }
  0xb1   : > { %p5440_p8 = pneg %p5439_p1  ;;  %p5446_p3 = por %p5445_p11, %p5444_p10 }
  0xb3   : > { %p5447_p5 = pnand %p5446_p3, %p5440_p8 }
  0xb5   : > { %5450 = shalt.err (!%p5447_p5)
}
  0xb6   : > { %5001 = dma.hbm_to_vmem [thread:$0]  (!%p5935_p6), %s6722_s14, 16, %s747_s19, [#allocation22]  }
  0xb7   : > { %s5462_s27 = scalar_lea.vmem %s771_s29, 16  ;;  %s5469_s23 = scalar_lea.vmem %s771_s29, 32 }
  0xb8   : > { %p5463_p9 = scmp.ne.s32.totalorder %s771_s29, %s5462_s27  ;;  %p5470_p4 = scmp.lt.s32.totalorder %s771_s29, %s771_s29 }
  0xb9   : > { %p5471_p2 = scmp.lt.s32.totalorder %s5469_s23, %s5462_s27 }
  0xba   : > { %p5465_p12 = pnand %p5463_p9, %p5943_p7 }
  0xbb   : > { %p5472_p13 = por %p5471_p2, %p5470_p4 }
  0xbc   : > { %p5466_p0 = pneg %p5465_p12 }
  0xbe   : > { %p5473_p1 = pnand %p5472_p13, %p5466_p0 }
  0xc0   : > { %5476 = shalt.err (!%p5473_p1)
}
  0xc1   : > { %5007 = dma.hbm_to_vmem [thread:$0]  (!%p5935_p6), %s6724_s16, 16, %s771_s29, [#allocation25]  }
  0xc2   : > { %s5744_s24 = smov [#allocation29]   ;;  %s5745_s17 = smov [#allocation30]  }
  0xc3   : > { %s794_s19 = sshll.u32 %s5744_s24, 4  ;;  %s810_s0 = sshll.u32 %s5745_s17, 4  ;;  %s795_s19 = int_to_ptr.vmem [resolvable:$true] %s794_s19  ;;  %s811_s0 = int_to_ptr.vmem [resolvable:$true] %s810_s0 }
  0xc4   : > { %s5488_s22 = scalar_lea.vmem %s795_s19, 16  ;;  %s5495_s25 = scalar_lea.vmem %s795_s19, 32 }
  0xc5   : > { %p5489_p8 = scmp.ne.s32.totalorder %s795_s19, %s5488_s22  ;;  %p5496_p3 = scmp.lt.s32.totalorder %s795_s19, %s795_s19 }
  0xc6   : > { %p5497_p5 = scmp.lt.s32.totalorder %s5495_s25, %s5488_s22 }
  0xc7   : > { %p5491_p10 = pnand %p5489_p8, %p5943_p7 }
  0xc8   : > { %p5498_p9 = por %p5497_p5, %p5496_p3 }
  0xc9   : > { %p5492_p11 = pneg %p5491_p10 }
  0xcb   : > { %p5499_p12 = pnand %p5498_p9, %p5492_p11 }
  0xcd   : > { %5502 = shalt.err (!%p5499_p12)
}
  0xce   : > { %5013 = dma.hbm_to_vmem [thread:$0]  (!%p5935_p6), %s6726_s18, 16, %s795_s19, [#allocation28]  }
  0xcf   : > { %s5514_s23 = scalar_lea.vmem %s811_s0, 256  ;;  %p5522_p13 = scmp.lt.s32.totalorder %s811_s0, %s811_s0 }
  0xd0   : > { %p5515_p0 = scmp.ne.s32.totalorder %s811_s0, %s5514_s23  ;;  %p5523_p1 = scmp.lt.s32.totalorder %s5514_s23, %s5514_s23 }
  0xd2   : > { %p5517_p4 = pnand %p5515_p0, %p5943_p7  ;;  %p5524_p8 = por %p5523_p1, %p5522_p13 }
  0xd4   : > { %p5518_p2 = pneg %p5517_p4 }
  0xd6   : > { %p5525_p10 = pnand %p5524_p8, %p5518_p2 }
  0xd8   : > { %5528 = shalt.err (!%p5525_p10)
}
  0xd9   : > { %s6800_s13 = smov 4   ;;  %s6801_s15 = smov 64  }
  0xda   : > { %5016 = dma.hbm_to_vmem [thread:$0]  (!%p5935_p6), %s6729_s21, 256, %s811_s0, [#allocation31], %s6801_s15, %s6801_s15, %s6800_s13  }
  0xdb   : > { %s6802_s22 = sld [smem:[#allocation50_spill]]  ;;  %s6803_s29 = sshll.u32 %s6042_s20, 2 }
  0xdc   : > { %s847_s27 = scalar_lea.vmem [#allocation6], %s6803_s29  ;;  %s4577_s23 = sshll.u32 %s6042_s20, 1 }
  0xdd   : > { %s854_s9 = sshll.u32 %s847_s27, 4  ;;  %s844_s10 = scalar_lea.sflag [#allocation7], %s6042_s20  ;;  %s855_s9 = int_to_ptr.vmem [resolvable:$true] %s854_s9 }
  0xde   : > { %s5542_s12 = scalar_lea.vmem %s855_s9, 64  ;;  %p6804_p11 = scmp.ne.s32.totalorder %s6796_s11, 0 }
  0xdf   : > { %p5543_p7 = scmp.ne.s32.totalorder %s855_s9, %s5542_s12  ;;  %s5746_s24 = smov [#allocation6]  }
  0xe0   : > { %p6805_p3 = pneg %p6804_p11  ;;  %s5547_s17 = sshll.u32 %s5746_s24, 4  ;;  %s5548_s17 = int_to_ptr.vmem [resolvable:$false] %s5547_s17 }
  0xe1   : > { %s852_s25 = scalar_lea.hbm %s6802_s22, %s4574_s28  ;;  %s5549_s0 = scalar_lea.vmem %s5548_s17, 128 }
  0xe2   : > { %p5545_p5 = pnand %p5543_p7, %p6805_p3  ;;  %p5550_p6 = scmp.lt.s32.totalorder %s855_s9, %s5548_s17 }
  0xe3   : > { %p5551_p12 = scmp.lt.s32.totalorder %s5549_s0, %s5542_s12 }
  0xe4   : > { %p5546_p9 = pneg %p5545_p5 }
  0xe5   : > { %p5552_p0 = por %p5551_p12, %p5550_p6 }
  0xe7   : > { %p5553_p4 = pnand %p5552_p0, %p5546_p9 }
  0xe9   : > { %5556 = shalt.err (!%p5553_p4)
}
  0xea   : > { %5020 = dma.hbm_to_vmem [thread:$0]  (!%p6804_p11), %s852_s25, 64, %s855_s9, %s844_s10  }
  0xeb   : > { %s4578_s28 = sshll.u32 %s5725_s7, 5  ;;  %s6806_s8 = sld [smem:[#allocation52_spill]] }
  0xec   : > { %s883_s22 = scalar_lea.vmem [#allocation11], %s4577_s23  ;;  %p6807_p13 = pmov %p6805_p3 }
  0xed   : > { %s891_s29 = sshll.u32 %s883_s22, 4  ;;  %s5747_s12 = smov [#allocation11]   ;;  %s892_s29 = int_to_ptr.vmem [resolvable:$true] %s891_s29 }
  0xee   : > { %s5570_s27 = scalar_lea.vmem %s892_s29, 32  ;;  %s5575_s24 = sshll.u32 %s5747_s12, 4  ;;  %s5576_s24 = int_to_ptr.vmem [resolvable:$false] %s5575_s24 }
  0xef   : > { %p5571_p2 = scmp.ne.s32.totalorder %s892_s29, %s5570_s27  ;;  %s5577_s17 = scalar_lea.vmem %s5576_s24, 64 }
  0xf0   : > { %p5578_p10 = scmp.lt.s32.totalorder %s892_s29, %s5576_s24  ;;  %p5579_p7 = scmp.lt.s32.totalorder %s5577_s17, %s5570_s27 }
  0xf1   : > { %s889_s19 = scalar_lea.hbm %s6806_s8, %s4578_s28  ;;  %p5573_p1 = pnand %p5571_p2, %p6807_p13 }
  0xf2   : > { %p5580_p3 = por %p5579_p7, %p5578_p10 }
  0xf3   : > { %p5574_p8 = pneg %p5573_p1 }
  0xf5   : > { %p5581_p5 = pnand %p5580_p3, %p5574_p8 }
  0xf7   : > { %5584 = shalt.err (!%p5581_p5)
}
  0xf8   : > { %5026 = dma.hbm_to_vmem [thread:$0]  (!%p6804_p11), %s889_s19, 32, %s892_s29, %s6062_s6  }
  0xf9   : > { %s6808_s9 = sld [smem:[#allocation53_spill]]  ;;  %s902_s13 = scalar_lea.vmem [#allocation12], %s4577_s23 }
  0xfa   : > { %s910_s15 = sshll.u32 %s902_s13, 4  ;;  %s6809_s8 = sand.u32 1, %s5729_s3   ;;  %s911_s15 = int_to_ptr.vmem [resolvable:$true] %s910_s15 }
  0xfb   : > { %s899_s22 = scalar_lea.sflag [#allocation13], %s6809_s8  ;;  %s5598_s27 = scalar_lea.vmem %s911_s15, 32 }
  0xfc   : > { %p5599_p9 = scmp.ne.s32.totalorder %s911_s15, %s5598_s27  ;;  %p6810_p6 = pmov %p6807_p13 }
  0xfd   : > { %s5748_s12 = smov [#allocation12]  }
  0xfe   : > { %p5601_p12 = pnand %p5599_p9, %p6810_p6  ;;  %s5603_s24 = sshll.u32 %s5748_s12, 4  ;;  %s5604_s24 = int_to_ptr.vmem [resolvable:$false] %s5603_s24 }
  0xff   : > { %s908_s0 = scalar_lea.hbm %s6808_s9, %s4578_s28  ;;  %s5605_s6 = scalar_lea.vmem %s5604_s24, 64 }
 0x100   : > { %p5602_p0 = pneg %p5601_p12  ;;  %p5606_p4 = scmp.lt.s32.totalorder %s911_s15, %s5604_s24 }
 0x101   : > { %p5607_p2 = scmp.lt.s32.totalorder %s5605_s6, %s5598_s27 }
 0x103   : > { %p5608_p13 = por %p5607_p2, %p5606_p4 }
 0x105   : > { %p5609_p1 = pnand %p5608_p13, %p5602_p0 }
 0x107   : > { %5612 = shalt.err (!%p5609_p1)
}
 0x108   : > { %5029 = dma.hbm_to_vmem [thread:$0]  (!%p6804_p11), %s908_s0, 32, %s911_s15, %s899_s22  }
 0x109   : > { %p6811_p8 = scmp.ne.s32.totalorder %s6779_s1, 0 }
 0x10a   : > { %s6158_s20 = sand.u32 (!%p6811_p8), 1, %s5713_s2   ;;  %p6812_p10 = scmp.ne.s32.totalorder (!%p6811_p8), %s6791_s5, 0 }
 0x10b   : > { %919 = sbr.rel (%p6811_p8) target bundleno = 3805 (0xedd), region = 120  ;;  %s4582_s23 = sshll.u32 (!%p6811_p8), %s6158_s20, 2 }
 0x10c   : > { %s922_s28 = scalar_lea.sflag (!%p6811_p8), [#allocation7], %s6158_s20  ;;  %s6162_s19 = scalar_lea.vmem (!%p6811_p8), [#allocation6], %s4582_s23 }
 0x110   : > { %5664 = dma.done.wait (%p6812_p10), %s922_s28, 64  }
 0x111   : > { %5666 = vsyncadd (%p6812_p10), %s922_s28, 4294967232  ;;  %s930_s11 = sand.u32 1, %s5921_s26   ;;  %s6169_s29 = scalar_lea.vmem [#allocation9], %s4582_s23 }
 0x112   : > { %s931_s1 = scalar_lea.sflag [#allocation10], %s930_s11 }
 0x113   : > { %5668 = dma.done.wait (%p6812_p10), %s931_s1, 96  }
 0x114   : > { %5670 = vsyncadd (%p6812_p10), %s931_s1, 4294967200  ;;  %s4584_s17 = sshll.u32 %s6158_s20, 1  ;;  %s949_s25 = scalar_lea.sflag [#allocation13], %s930_s11 }
 0x115   : > { %s6176_s10 = scalar_lea.vmem [#allocation11], %s4584_s17  ;;  %s6178_s9 = scalar_lea.vmem [#allocation12], %s4584_s17 }
 0x116   : > { %5672 = dma.done.wait (%p6812_p10), %s949_s25, 32  }
 0x117   : > { %5674 = vsyncadd (%p6812_p10), %s949_s25, 4294967264  ;;  %p6813_p11 = scmp.eq.s32.totalorder %s5921_s26, 0 }
 0x119   : > { %5676 = dma.done.wait (%p6813_p11), [#allocation13], 16   ;;  %p6814_p7 = pmov %p6813_p11 }
 0x11b   : > { %5678 = vsyncadd (%p6814_p7), [#allocation13], 4294967280  ;;  %p6815_p3 = pmov %p6814_p7 }
 0x11d   : > { %5680 = dma.done.wait (%p6815_p3), [#allocation16], 32   ;;  %p6816_p5 = pmov %p6815_p3 }
 0x11e   : > { %p6817_p9 = pmov %p6815_p3 }
 0x11f   : > { %5682 = vsyncadd (%p6816_p5), [#allocation16], 4294967264 }
 0x120   : > { %5684 = dma.done.wait (%p6817_p9), [#allocation19], 272   ;;  %p6818_p6 = pmov %p6815_p3 }
 0x121   : > { %p6819_p12 = pmov %p6815_p3 }
 0x122   : > { %5686 = vsyncadd (%p6818_p6), [#allocation19], 4294967024 }
 0x123   : > { %5688 = dma.done.wait (%p6819_p12), [#allocation22], 272   ;;  %p6820_p0 = pmov %p6815_p3 }
 0x125   : > { %5690 = vsyncadd (%p6820_p0), [#allocation22], 4294967024  ;;  %p6821_p4 = pmov %p6820_p0 }
 0x126   : > { %p6822_p2 = pmov %p6820_p0 }
 0x127   : > { %5692 = dma.done.wait (%p6821_p4), [#allocation25], 272  }
 0x128   : > { %5694 = vsyncadd (%p6822_p2), [#allocation25], 4294967024  ;;  %p6823_p13 = pmov %p6820_p0 }
 0x129   : > { %p6824_p1 = pmov %p6820_p0 }
 0x12a   : > { %5696 = dma.done.wait (%p6823_p13), [#allocation28], 272  }
 0x12b   : > { %5698 = vsyncadd (%p6824_p1), [#allocation28], 4294967024  ;;  %p6825_p8 = pmov %p6820_p0 }
 0x12c   : > { %p6826_p10 = pmov %p6820_p0 }
 0x12d   : > { %5700 = dma.done.wait (%p6825_p8), [#allocation31], 256  }
 0x12e   : > { %5702 = vsyncadd (%p6826_p10), [#allocation31], 4294967040  ;;  %v5749_v0 = vmov 0.0   ;;  %vm5750_vm0 = vmmov 0   ;;  %p1089_p11 = scmp.lt.s32.totalorder %s5721_s30, 1  ;;  %s6827_s26 = sld [smem:[#allocation56_spill]]  ;;  %v1185_v34 = vlaneseq }
 0x12f   : > { %4742 = vmatprep.subr.bf16.mxu0 %v5749_v0  ;;  %4746 = vmatprep.mubr.msk.bf16.mxu0 %vm5750_vm0, %v5749_v0  ;;  %v1101_v3 = vld [vmem:[%s6162_s19] sm:$0xf]  ;;  %vm1126_vm1 = vcmask 261120   ;;  %v5135_v4 = vld [vmem:[#allocation24 + $0x8] sm:$0xff]   ;;  %s6828_s24 = sld [smem:[#allocation54_spill]]  ;;  %s5751_s5 = smov 104  }
 0x130   : > { %4750 = vmatprep.subr.bf16.mxu1 %v5749_v0  ;;  %4754 = vmatprep.mubr.msk.bf16.mxu1 %vm5750_vm0, %v5749_v0  ;;  %s1090_s8 = scalar_select %p1089_p11, %s5721_s30, 1  ;;  %v5136_v5 = vld [vmem:[#allocation24] sm:$0xff]   ;;  %v4600_v11 = vld [vmem:[#allocation15] ss:$0 sm:$0xff]  ;;  %v4624_v24 = vld [vmem:[#allocation14] ss:$0 sm:$0xff] }
 0x131   : > { %v1102_v6 = vld [vmem:[%s6169_s29] sm:$0xf]  ;;  %s6829_s28 = sld [smem:[#allocation49_spill]]  ;;  %s5752_s0 = smov 120   ;;  %v5141_v21 = vld [vmem:[#allocation27 + $0x8] sm:$0xff]   ;;  %v5142_v25 = vld [vmem:[#allocation27] sm:$0xff]  }
 0x132   : > { %s4599_s22 = sshll.u32 %s1090_s8, 3  ;;  %s6830_s25 = sld [smem:[#allocation58_spill]]  ;;  %v5754_v32 = vmov 1983009808   ;;  %v5755_v35 = vmov 1934713408  }
 0x133   : > { %s5753_s8 = smov 112   ;;  %v1183_v33 = vunpack.c.l.s4 %v5754_v32  ;;  %v1215_v36 = vunpack.c.l.s4 %v5755_v35  ;;  %v1186_v38 = vshrl.u32 %v1185_v34, 7  ;;  %vm1320_vm2 = vcmask 60416   ;;  %s5758_s27 = smov 24  }
 0x134   : > { %v5133_v1 = vld [vmem:[%s6827_s26 + $0x8] sm:$0xff]   ;;  %v5134_v2 = vld [vmem:[%s6827_s26] sm:$0xff]   ;;  %vm2209_vm3 = vcmask 64512   ;;  %vm2977_vm5 = vcmask 130048   ;;  %vm2979_vm6 = vcmask 195584   ;;  %s6835_s6 = sld [smem:[#allocation65_spill]] }
 0x135   : > { %4743 = vmatpush3.bf16.msra.mxu0 %v5133_v1  ;;  %v5137_v7 = vld [vmem:[%s6828_s24 + $0x8] sm:$0xff]   ;;  %v5138_v8 = vld [vmem:[%s6828_s24] sm:$0xff]   ;;  %v1184_v37 = vunpack.c.0.s8 %v1183_v33  ;;  %v1216_v41 = vunpack.c.0.s8 %v1215_v36  ;;  %s6837_s29 = sld [smem:[#allocation66_spill]]  ;;  %vm4220_vm8 = vcmask 523264   ;;  %p6842_p3 = scmp.ne.s32.totalorder %s6792_s4, 0 }
 0x136   : > { %4744 = vmatprep.subr.bf16.mxu0 %v5749_v0  ;;  %s6840_s1 = sld [smem:[#allocation69_spill]] }
 0x137   : > { %s1095_s19 = scalar_lea.vmem %s6829_s28, %s4599_s22  ;;  %v6285_v42 = vsub.s32 %v1184_v37, %v1186_v38  ;;  %v6287_v48 = vsub.s32 %v1216_v41, %v1186_v38  ;;  %s5757_s22 = smov 8  }
 0x138   : > { %v6247_v9 = vld [vmem:[%s1095_s19] sm:$0xff]  ;;  %v5139_v14 = vld [vmem:[%s6830_s25 + $0x8] sm:$0xff]   ;;  %s4598_s28 = sshll.u32 %s6158_s20, 3 }
 0x139   : > { %4745 = vmatpush3.bf16.msra.mxu0 %v5134_v2  ;;  %v1986_v10 = vpack.c.bf16 %v6247_v9, %v6247_v9  ;;  %4751 = vmatpush3.bf16.msra.mxu1 %v5139_v14  ;;  %v5140_v17 = vld [vmem:[%s6830_s25] sm:$0xff]   ;;  %s1088_s17 = scalar_lea.vmem [#allocation32], %s4598_s28 }
 0x13a   : > { %4758 = vmatprep.subr.bf16.mxu0 %v5749_v0  ;;  %4752 = vmatprep.subr.bf16.mxu1 %v5749_v0  ;;  %s6836_s23 = smov %s6835_s6 }
 0x13c   : > { %4747 = vmatmul.mubr.msk.bf16.vlgmr.msra.gmra.mxu0 %vm1126_vm1, %v1101_v3 }
 0x13d   : > { %4759 = vmatpush3.bf16.msra.mxu0 %v5135_v4  ;;  %4762 = vmatprep.mubr.msk.bf16.mxu0 %vm5750_vm0, %v5749_v0 }
 0x13e   : > { %4760 = vmatprep.subr.bf16.mxu0 %v5749_v0  ;;  %4753 = vmatpush3.bf16.msra.mxu1 %v5140_v17 }
 0x13f   : > { %4766 = vmatprep.subr.bf16.mxu1 %v5749_v0 }
 0x141   : > { %4761 = vmatpush3.bf16.msra.mxu0 %v5136_v5  ;;  %4755 = vmatmul.mubr.msk.bf16.vlgmr.msra.gmra.mxu1 %vm1126_vm1, %v1101_v3 }
 0x142   : > { %4774 = vmatprep.subr.bf16.mxu0 %v5749_v0  ;;  %4767 = vmatpush3.bf16.msra.mxu1 %v5141_v21 }
 0x143   : > { %4770 = vmatprep.mubr.msk.bf16.mxu1 %vm5750_vm0, %v5749_v0  ;;  %4768 = vmatprep.subr.bf16.mxu1 %v5749_v0 }
 0x144   : > { %4763 = vmatmul.mubr.msk.bf16.vlgmr.msra.gmra.mxu0 %vm1126_vm1, %v1102_v6 }
 0x145   : > { %4775 = vmatpush3.bf16.msra.mxu0 %v5137_v7  ;;  %4778 = vmatprep.mubr.msk.bf16.mxu0 %vm5750_vm0, %v5749_v0 }
 0x146   : > { %4776 = vmatprep.subr.bf16.mxu0 %v5749_v0  ;;  %4769 = vmatpush3.bf16.msra.mxu1 %v5142_v25 }
 0x147   : > { %4782 = vmatprep.subr.bf16.mxu1 %v5749_v0 }
 0x149   : > { %4777 = vmatpush3.bf16.msra.mxu0 %v5138_v8  ;;  %4771 = vmatmul.mubr.msk.bf16.vlgmr.msra.gmra.mxu1 %vm1126_vm1, %v1102_v6 }
 0x14a   : > { %4788 = vmatprep.subr.bf16.mxu0 %v5749_v0  ;;  %4784 = vmatprep.mubr.msk.bf16.mxu1 %vm5750_vm0, %v5749_v0 }
 0x14c   : > { %4779 = vmatmul.mubr.msk.bf16.vlgmr.msra.gmra.mxu0 %vm1126_vm1, %v1986_v10 }
 0x14d   : > { %4790 = vmatprep.mubr.msk.bf16.mxu0 %vm5750_vm0, %v5749_v0 }
 0x1fc   : > { %v1164_v12 = vpop.f32.mrf.mxu0 }
 0x1fd   : > { %v1165_v13 = vadd.f32 %v4600_v11, %v1164_v12 }
 0x1fe   : > { %v4748_v15 = vpop.f32.mrf.mxu0 }
 0x1ff   : > { %1177 = vrot.lane.b32.xlu1 %v1165_v13, %s5751_s5  ;;  %1171 = vrot.lane.b32.xlu0 %v1165_v13, %s5752_s0 }
 0x200   : > { %v1167_v16 = vpop.f32.mrf.mxu0 }
 0x202   : > { %v4749_v18 = vpop.f32.mrf.mxu0 }
 0x203   : > { %1174 = vrot.lane.b32.xlu0 %v1165_v13, %s5753_s8 }
 0x204   : > { %v6266_v19 = vpop.f32.mrf.mxu0 }
 0x206   : > { %v4764_v20 = vpop.f32.mrf.mxu0 }
 0x208   : > { %v1605_v22 = vpop.f32.mrf.mxu0 }
 0x20a   : > { %v4765_v23 = vpop.f32.mrf.mxu0 }
 0x20c   : > { %v2048_v26 = vpop.f32.mrf.mxu0 }
 0x20d   : > { %v2049_v27 = vadd.f32 %v4624_v24, %v2048_v26 }
 0x20e   : > { %v4780_v28 = vpop.f32.mrf.mxu0 }
 0x20f   : > { %v6274_v29 = vmul.f32 0.35355338, %v2049_v27 }
 0x210   : > { %v2051_v30 = vpop.f32.mrf.mxu0 }
 0x211   : > { %2059 = vrot.lane.b32.xlu0 %v6274_v29, %s5753_s8  ;;  %2056 = vrot.lane.b32.xlu1 %v6274_v29, %s5752_s0 }
 0x212   : > { %v4781_v31 = vpop.f32.mrf.mxu0 }
 0x215   : > { %2062 = vrot.lane.b32.xlu1 %v6274_v29, %s5751_s5 }
 0x271   : > { %v1178_v39 = vpop.permute.xlu1 %1177  ;;  %v1172_v40 = vpop.permute.xlu0 %1171 }
 0x272   : > { %v1196_v43 = vcombine.low %v1172_v40, %v1178_v39  ;;  %v1197_v44 = vcombine.high %v1172_v40, %v1178_v39 }
 0x274   : > { %v1204_v49 = vrot.slane %v1196_v43, %v6285_v42  ;;  %v1211_v50 = vrot.slane %v1197_v44, %v6285_v42 }
 0x275   : > { %v1175_v45 = vpop.permute.xlu0 %1174 }
 0x276   : > { %v1180_v46 = vcombine.low %v1165_v13, %v1175_v45  ;;  %v1181_v47 = vcombine.high %v1165_v13, %v1175_v45 }
 0x278   : > { %v1188_v51 = vrot.slane %v1180_v46, %v6285_v42  ;;  %v1195_v52 = vrot.slane %v1181_v47, %v6285_v42 }
 0x27a   : > { %v1212_v53 = vcombine.low %v1188_v51, %v1204_v49  ;;  %v1213_v54 = vcombine.high %v1188_v51, %v1204_v49  ;;  %v1228_v55 = vcombine.low %v1195_v52, %v1211_v50  ;;  %v1229_v56 = vcombine.high %v1195_v52, %v1211_v50 }
 0x27c   : > { %v1220_v57 = vrot.slane %v1212_v53, %v6287_v48  ;;  %v1227_v58 = vrot.slane %v1213_v54, %v6287_v48  ;;  %v1236_v59 = vrot.slane %v1228_v55, %v6287_v48  ;;  %v1243_v60 = vrot.slane %v1229_v56, %v6287_v48 }
 0x27e   : > { %v1248_v61 = vcombine.low %v1220_v57, %v1227_v58  ;;  %v4604_v62 = vcombine.high %v1220_v57, %v1227_v58  ;;  %v1264_v63 = vcombine.low %v1236_v59, %v1243_v60  ;;  %v4605_v1 = vcombine.high %v1236_v59, %v1243_v60 }
 0x280   : > { %v1255_v2 = vrot.slane %v1248_v61, %v6285_v42  ;;  %v1263_v3 = vrot.slane %v4604_v62, %v6285_v42  ;;  %v1271_v4 = vrot.slane %v1264_v63, %v6285_v42  ;;  %v1279_v5 = vrot.slane %v4605_v1, %v6285_v42 }
 0x282   : > { %v1280_v6 = vcombine.low %v1255_v2, %v1263_v3  ;;  %v1281_v7 = vcombine.high %v1255_v2, %v1263_v3  ;;  %v1296_v8 = vcombine.low %v1271_v4, %v1279_v5  ;;  %v1297_v10 = vcombine.high %v1271_v4, %v1279_v5 }
 0x283   : > { %v2057_v11 = vpop.permute.xlu1 %2056  ;;  %v2060_v16 = vpop.permute.xlu0 %2059 }
 0x284   : > { %v1288_v12 = vrot.slane %v1280_v6, %v6287_v48  ;;  %v1295_v13 = vrot.slane %v1281_v7, %v6287_v48  ;;  %v1304_v14 = vrot.slane %v1296_v8, %v6287_v48  ;;  %v1311_v15 = vrot.slane %v1297_v10, %v6287_v48 }
 0x285   : > { %v2065_v22 = vcombine.low %v6274_v29, %v2060_v16  ;;  %v2066_v23 = vcombine.high %v6274_v29, %v2060_v16 }
 0x286   : > { %v1312_v17 = vcombine.low %v1288_v12, %v1304_v14  ;;  %v1313_v18 = vcombine.high %v1288_v12, %v1304_v14  ;;  %v1314_v20 = vcombine.low %v1295_v13, %v1311_v15  ;;  %v1315_v21 = vcombine.high %v1295_v13, %v1311_v15  ;;  %v1382_v15 = vpop.f32.mrf.mxu1 }
 0x287   : > { %v2063_v24 = vpop.permute.xlu1 %2062  ;;  %v2073_v32 = vrot.slane %v2065_v22, %v6285_v42  ;;  %v2080_v33 = vrot.slane %v2066_v23, %v6285_v42 }
 0x288   : > { %v1316_v25 = vpack.c.bf16 %v1312_v17, %v1312_v17  ;;  %v1317_v26 = vpack.c.bf16 %v1313_v18, %v1313_v18  ;;  %v1318_v27 = vpack.c.bf16 %v1314_v20, %v1314_v20  ;;  %v1319_v28 = vpack.c.bf16 %v1315_v21, %v1315_v21  ;;  %v4756_v16 = vpop.f32.mrf.mxu1 }
 0x289   : > { %v2081_v30 = vcombine.low %v2057_v11, %v2063_v24  ;;  %v2082_v31 = vcombine.high %v2057_v11, %v2063_v24  ;;  %v1980_v24 = vld [vmem:[%s6176_s10] sm:$0x3]  ;;  %s5756_s10 = smov 16  }
 0x28a   : > { %1321 = vst.msk [vmem:[#allocation2] sm:$0xf] %vm1320_vm2, %v1316_v25  ;;  %1322 = vst.msk [vmem:[#allocation2 + $0x4] sm:$0xf] %vm1320_vm2, %v1317_v26  ;;  %v1385_v17 = vpop.f32.mrf.mxu1  ;;  %v1981_v25 = vunpack.c.0.s8 %v1980_v24 }
 0x28b   : > { %1323 = vst.msk [vmem:[#allocation2 + $0x8] sm:$0xf] %vm1320_vm2, %v1318_v27  ;;  %1324 = vst.msk [vmem:[#allocation2 + $0xc] sm:$0xf] %vm1320_vm2, %v1319_v28  ;;  %v2089_v29 = vrot.slane %v2081_v30, %v6285_v42  ;;  %v2096_v34 = vrot.slane %v2082_v31, %v6285_v42 }
 0x28c   : > { %v4757_v18 = vpop.f32.mrf.mxu1  ;;  %vm6350_vm4 = vcmp.eq.s32.totalorder %v1981_v25, 0 }
 0x28d   : > { %v2097_v35 = vcombine.low %v2073_v32, %v2089_v29  ;;  %v2098_v36 = vcombine.high %v2073_v32, %v2089_v29  ;;  %v2113_v37 = vcombine.low %v2080_v33, %v2096_v34  ;;  %v2114_v38 = vcombine.high %v2080_v33, %v2096_v34 }
 0x28e   : > { %v6347_v20 = vpop.f32.mrf.mxu1 }
 0x28f   : > { %v2105_v39 = vrot.slane %v2097_v35, %v6287_v48  ;;  %v2112_v40 = vrot.slane %v2098_v36, %v6287_v48  ;;  %v2121_v41 = vrot.slane %v2113_v37, %v6287_v48  ;;  %v2128_v43 = vrot.slane %v2114_v38, %v6287_v48 }
 0x290   : > { %v4772_v21 = vpop.f32.mrf.mxu1 }
 0x291   : > { %v2133_v44 = vcombine.low %v2105_v39, %v2112_v40  ;;  %v4628_v45 = vcombine.high %v2105_v39, %v2112_v40  ;;  %v2149_v46 = vcombine.low %v2121_v41, %v2128_v43  ;;  %v4629_v47 = vcombine.high %v2121_v41, %v2128_v43  ;;  %v2205_v49 = vld [vmem:[#allocation2] sm:$0xf]  ;;  %v2206_v50 = vld [vmem:[#allocation2 + $0x4] sm:$0xf] }
 0x292   : > { %v2214_v51 = vsel %vm2209_vm3, %v2205_v49, 0  ;;  %v2260_v52 = vsel %vm2209_vm3, %v2206_v50, 0  ;;  %v2207_v2 = vld [vmem:[#allocation2 + $0x8] sm:$0xf]  ;;  %v2208_v3 = vld [vmem:[#allocation2 + $0xc] sm:$0xf]  ;;  %v1822_v22 = vpop.f32.mrf.mxu1 }
 0x293   : > { %v2140_v53 = vrot.slane %v2133_v44, %v6285_v42  ;;  %v2148_v54 = vrot.slane %v4628_v45, %v6285_v42  ;;  %v2156_v55 = vrot.slane %v2149_v46, %v6285_v42  ;;  %v2164_v56 = vrot.slane %v4629_v47, %v6285_v42  ;;  %4783 = vmatpush3.bf16.xpose.msra.mxu1 %v2214_v51 }
 0x294   : > { %4789 = vmatpush3.bf16.xpose.msra.mxu0 %v2260_v52  ;;  %4794 = vmatprep.subr.bf16.mxu1 %v5749_v0  ;;  %v2306_v8 = vsel %vm2209_vm3, %v2207_v2, 0  ;;  %v2352_v10 = vsel %vm2209_vm3, %v2208_v3, 0  ;;  %v4773_v23 = vpop.f32.mrf.mxu1 }
 0x295   : > { %v2165_v57 = vcombine.low %v2140_v53, %v2148_v54  ;;  %v2181_v58 = vcombine.low %v2156_v55, %v2164_v56  ;;  %4800 = vmatprep.subr.bf16.mxu0 %v5749_v0  ;;  %v2166_v59 = vcombine.high %v2140_v53, %v2148_v54  ;;  %v2182_v60 = vcombine.high %v2156_v55, %v2164_v56  ;;  %v4606_v53 = vld [vmem:[#allocation17] ss:$0 sm:$0xff] }
 0x296   : > { %v1383_v54 = vadd.f32 %v4606_v53, %v1382_v15 }
 0x297   : > { %v2173_v61 = vrot.slane %v2165_v57, %v6287_v48  ;;  %v2189_v62 = vrot.slane %v2181_v58, %v6287_v48  ;;  %v2180_v6 = vrot.slane %v2166_v59, %v6287_v48  ;;  %v2196_v7 = vrot.slane %v2182_v60, %v6287_v48 }
 0x299   : > { %v2197_v63 = vcombine.low %v2173_v61, %v2189_v62  ;;  %v2198_v1 = vcombine.high %v2173_v61, %v2189_v62  ;;  %v2199_v11 = vcombine.low %v2180_v6, %v2196_v7  ;;  %v2200_v12 = vcombine.high %v2180_v6, %v2196_v7 }
 0x29b   : > { %v2201_v4 = vpack.c.bf16 %v2197_v63, %v2197_v63  ;;  %v2202_v5 = vpack.c.bf16 %v2198_v1, %v2198_v1  ;;  %v2203_v13 = vpack.c.bf16 %v2199_v11, %v2199_v11  ;;  %v2204_v14 = vpack.c.bf16 %v2200_v12, %v2200_v12 }
 0x29d   : > { %4785 = vmatmul.mubr.msk.bf16.vlgmr.msra.gmra.mxu1 %vm2209_vm3, %v2201_v4  ;;  %4791 = vmatmul.mubr.msk.bf16.vlgmr.msra.gmra.mxu0 %vm2209_vm3, %v2202_v5 }
 0x29e   : > { %4795 = vmatpush3.bf16.xpose.msra.mxu1 %v2306_v8  ;;  %4801 = vmatpush3.bf16.xpose.msra.mxu0 %v2352_v10 }
 0x29f   : > { %4796 = vmatprep.mubr.msk.bf16.mxu1 %vm5750_vm0, %v5749_v0  ;;  %4802 = vmatprep.mubr.msk.bf16.mxu0 %vm5750_vm0, %v5749_v0 }
 0x2a0   : > { %4806 = vmatprep.subr.bf16.mxu1 %v5749_v0  ;;  %4812 = vmatprep.subr.bf16.mxu0 %v5749_v0 }
 0x2a5   : > { %4797 = vmatmul.mubr.msk.bf16.vlgmr.msra.gmra.mxu1 %vm2209_vm3, %v2203_v13  ;;  %4803 = vmatmul.mubr.msk.bf16.vlgmr.msra.gmra.mxu0 %vm2209_vm3, %v2204_v14 }
 0x2a6   : > { %4808 = vmatprep.mubr.msk.bf16.mxu1 %vm5750_vm0, %v5749_v0  ;;  %4814 = vmatprep.mubr.msk.bf16.mxu0 %vm5750_vm0, %v5749_v0 }
 0x35d   : > { %v2250_v27 = vpop.f32.mrf.mxu1  ;;  %v2296_v28 = vpop.f32.mrf.mxu0 }
 0x35e   : > { %v2396_v30 = vsel %vm6350_vm4, -1e-09, %v2250_v27  ;;  %v2397_v31 = vsel %vm6350_vm4, -1e-09, %v2296_v28 }
 0x35f   : > { %v4786_v32 = vpop.f32.mrf.mxu1  ;;  %v4792_v33 = vpop.f32.mrf.mxu0  ;;  %v2400_v29 = vsel %vm2209_vm3, %v2396_v30, -inf  ;;  %v2403_v34 = vsel %vm2209_vm3, %v2397_v31, -inf }
 0x360   : > { %2401 = vmax.xlane.f32.xlu0 %v2400_v29  ;;  %2404 = vmax.xlane.f32.xlu1 %v2403_v34 }
 0x361   : > { %v2253_v35 = vpop.f32.mrf.mxu1  ;;  %v2299_v36 = vpop.f32.mrf.mxu0 }
 0x363   : > { %v4787_v37 = vpop.f32.mrf.mxu1  ;;  %v4793_v38 = vpop.f32.mrf.mxu0 }
 0x365   : > { %v2342_v39 = vpop.f32.mrf.mxu1  ;;  %v2388_v40 = vpop.f32.mrf.mxu0 }
 0x366   : > { %v2398_v41 = vsel %vm6350_vm4, -1e-09, %v2342_v39  ;;  %v2399_v46 = vsel %vm6350_vm4, -1e-09, %v2388_v40 }
 0x367   : > { %v4798_v43 = vpop.f32.mrf.mxu1  ;;  %v4804_v44 = vpop.f32.mrf.mxu0  ;;  %v2406_v45 = vsel %vm2209_vm3, %v2398_v41, -inf  ;;  %v2409_v52 = vsel %vm2209_vm3, %v2399_v46, -inf }
 0x368   : > { %2407 = vmax.xlane.f32.xlu0 %v2406_v45 }
 0x369   : > { %v2345_v47 = vpop.f32.mrf.mxu1  ;;  %v2391_v49 = vpop.f32.mrf.mxu0 }
 0x36b   : > { %v4799_v50 = vpop.f32.mrf.mxu1  ;;  %v4805_v51 = vpop.f32.mrf.mxu0 }
 0x36c   : > { %2410 = vmax.xlane.f32.xlu0 %v2409_v52 }
 0x371   : > { %1389 = vrot.lane.b32.xlu1 %v1383_v54, %s5752_s0 }
 0x375   : > { %1395 = vrot.lane.b32.xlu1 %v1383_v54, %s5751_s5 }
 0x382   : > { %1392 = vrot.lane.b32.xlu0 %v1383_v54, %s5753_s8 }
 0x3e9   : > { %v2402_v55 = vpop.xlane.xlu0 %2401  ;;  %v2405_v56 = vpop.xlane.xlu1 %2404 }
 0x3ea   : > { %v2412_v57 = vsub.f32 %v2396_v30, %v2402_v55  ;;  %v2413_v58 = vsub.f32 %v2397_v31, %v2405_v56 }
 0x3ec   : > { %v2416_v59 = vmul.f32 1.442695, %v2412_v57  ;;  %v2418_v60 = vmul.f32 1.442695, %v2413_v58 }
 0x3ed   : > { %v1390_v61 = vpop.permute.xlu1 %1389 }
 0x3ee   : > { %5155 = vpow2.f32 %v2416_v59 }
 0x3ef   : > { %5157 = vpow2.f32 %v2418_v60 }
 0x3f1   : > { %v2408_v62 = vpop.xlane.xlu0 %2407  ;;  %v1396_v2 = vpop.permute.xlu1 %1395 }
 0x3f2   : > { %v2414_v63 = vsub.f32 %v2398_v41, %v2408_v62  ;;  %v1414_v5 = vcombine.low %v1390_v61, %v1396_v2  ;;  %v1415_v6 = vcombine.high %v1390_v61, %v1396_v2 }
 0x3f4   : > { %v2420_v1 = vmul.f32 1.442695, %v2414_v63  ;;  %v1422_v13 = vrot.slane %v1414_v5, %v6285_v42  ;;  %v1429_v15 = vrot.slane %v1415_v6, %v6285_v42 }
 0x3f5   : > { %v2411_v3 = vpop.xlane.xlu0 %2410 }
 0x3f6   : > { %5159 = vpow2.f32 %v2420_v1  ;;  %v2415_v4 = vsub.f32 %v2399_v46, %v2411_v3 }
 0x3f8   : > { %v2422_v7 = vmul.f32 1.442695, %v2415_v4 }
 0x3f9   : > { %v1393_v8 = vpop.permute.xlu0 %1392 }
 0x3fa   : > { %5161 = vpow2.f32 %v2422_v7  ;;  %v1398_v10 = vcombine.low %v1383_v54, %v1393_v8  ;;  %v1399_v11 = vcombine.high %v1383_v54, %v1393_v8 }
 0x3fb   : > { %v6369_v12 = vpop.eup %5155 }
 0x3fc   : > { %v6372_v14 = vpop.eup %5157  ;;  %v1406_v16 = vrot.slane %v1398_v10, %v6285_v42  ;;  %v1413_v17 = vrot.slane %v1399_v11, %v6285_v42  ;;  %v2424_v18 = vsel %vm2209_vm3, %v6369_v12, 0.0 }
 0x3fd   : > { %2425 = vadd.xlane.f32.xlu1 %v2424_v18  ;;  %v2427_v21 = vsel %vm2209_vm3, %v6372_v14, 0.0 }
 0x3fe   : > { %v1430_v22 = vcombine.low %v1406_v16, %v1422_v13  ;;  %v1431_v23 = vcombine.high %v1406_v16, %v1422_v13  ;;  %v1446_v24 = vcombine.low %v1413_v17, %v1429_v15  ;;  %v1447_v25 = vcombine.high %v1413_v17, %v1429_v15  ;;  %2428 = vadd.xlane.f32.xlu0 %v2427_v21 }
 0x400   : > { %v1438_v26 = vrot.slane %v1430_v22, %v6287_v48  ;;  %v1445_v27 = vrot.slane %v1431_v23, %v6287_v48  ;;  %v1454_v28 = vrot.slane %v1446_v24, %v6287_v48  ;;  %v1461_v30 = vrot.slane %v1447_v25, %v6287_v48 }
 0x402   : > { %v1466_v31 = vcombine.low %v1438_v26, %v1445_v27  ;;  %v4610_v32 = vcombine.high %v1438_v26, %v1445_v27  ;;  %v1482_v33 = vcombine.low %v1454_v28, %v1461_v30  ;;  %v4611_v29 = vcombine.high %v1454_v28, %v1461_v30 }
 0x403   : > { %v5160_v34 = vpop.eup %5159 }
 0x404   : > { %v1473_v35 = vrot.slane %v1466_v31, %v6285_v42  ;;  %v1481_v36 = vrot.slane %v4610_v32, %v6285_v42  ;;  %v1489_v37 = vrot.slane %v1482_v33, %v6285_v42  ;;  %v1497_v38 = vrot.slane %v4611_v29, %v6285_v42 }
 0x405   : > { %v2430_v39 = vsel %vm2209_vm3, %v5160_v34, 0.0 }
 0x406   : > { %v1498_v40 = vcombine.low %v1473_v35, %v1481_v36  ;;  %v1499_v41 = vcombine.high %v1473_v35, %v1481_v36  ;;  %v1514_v43 = vcombine.low %v1489_v37, %v1497_v38  ;;  %v1515_v44 = vcombine.high %v1489_v37, %v1497_v38  ;;  %2431 = vadd.xlane.f32.xlu0 %v2430_v39 }
 0x407   : > { %v5162_v45 = vpop.eup %5161 }
 0x408   : > { %v1506_v46 = vrot.slane %v1498_v40, %v6287_v48  ;;  %v1513_v47 = vrot.slane %v1499_v41, %v6287_v48  ;;  %v1522_v49 = vrot.slane %v1514_v43, %v6287_v48  ;;  %v1529_v50 = vrot.slane %v1515_v44, %v6287_v48 }
 0x409   : > { %v2433_v51 = vsel %vm2209_vm3, %v5162_v45, 0.0 }
 0x40a   : > { %v1530_v52 = vcombine.low %v1506_v46, %v1522_v49  ;;  %v1531_v53 = vcombine.high %v1506_v46, %v1522_v49  ;;  %v1532_v54 = vcombine.low %v1513_v47, %v1529_v50  ;;  %v1533_v55 = vcombine.high %v1513_v47, %v1529_v50  ;;  %2434 = vadd.xlane.f32.xlu1 %v2433_v51 }
 0x40c   : > { %v1534_v56 = vpack.c.bf16 %v1530_v52, %v1530_v52  ;;  %v1535_v57 = vpack.c.bf16 %v1531_v53, %v1531_v53  ;;  %v1536_v58 = vpack.c.bf16 %v1532_v54, %v1532_v54  ;;  %v1537_v59 = vpack.c.bf16 %v1533_v55, %v1533_v55 }
 0x40e   : > { %1538 = vst.msk [vmem:[#allocation3] sm:$0xf] %vm1320_vm2, %v1534_v56  ;;  %1539 = vst.msk [vmem:[#allocation3 + $0x4] sm:$0xf] %vm1320_vm2, %v1535_v57 }
 0x40f   : > { %1540 = vst.msk [vmem:[#allocation3 + $0x8] sm:$0xf] %vm1320_vm2, %v1536_v58  ;;  %1541 = vst.msk [vmem:[#allocation3 + $0xc] sm:$0xf] %vm1320_vm2, %v1537_v59  ;;  %v5143_v58 = vld [vmem:[#allocation18 + $0x8] sm:$0xff]  }
 0x415   : > { %v2448_v60 = vld [vmem:[#allocation3] sm:$0xf]  ;;  %v2449_v61 = vld [vmem:[#allocation3 + $0x4] sm:$0xf] }
 0x416   : > { %v2450_v62 = vld [vmem:[#allocation3 + $0x8] sm:$0xf]  ;;  %v2451_v63 = vld [vmem:[#allocation3 + $0xc] sm:$0xf] }
 0x433   : > { %2452 = vxpose.xlu0.c.b16.start.end [1/1] (short) (narrow) %v2448_v60, 16 }
 0x437   : > { %2514 = vxpose.xlu1.c.b16.start.end [1/1] (short) (narrow) %v2449_v61, 16  ;;  %2576 = vxpose.xlu0.c.b16.start.end [1/1] (short) (narrow) %v2450_v62, 16 }
 0x43b   : > { %2638 = vxpose.xlu1.c.b16.start.end [1/1] (short) (narrow) %v2451_v63, 16 }
 0x486   : > { %v2426_v1 = vpop.xlane.xlu1 %2425 }
 0x487   : > { %5163 = vrcp.f32 %v2426_v1  ;;  %v2429_v2 = vpop.xlane.xlu0 %2428 }
 0x488   : > { %5165 = vrcp.f32 %v2429_v2 }
 0x48f   : > { %v2432_v3 = vpop.xlane.xlu0 %2431 }
 0x490   : > { %5167 = vrcp.f32 %v2432_v3 }
 0x493   : > { %v2435_v4 = vpop.xlane.xlu1 %2434 }
 0x494   : > { %v5164_v5 = vpop.eup %5163  ;;  %5169 = vrcp.f32 %v2435_v4  ;;  %v5144_v4 = vld [vmem:[#allocation18] sm:$0xff]  }
 0x495   : > { %v5166_v6 = vpop.eup %5165  ;;  %v2440_v7 = vmul.f32 %v5164_v5, %v6369_v12  ;;  %v2460_v17 = vpop.trf.xlu0 }
 0x496   : > { %v2441_v8 = vmul.f32 %v5166_v6, %v6372_v14 }
 0x497   : > { %v2444_v10 = vpack.c.bf16 %v2440_v7, %v2440_v7 }
 0x498   : > { %v2445_v11 = vpack.c.bf16 %v2441_v8, %v2441_v8 }
 0x499   : > { %v2472_v13 = vsel %vm2209_vm3, %v2444_v10, 0  ;;  %v2522_v21 = vpop.trf.xlu1  ;;  %v2584_v26 = vpop.trf.xlu0 }
 0x49a   : > { %4807 = vmatpush3.bf16.xpose.msra.mxu1 %v2472_v13  ;;  %v2534_v15 = vsel %vm2209_vm3, %v2445_v11, 0 }
 0x49b   : > { %4813 = vmatpush3.bf16.xpose.msra.mxu0 %v2534_v15  ;;  %4818 = vmatprep.subr.bf16.mxu1 %v5749_v0 }
 0x49c   : > { %4824 = vmatprep.subr.bf16.mxu0 %v5749_v0 }
 0x49d   : > { %v5168_v16 = vpop.eup %5167  ;;  %v2646_v27 = vpop.trf.xlu1 }
 0x49e   : > { %v2442_v18 = vmul.f32 %v5168_v16, %v5160_v34 }
 0x4a0   : > { %v2446_v22 = vpack.c.bf16 %v2442_v18, %v2442_v18 }
 0x4a1   : > { %v5170_v12 = vpop.eup %5169  ;;  %4809 = vmatmul.mubr.msk.bf16.vlgmr.msra.gmra.mxu1 %vm2209_vm3, %v2460_v17 }
 0x4a2   : > { %4815 = vmatmul.mubr.msk.bf16.vlgmr.msra.gmra.mxu0 %vm2209_vm3, %v2522_v21  ;;  %v2596_v14 = vsel %vm2209_vm3, %v2446_v22, 0  ;;  %v2443_v23 = vmul.f32 %v5170_v12, %v5162_v45  ;;  %4820 = vmatprep.mubr.msk.bf16.mxu1 %vm5750_vm0, %v5749_v0 }
 0x4a3   : > { %4819 = vmatpush3.bf16.xpose.msra.mxu1 %v2596_v14  ;;  %4826 = vmatprep.mubr.msk.bf16.mxu0 %vm5750_vm0, %v5749_v0 }
 0x4a4   : > { %v2447_v24 = vpack.c.bf16 %v2443_v23, %v2443_v23  ;;  %4830 = vmatprep.subr.bf16.mxu1 %v5749_v0 }
 0x4a6   : > { %v2658_v25 = vsel %vm2209_vm3, %v2447_v24, 0 }
 0x4a7   : > { %4825 = vmatpush3.bf16.xpose.msra.mxu0 %v2658_v25 }
 0x4a8   : > { %4838 = vmatprep.subr.bf16.mxu0 %v5749_v0 }
 0x4aa   : > { %4821 = vmatmul.mubr.msk.bf16.vlgmr.msra.gmra.mxu1 %vm2209_vm3, %v2584_v26 }
 0x4ab   : > { %4834 = vmatprep.mubr.msk.bf16.mxu1 %vm5750_vm0, %v5749_v0  ;;  %4831 = vmatpush3.bf16.msra.mxu1 %v5143_v58 }
 0x4ac   : > { %4832 = vmatprep.subr.bf16.mxu1 %v5749_v0 }
 0x4ae   : > { %4827 = vmatmul.mubr.msk.bf16.vlgmr.msra.gmra.mxu0 %vm2209_vm3, %v2646_v27  ;;  %v4612_v27 = vld [vmem:[#allocation26] ss:$0 sm:$0xff] }
 0x4af   : > { %4842 = vmatprep.mubr.msk.bf16.mxu0 %vm5750_vm0, %v5749_v0  ;;  %4833 = vmatpush3.bf16.msra.mxu1 %v5144_v4 }
 0x4b0   : > { %4846 = vmatprep.subr.bf16.mxu1 %v5749_v0 }
 0x561   : > { %v2508_v28 = vpop.f32.mrf.mxu1 }
 0x562   : > { %v2570_v30 = vpop.f32.mrf.mxu0  ;;  %2700 = vxpose.xlu0.b32.start.end [1/1] (short) (narrow) %v2508_v28, 8  ;;  %v1603_v28 = vadd.f32 %v4612_v27, %v6266_v19 }
 0x563   : > { %v4810_v31 = vpop.f32.mrf.mxu1  ;;  %2732 = vxpose.xlu1.b32.start.end [1/1] (short) (narrow) %v2570_v30, 8 }
 0x564   : > { %v4816_v32 = vpop.f32.mrf.mxu0  ;;  %v5145_v31 = vld [vmem:[#allocation21 + $0x8] sm:$0xff]  }
 0x565   : > { %v2511_v33 = vpop.f32.mrf.mxu1  ;;  %4839 = vmatpush3.bf16.msra.mxu0 %v5145_v31 }
 0x566   : > { %v2573_v29 = vpop.f32.mrf.mxu0  ;;  %4840 = vmatprep.subr.bf16.mxu0 %v5749_v0 }
 0x567   : > { %v4811_v34 = vpop.f32.mrf.mxu1 }
 0x568   : > { %v4817_v35 = vpop.f32.mrf.mxu0 }
 0x56a   : > { %v2632_v36 = vpop.f32.mrf.mxu1 }
 0x56b   : > { %2764 = vxpose.xlu0.b32.start.end [1/1] (short) (narrow) %v2632_v36, 8 }
 0x56c   : > { %v4822_v37 = vpop.f32.mrf.mxu1 }
 0x56e   : > { %v2635_v38 = vpop.f32.mrf.mxu1  ;;  %v2694_v39 = vpop.f32.mrf.mxu0 }
 0x56f   : > { %2796 = vxpose.xlu0.b32.start.end [1/1] (short) (narrow) %v2694_v39, 8 }
 0x570   : > { %v4823_v40 = vpop.f32.mrf.mxu1  ;;  %v4828_v41 = vpop.f32.mrf.mxu0 }
 0x572   : > { %v2697_v43 = vpop.f32.mrf.mxu0 }
 0x574   : > { %v4829_v44 = vpop.f32.mrf.mxu0 }
 0x5de   : > { %v2716_v45 = vpop.trf.xlu0 }
 0x5df   : > { %v2748_v47 = vpop.trf.xlu1 }
 0x5e7   : > { %v2780_v46 = vpop.trf.xlu0 }
 0x5e8   : > { %v2828_v49 = vcombine.low %v2716_v45, %v2780_v46  ;;  %v2829_v50 = vcombine.high %v2716_v45, %v2780_v46 }
 0x5ea   : > { %v2836_v54 = vrot.slane %v2828_v49, %v6285_v42  ;;  %v2843_v55 = vrot.slane %v2829_v50, %v6285_v42 }
 0x5eb   : > { %v2812_v51 = vpop.trf.xlu0 }
 0x5ec   : > { %v2844_v52 = vcombine.low %v2748_v47, %v2812_v51  ;;  %v2845_v53 = vcombine.high %v2748_v47, %v2812_v51 }
 0x5ee   : > { %v2852_v56 = vrot.slane %v2844_v52, %v6285_v42  ;;  %v2859_v57 = vrot.slane %v2845_v53, %v6285_v42 }
 0x5f0   : > { %v2860_v59 = vcombine.low %v2836_v54, %v2852_v56  ;;  %v2861_v60 = vcombine.high %v2836_v54, %v2852_v56  ;;  %v2876_v61 = vcombine.low %v2843_v55, %v2859_v57  ;;  %v2877_v62 = vcombine.high %v2843_v55, %v2859_v57 }
 0x5f2   : > { %v2868_v63 = vrot.slane %v2860_v59, %v6287_v48  ;;  %v2875_v1 = vrot.slane %v2861_v60, %v6287_v48  ;;  %v2884_v2 = vrot.slane %v2876_v61, %v6287_v48  ;;  %v2891_v3 = vrot.slane %v2877_v62, %v6287_v48 }
 0x5f4   : > { %v2896_v5 = vcombine.low %v2868_v63, %v2875_v1  ;;  %v4638_v6 = vcombine.high %v2868_v63, %v2875_v1  ;;  %v2912_v7 = vcombine.low %v2884_v2, %v2891_v3  ;;  %v4639_v8 = vcombine.high %v2884_v2, %v2891_v3 }
 0x5f6   : > { %v2903_v10 = vrot.slane %v2896_v5, %v6285_v42  ;;  %v2911_v11 = vrot.slane %v4638_v6, %v6285_v42  ;;  %v2919_v13 = vrot.slane %v2912_v7, %v6285_v42  ;;  %v2927_v15 = vrot.slane %v4639_v8, %v6285_v42 }
 0x5f8   : > { %v2929_v16 = vcombine.high %v2903_v10, %v2911_v11  ;;  %v2945_v17 = vcombine.high %v2919_v13, %v2927_v15  ;;  %v2928_v18 = vcombine.low %v2903_v10, %v2911_v11  ;;  %v2944_v21 = vcombine.low %v2919_v13, %v2927_v15 }
 0x5fa   : > { %v2943_v22 = vrot.slane %v2929_v16, %v6287_v48  ;;  %v2959_v12 = vrot.slane %v2945_v17, %v6287_v48  ;;  %v2936_v14 = vrot.slane %v2928_v18, %v6287_v48  ;;  %v2952_v23 = vrot.slane %v2944_v21, %v6287_v48 }
 0x5fc   : > { %v2962_v24 = vcombine.low %v2943_v22, %v2959_v12  ;;  %v2961_v25 = vcombine.high %v2936_v14, %v2952_v23  ;;  %v2960_v26 = vcombine.low %v2936_v14, %v2952_v23  ;;  %v2963_v30 = vcombine.high %v2943_v22, %v2959_v12 }
 0x5fe   : > { %2969 = vrot.lane.b32.xlu0 %v2962_v24, %s5756_s10  ;;  %2965 = vrot.lane.b32.xlu1 %v2961_v25, %s5757_s22  ;;  %v5146_v24 = vld [vmem:[#allocation21] sm:$0xff]   ;;  %v4640_v25 = vld [vmem:[#allocation20] ss:$0 sm:$0xff] }
 0x5ff   : > { %4841 = vmatpush3.bf16.msra.mxu0 %v5146_v24 }
 0x600   : > { %4852 = vmatprep.subr.bf16.mxu0 %v5749_v0 }
 0x602   : > { %1615 = vrot.lane.b32.xlu0 %v1603_v28, %s5751_s5  ;;  %2973 = vrot.lane.b32.xlu1 %v2963_v30, %s5758_s27 }
 0x606   : > { %1609 = vrot.lane.b32.xlu1 %v1603_v28, %s5752_s0 }
 0x60a   : > { %1612 = vrot.lane.b32.xlu1 %v1603_v28, %s5753_s8 }
 0x670   : > { %v2966_v32 = vpop.permute.xlu1 %2965  ;;  %v2970_v33 = vpop.permute.xlu0 %2969 }
 0x671   : > { %v2976_v29 = vsel %vm2209_vm3, %v2960_v26, %v2966_v32 }
 0x672   : > { %v2978_v34 = vsel %vm2977_vm5, %v2976_v29, %v2970_v33 }
 0x674   : > { %v2974_v19 = vpop.permute.xlu1 %2973  ;;  %v1616_v38 = vpop.permute.xlu0 %1615 }
 0x675   : > { %v2980_v35 = vsel %vm2979_vm6, %v2978_v34, %v2974_v19  ;;  %v4644_v34 = vld [vmem:[#allocation23] ss:$0 sm:$0xff] }
 0x676   : > { %v2981_v36 = vpack.c.bf16 %v2980_v35, %v2980_v35 }
 0x678   : > { %v1610_v37 = vpop.permute.xlu1 %1609  ;;  %4835 = vmatmul.mubr.msk.bf16.vlgmr.msra.gmra.mxu1 %vm1126_vm1, %v2981_v36 }
 0x679   : > { %4848 = vmatprep.mubr.msk.bf16.mxu1 %vm5750_vm0, %v5749_v0  ;;  %v1634_v39 = vcombine.low %v1610_v37, %v1616_v38  ;;  %v1635_v40 = vcombine.high %v1610_v37, %v1616_v38 }
 0x67b   : > { %v1642_v45 = vrot.slane %v1634_v39, %v6285_v42  ;;  %v1649_v46 = vrot.slane %v1635_v40, %v6285_v42 }
 0x67c   : > { %v1613_v41 = vpop.permute.xlu1 %1612 }
 0x67d   : > { %v1618_v43 = vcombine.low %v1603_v28, %v1613_v41  ;;  %v1619_v44 = vcombine.high %v1603_v28, %v1613_v41 }
 0x67f   : > { %v1626_v47 = vrot.slane %v1618_v43, %v6285_v42  ;;  %v1633_v49 = vrot.slane %v1619_v44, %v6285_v42 }
 0x681   : > { %v1650_v50 = vcombine.low %v1626_v47, %v1642_v45  ;;  %v1651_v51 = vcombine.high %v1626_v47, %v1642_v45  ;;  %v1666_v52 = vcombine.low %v1633_v49, %v1649_v46  ;;  %v1667_v53 = vcombine.high %v1633_v49, %v1649_v46 }
 0x683   : > { %v1658_v54 = vrot.slane %v1650_v50, %v6287_v48  ;;  %v1665_v55 = vrot.slane %v1651_v51, %v6287_v48  ;;  %v1674_v56 = vrot.slane %v1666_v52, %v6287_v48  ;;  %v1681_v57 = vrot.slane %v1667_v53, %v6287_v48 }
 0x685   : > { %v1686_v58 = vcombine.low %v1658_v54, %v1665_v55  ;;  %v4616_v59 = vcombine.high %v1658_v54, %v1665_v55  ;;  %v1702_v60 = vcombine.low %v1674_v56, %v1681_v57  ;;  %v4617_v61 = vcombine.high %v1674_v56, %v1681_v57 }
 0x687   : > { %v1693_v62 = vrot.slane %v1686_v58, %v6285_v42  ;;  %v1701_v63 = vrot.slane %v4616_v59, %v6285_v42  ;;  %v1709_v1 = vrot.slane %v1702_v60, %v6285_v42  ;;  %v1717_v2 = vrot.slane %v4617_v61, %v6285_v42 }
 0x689   : > { %v1718_v3 = vcombine.low %v1693_v62, %v1701_v63  ;;  %v1719_v4 = vcombine.high %v1693_v62, %v1701_v63  ;;  %v1734_v5 = vcombine.low %v1709_v1, %v1717_v2  ;;  %v1735_v6 = vcombine.high %v1709_v1, %v1717_v2 }
 0x68b   : > { %v1726_v7 = vrot.slane %v1718_v3, %v6287_v48  ;;  %v1733_v8 = vrot.slane %v1719_v4, %v6287_v48  ;;  %v1742_v10 = vrot.slane %v1734_v5, %v6287_v48  ;;  %v1749_v11 = vrot.slane %v1735_v6, %v6287_v48 }
 0x68d   : > { %v1750_v13 = vcombine.low %v1726_v7, %v1742_v10  ;;  %v1751_v15 = vcombine.high %v1726_v7, %v1742_v10  ;;  %v1752_v16 = vcombine.low %v1733_v8, %v1749_v11  ;;  %v1753_v17 = vcombine.high %v1733_v8, %v1749_v11 }
 0x68f   : > { %v1754_v18 = vpack.c.bf16 %v1750_v13, %v1750_v13  ;;  %v1755_v21 = vpack.c.bf16 %v1751_v15, %v1751_v15  ;;  %v1756_v22 = vpack.c.bf16 %v1752_v16, %v1752_v16  ;;  %v1757_v12 = vpack.c.bf16 %v1753_v17, %v1753_v17 }
 0x691   : > { %1758 = vst.msk [vmem:[#allocation4] sm:$0xf] %vm1320_vm2, %v1754_v18  ;;  %1759 = vst.msk [vmem:[#allocation4 + $0x4] sm:$0xf] %vm1320_vm2, %v1755_v21 }
 0x692   : > { %1760 = vst.msk [vmem:[#allocation4 + $0x8] sm:$0xf] %vm1320_vm2, %v1756_v22  ;;  %1761 = vst.msk [vmem:[#allocation4 + $0xc] sm:$0xf] %vm1320_vm2, %v1757_v12 }
 0x698   : > { %v3267_v14 = vld [vmem:[#allocation4] sm:$0xf]  ;;  %v3268_v32 = vld [vmem:[#allocation4 + $0x4] sm:$0xf] }
 0x699   : > { %v3275_v23 = vsel %vm2209_vm3, %v3267_v14, 0  ;;  %v3321_v19 = vsel %vm2209_vm3, %v3268_v32, 0  ;;  %v3269_v17 = vld [vmem:[#allocation4 + $0x8] sm:$0xf]  ;;  %v3270_v18 = vld [vmem:[#allocation4 + $0xc] sm:$0xf] }
 0x69a   : > { %4847 = vmatpush3.bf16.xpose.msra.mxu1 %v3275_v23  ;;  %v3367_v23 = vsel %vm2209_vm3, %v3269_v17, 0  ;;  %v3413_v24 = vsel %vm2209_vm3, %v3270_v18, 0 }
 0x69b   : > { %4858 = vmatprep.subr.bf16.mxu1 %v5749_v0 }
 0x738   : > { %v3042_v26 = vpop.f32.mrf.mxu1 }
 0x739   : > { %v3043_v27 = vadd.f32 %v4640_v25, %v3042_v26 }
 0x73a   : > { %v4836_v28 = vpop.f32.mrf.mxu1 }
 0x73b   : > { %v6477_v30 = vadd.f32 %v3043_v27, %v6247_v9 }
 0x73c   : > { %v3045_v31 = vpop.f32.mrf.mxu1 }
 0x73d   : > { %v3049_v33 = vpack.c.bf16 %v6477_v30, %v6477_v30  ;;  %v1983_v31 = vld [vmem:[%s6178_s9] sm:$0x3] }
 0x73e   : > { %v4837_v29 = vpop.f32.mrf.mxu1  ;;  %v1984_v32 = vunpack.c.0.s8 %v1983_v31 }
 0x73f   : > { %4843 = vmatmul.mubr.msk.bf16.vlgmr.msra.gmra.mxu0 %vm1126_vm1, %v3049_v33 }
 0x740   : > { %4853 = vmatpush3.bf16.xpose.msra.mxu0 %v3321_v19  ;;  %4854 = vmatprep.mubr.msk.bf16.mxu0 %vm5750_vm0, %v5749_v0  ;;  %vm6522_vm7 = vcmp.eq.s32.totalorder %v1984_v32, 0 }
 0x741   : > { %4864 = vmatprep.subr.bf16.mxu0 %v5749_v0 }
 0x7ff   : > { %v3110_v35 = vpop.f32.mrf.mxu0 }
 0x800   : > { %v3111_v9 = vadd.f32 %v4644_v34, %v3110_v35 }
 0x801   : > { %v4844_v36 = vpop.f32.mrf.mxu0 }
 0x802   : > { %v3116_v37 = vmul.f32 0.35355338, %v3111_v9 }
 0x803   : > { %v3113_v38 = vpop.f32.mrf.mxu0 }
 0x804   : > { %3121 = vrot.lane.b32.xlu0 %v3116_v37, %s5753_s8  ;;  %3118 = vrot.lane.b32.xlu1 %v3116_v37, %s5752_s0 }
 0x805   : > { %v4845_v39 = vpop.f32.mrf.mxu0 }
 0x808   : > { %3124 = vrot.lane.b32.xlu1 %v3116_v37, %s5751_s5 }
 0x876   : > { %v3122_v40 = vpop.permute.xlu0 %3121  ;;  %v3119_v41 = vpop.permute.xlu1 %3118 }
 0x877   : > { %v3127_v43 = vcombine.low %v3116_v37, %v3122_v40  ;;  %v3128_v44 = vcombine.high %v3116_v37, %v3122_v40 }
 0x879   : > { %v3135_v49 = vrot.slane %v3127_v43, %v6285_v42  ;;  %v3142_v50 = vrot.slane %v3128_v44, %v6285_v42 }
 0x87a   : > { %v3125_v45 = vpop.permute.xlu1 %3124 }
 0x87b   : > { %v3143_v46 = vcombine.low %v3119_v41, %v3125_v45  ;;  %v3144_v47 = vcombine.high %v3119_v41, %v3125_v45 }
 0x87d   : > { %v3151_v51 = vrot.slane %v3143_v46, %v6285_v42  ;;  %v3158_v52 = vrot.slane %v3144_v47, %v6285_v42 }
 0x87f   : > { %v3159_v53 = vcombine.low %v3135_v49, %v3151_v51  ;;  %v3160_v54 = vcombine.high %v3135_v49, %v3151_v51  ;;  %v3175_v55 = vcombine.low %v3142_v50, %v3158_v52  ;;  %v3176_v56 = vcombine.high %v3142_v50, %v3158_v52 }
 0x881   : > { %v3167_v57 = vrot.slane %v3159_v53, %v6287_v48  ;;  %v3174_v58 = vrot.slane %v3160_v54, %v6287_v48  ;;  %v3183_v59 = vrot.slane %v3175_v55, %v6287_v48  ;;  %v3190_v60 = vrot.slane %v3176_v56, %v6287_v48 }
 0x883   : > { %v3195_v61 = vcombine.low %v3167_v57, %v3174_v58  ;;  %v4648_v62 = vcombine.high %v3167_v57, %v3174_v58  ;;  %v3211_v63 = vcombine.low %v3183_v59, %v3190_v60  ;;  %v4649_v1 = vcombine.high %v3183_v59, %v3190_v60  ;;  %v4618_v57 = vld [vmem:[#allocation29] ss:$0 sm:$0xff] }
 0x884   : > { %v1820_v58 = vadd.f32 %v4618_v57, %v6347_v20 }
 0x885   : > { %v3202_v2 = vrot.slane %v3195_v61, %v6285_v42  ;;  %v3210_v3 = vrot.slane %v4648_v62, %v6285_v42  ;;  %v3218_v4 = vrot.slane %v3211_v63, %v6285_v42  ;;  %v3226_v5 = vrot.slane %v4649_v1, %v6285_v42 }
 0x887   : > { %v3227_v6 = vcombine.low %v3202_v2, %v3210_v3  ;;  %v3243_v7 = vcombine.low %v3218_v4, %v3226_v5  ;;  %v3228_v8 = vcombine.high %v3202_v2, %v3210_v3  ;;  %v3244_v10 = vcombine.high %v3218_v4, %v3226_v5 }
 0x889   : > { %v3235_v11 = vrot.slane %v3227_v6, %v6287_v48  ;;  %v3251_v13 = vrot.slane %v3243_v7, %v6287_v48  ;;  %v3242_v12 = vrot.slane %v3228_v8, %v6287_v48  ;;  %v3258_v14 = vrot.slane %v3244_v10, %v6287_v48 }
 0x88b   : > { %v3259_v15 = vcombine.low %v3235_v11, %v3251_v13  ;;  %v3260_v16 = vcombine.high %v3235_v11, %v3251_v13  ;;  %v3261_v25 = vcombine.low %v3242_v12, %v3258_v14  ;;  %v3262_v26 = vcombine.high %v3242_v12, %v3258_v14 }
 0x88d   : > { %v3263_v21 = vpack.c.bf16 %v3259_v15, %v3259_v15  ;;  %v3264_v22 = vpack.c.bf16 %v3260_v16, %v3260_v16  ;;  %v3265_v27 = vpack.c.bf16 %v3261_v25, %v3261_v25  ;;  %v3266_v28 = vpack.c.bf16 %v3262_v26, %v3262_v26 }
 0x88f   : > { %4849 = vmatmul.mubr.msk.bf16.vlgmr.msra.gmra.mxu1 %vm2209_vm3, %v3263_v21  ;;  %4855 = vmatmul.mubr.msk.bf16.vlgmr.msra.gmra.mxu0 %vm2209_vm3, %v3264_v22 }
 0x890   : > { %4859 = vmatpush3.bf16.xpose.msra.mxu1 %v3367_v23  ;;  %4865 = vmatpush3.bf16.xpose.msra.mxu0 %v3413_v24 }
 0x891   : > { %4860 = vmatprep.mubr.msk.bf16.mxu1 %vm5750_vm0, %v5749_v0  ;;  %4866 = vmatprep.mubr.msk.bf16.mxu0 %vm5750_vm0, %v5749_v0 }
 0x892   : > { %4870 = vmatprep.subr.bf16.mxu1 %v5749_v0  ;;  %4876 = vmatprep.subr.bf16.mxu0 %v5749_v0 }
 0x897   : > { %4861 = vmatmul.mubr.msk.bf16.vlgmr.msra.gmra.mxu1 %vm2209_vm3, %v3265_v27  ;;  %4867 = vmatmul.mubr.msk.bf16.vlgmr.msra.gmra.mxu0 %vm2209_vm3, %v3266_v28 }
 0x898   : > { %4872 = vmatprep.mubr.msk.bf16.mxu1 %vm5750_vm0, %v5749_v0  ;;  %4878 = vmatprep.mubr.msk.bf16.mxu0 %vm5750_vm0, %v5749_v0 }
 0x94f   : > { %v3311_v29 = vpop.f32.mrf.mxu1  ;;  %v3357_v19 = vpop.f32.mrf.mxu0 }
 0x950   : > { %v3457_v34 = vsel %vm6522_vm7, -1e-09, %v3311_v29  ;;  %v3458_v35 = vsel %vm6522_vm7, -1e-09, %v3357_v19 }
 0x951   : > { %v4850_v9 = vpop.f32.mrf.mxu1  ;;  %v4856_v36 = vpop.f32.mrf.mxu0  ;;  %v3461_v37 = vsel %vm2209_vm3, %v3457_v34, -inf  ;;  %v3464_v38 = vsel %vm2209_vm3, %v3458_v35, -inf }
 0x952   : > { %3462 = vmax.xlane.f32.xlu0 %v3461_v37  ;;  %3465 = vmax.xlane.f32.xlu1 %v3464_v38 }
 0x953   : > { %v3314_v39 = vpop.f32.mrf.mxu1  ;;  %v3360_v40 = vpop.f32.mrf.mxu0 }
 0x955   : > { %v4851_v41 = vpop.f32.mrf.mxu1  ;;  %v4857_v43 = vpop.f32.mrf.mxu0 }
 0x957   : > { %v3403_v44 = vpop.f32.mrf.mxu1  ;;  %v3449_v45 = vpop.f32.mrf.mxu0 }
 0x958   : > { %v3459_v46 = vsel %vm6522_vm7, -1e-09, %v3403_v44  ;;  %v3460_v51 = vsel %vm6522_vm7, -1e-09, %v3449_v45 }
 0x959   : > { %v4862_v47 = vpop.f32.mrf.mxu1  ;;  %v4868_v49 = vpop.f32.mrf.mxu0  ;;  %v3467_v50 = vsel %vm2209_vm3, %v3459_v46, -inf  ;;  %v3470_v56 = vsel %vm2209_vm3, %v3460_v51, -inf }
 0x95a   : > { %3468 = vmax.xlane.f32.xlu0 %v3467_v50 }
 0x95b   : > { %v3406_v52 = vpop.f32.mrf.mxu1  ;;  %v3452_v53 = vpop.f32.mrf.mxu0 }
 0x95d   : > { %v4863_v54 = vpop.f32.mrf.mxu1  ;;  %v4869_v55 = vpop.f32.mrf.mxu0 }
 0x95e   : > { %3471 = vmax.xlane.f32.xlu0 %v3470_v56 }
 0x963   : > { %1826 = vrot.lane.b32.xlu1 %v1820_v58, %s5752_s0  ;;  %s6838_s0 = sld [smem:[#allocation68_spill]] }
 0x967   : > { %1832 = vrot.lane.b32.xlu1 %v1820_v58, %s5751_s5  ;;  %s4281_s5 = sshll.u32 %s1088_s17, 4  ;;  %s6661_s5 = int_to_ptr.vmem [resolvable:$true] %s4281_s5 }
 0x974   : > { %1829 = vrot.lane.b32.xlu0 %v1820_v58, %s5753_s8  ;;  %s6841_s8 = sld [smem:[#allocation70_spill]] }
 0x9db   : > { %v3463_v59 = vpop.xlane.xlu0 %3462  ;;  %v3466_v60 = vpop.xlane.xlu1 %3465 }
 0x9dc   : > { %v3473_v61 = vsub.f32 %v3457_v34, %v3463_v59  ;;  %v3474_v62 = vsub.f32 %v3458_v35, %v3466_v60 }
 0x9de   : > { %v3477_v63 = vmul.f32 1.442695, %v3473_v61  ;;  %v3479_v1 = vmul.f32 1.442695, %v3474_v62 }
 0x9df   : > { %v1827_v2 = vpop.permute.xlu1 %1826 }
 0x9e0   : > { %5171 = vpow2.f32 %v3477_v63 }
 0x9e1   : > { %5173 = vpow2.f32 %v3479_v1 }
 0x9e3   : > { %v3469_v3 = vpop.xlane.xlu0 %3468  ;;  %v1833_v6 = vpop.permute.xlu1 %1832 }
 0x9e4   : > { %v3475_v4 = vsub.f32 %v3459_v46, %v3469_v3  ;;  %v1851_v8 = vcombine.low %v1827_v2, %v1833_v6  ;;  %v1852_v10 = vcombine.high %v1827_v2, %v1833_v6 }
 0x9e6   : > { %v3481_v5 = vmul.f32 1.442695, %v3475_v4  ;;  %v1859_v18 = vrot.slane %v1851_v8, %v6285_v42  ;;  %v1866_v22 = vrot.slane %v1852_v10, %v6285_v42 }
 0x9e7   : > { %v3472_v20 = vpop.xlane.xlu0 %3471 }
 0x9e8   : > { %5175 = vpow2.f32 %v3481_v5  ;;  %v3476_v7 = vsub.f32 %v3460_v51, %v3472_v20 }
 0x9ea   : > { %v3483_v11 = vmul.f32 1.442695, %v3476_v7 }
 0x9eb   : > { %v1830_v13 = vpop.permute.xlu0 %1829 }
 0x9ec   : > { %5177 = vpow2.f32 %v3483_v11  ;;  %v1835_v15 = vcombine.low %v1820_v58, %v1830_v13  ;;  %v1836_v16 = vcombine.high %v1820_v58, %v1830_v13 }
 0x9ed   : > { %v6542_v17 = vpop.eup %5171 }
 0x9ee   : > { %v6545_v21 = vpop.eup %5173  ;;  %v1843_v12 = vrot.slane %v1835_v15, %v6285_v42  ;;  %v1850_v14 = vrot.slane %v1836_v16, %v6285_v42  ;;  %v3485_v23 = vsel %vm2209_vm3, %v6542_v17, 0.0 }
 0x9ef   : > { %3486 = vadd.xlane.f32.xlu1 %v3485_v23  ;;  %v3488_v24 = vsel %vm2209_vm3, %v6545_v21, 0.0 }
 0x9f0   : > { %v1867_v25 = vcombine.low %v1843_v12, %v1859_v18  ;;  %v1868_v26 = vcombine.high %v1843_v12, %v1859_v18  ;;  %v1883_v27 = vcombine.low %v1850_v14, %v1866_v22  ;;  %v1884_v28 = vcombine.high %v1850_v14, %v1866_v22  ;;  %3489 = vadd.xlane.f32.xlu0 %v3488_v24 }
 0x9f2   : > { %v1875_v31 = vrot.slane %v1867_v25, %v6287_v48  ;;  %v1882_v32 = vrot.slane %v1868_v26, %v6287_v48  ;;  %v1891_v33 = vrot.slane %v1883_v27, %v6287_v48  ;;  %v1898_v29 = vrot.slane %v1884_v28, %v6287_v48 }
 0x9f4   : > { %v1903_v19 = vcombine.low %v1875_v31, %v1882_v32  ;;  %v4622_v34 = vcombine.high %v1875_v31, %v1882_v32  ;;  %v1919_v35 = vcombine.low %v1891_v33, %v1898_v29  ;;  %v4623_v9 = vcombine.high %v1891_v33, %v1898_v29 }
 0x9f5   : > { %v5176_v36 = vpop.eup %5175 }
 0x9f6   : > { %v1910_v37 = vrot.slane %v1903_v19, %v6285_v42  ;;  %v1918_v38 = vrot.slane %v4622_v34, %v6285_v42  ;;  %v1926_v39 = vrot.slane %v1919_v35, %v6285_v42  ;;  %v1934_v40 = vrot.slane %v4623_v9, %v6285_v42 }
 0x9f7   : > { %v3491_v41 = vsel %vm2209_vm3, %v5176_v36, 0.0 }
 0x9f8   : > { %v1935_v43 = vcombine.low %v1910_v37, %v1918_v38  ;;  %v1936_v44 = vcombine.high %v1910_v37, %v1918_v38  ;;  %v1951_v45 = vcombine.low %v1926_v39, %v1934_v40  ;;  %v1952_v46 = vcombine.high %v1926_v39, %v1934_v40  ;;  %3492 = vadd.xlane.f32.xlu0 %v3491_v41 }
 0x9f9   : > { %v5178_v47 = vpop.eup %5177 }
 0x9fa   : > { %v1943_v49 = vrot.slane %v1935_v43, %v6287_v48  ;;  %v1950_v50 = vrot.slane %v1936_v44, %v6287_v48  ;;  %v1959_v51 = vrot.slane %v1951_v45, %v6287_v48  ;;  %v1966_v52 = vrot.slane %v1952_v46, %v6287_v48 }
 0x9fb   : > { %v3494_v53 = vsel %vm2209_vm3, %v5178_v47, 0.0 }
 0x9fc   : > { %v1967_v54 = vcombine.low %v1943_v49, %v1959_v51  ;;  %v1968_v55 = vcombine.high %v1943_v49, %v1959_v51  ;;  %v1969_v56 = vcombine.low %v1950_v50, %v1966_v52  ;;  %v1970_v57 = vcombine.high %v1950_v50, %v1966_v52  ;;  %3495 = vadd.xlane.f32.xlu1 %v3494_v53 }
 0x9fe   : > { %v1971_v58 = vpack.c.bf16 %v1967_v54, %v1967_v54  ;;  %v1972_v59 = vpack.c.bf16 %v1968_v55, %v1968_v55  ;;  %v1973_v60 = vpack.c.bf16 %v1969_v56, %v1969_v56  ;;  %v1974_v61 = vpack.c.bf16 %v1970_v57, %v1970_v57 }
 0xa00   : > { %1975 = vst.msk [vmem:[#allocation5] sm:$0xf] %vm1320_vm2, %v1971_v58  ;;  %1976 = vst.msk [vmem:[#allocation5 + $0x4] sm:$0xf] %vm1320_vm2, %v1972_v59  ;;  %v5147_v58 = vld [vmem:[%s6835_s6 + $0x8] sm:$0xff]   ;;  %s6839_s6 = sld [smem:[#allocation67_spill]] }
 0xa01   : > { %1977 = vst.msk [vmem:[#allocation5 + $0x8] sm:$0xf] %vm1320_vm2, %v1973_v60  ;;  %1978 = vst.msk [vmem:[#allocation5 + $0xc] sm:$0xf] %vm1320_vm2, %v1974_v61 }
 0xa07   : > { %v3509_v62 = vld [vmem:[#allocation5] sm:$0xf]  ;;  %v3510_v63 = vld [vmem:[#allocation5 + $0x4] sm:$0xf] }
 0xa08   : > { %v3511_v1 = vld [vmem:[#allocation5 + $0x8] sm:$0xf]  ;;  %v3512_v2 = vld [vmem:[#allocation5 + $0xc] sm:$0xf] }
 0xa25   : > { %3513 = vxpose.xlu0.c.b16.start.end [1/1] (short) (narrow) %v3509_v62, 16 }
 0xa29   : > { %3575 = vxpose.xlu1.c.b16.start.end [1/1] (short) (narrow) %v3510_v63, 16  ;;  %3637 = vxpose.xlu0.c.b16.start.end [1/1] (short) (narrow) %v3511_v1, 16 }
 0xa2d   : > { %3699 = vxpose.xlu1.c.b16.start.end [1/1] (short) (narrow) %v3512_v2, 16 }
 0xa78   : > { %v3487_v3 = vpop.xlane.xlu1 %3486 }
 0xa79   : > { %5179 = vrcp.f32 %v3487_v3  ;;  %v3490_v4 = vpop.xlane.xlu0 %3489 }
 0xa7a   : > { %5181 = vrcp.f32 %v3490_v4  ;;  %v5148_v4 = vld [vmem:[%s6836_s23] sm:$0xff]  }
 0xa81   : > { %v3493_v5 = vpop.xlane.xlu0 %3492 }
 0xa82   : > { %5183 = vrcp.f32 %v3493_v5 }
 0xa85   : > { %v3496_v6 = vpop.xlane.xlu1 %3495 }
 0xa86   : > { %v5180_v20 = vpop.eup %5179  ;;  %5185 = vrcp.f32 %v3496_v6 }
 0xa87   : > { %v5182_v7 = vpop.eup %5181  ;;  %v3501_v8 = vmul.f32 %v5180_v20, %v6542_v17  ;;  %v3521_v22 = vpop.trf.xlu0 }
 0xa88   : > { %v3502_v10 = vmul.f32 %v5182_v7, %v6545_v21 }
 0xa89   : > { %v3505_v11 = vpack.c.bf16 %v3501_v8, %v3501_v8 }
 0xa8a   : > { %v3506_v13 = vpack.c.bf16 %v3502_v10, %v3502_v10 }
 0xa8b   : > { %v3533_v15 = vsel %vm2209_vm3, %v3505_v11, 0  ;;  %v3583_v14 = vpop.trf.xlu1  ;;  %v3645_v27 = vpop.trf.xlu0 }
 0xa8c   : > { %4871 = vmatpush3.bf16.xpose.msra.mxu1 %v3533_v15  ;;  %v3595_v16 = vsel %vm2209_vm3, %v3506_v13, 0 }
 0xa8d   : > { %4877 = vmatpush3.bf16.xpose.msra.mxu0 %v3595_v16  ;;  %4882 = vmatprep.subr.bf16.mxu1 %v5749_v0 }
 0xa8e   : > { %4888 = vmatprep.subr.bf16.mxu0 %v5749_v0 }
 0xa8f   : > { %v5184_v18 = vpop.eup %5183  ;;  %v3707_v28 = vpop.trf.xlu1 }
 0xa90   : > { %v3503_v12 = vmul.f32 %v5184_v18, %v5176_v36 }
 0xa92   : > { %v3507_v23 = vpack.c.bf16 %v3503_v12, %v3503_v12 }
 0xa93   : > { %v5186_v17 = vpop.eup %5185  ;;  %4873 = vmatmul.mubr.msk.bf16.vlgmr.msra.gmra.mxu1 %vm2209_vm3, %v3521_v22 }
 0xa94   : > { %4879 = vmatmul.mubr.msk.bf16.vlgmr.msra.gmra.mxu0 %vm2209_vm3, %v3583_v14  ;;  %v3657_v21 = vsel %vm2209_vm3, %v3507_v23, 0  ;;  %v3504_v24 = vmul.f32 %v5186_v17, %v5178_v47  ;;  %4884 = vmatprep.mubr.msk.bf16.mxu1 %vm5750_vm0, %v5749_v0 }
 0xa95   : > { %4883 = vmatpush3.bf16.xpose.msra.mxu1 %v3657_v21  ;;  %4890 = vmatprep.mubr.msk.bf16.mxu0 %vm5750_vm0, %v5749_v0 }
 0xa96   : > { %v3508_v25 = vpack.c.bf16 %v3504_v24, %v3504_v24  ;;  %4894 = vmatprep.subr.bf16.mxu1 %v5749_v0 }
 0xa98   : > { %v3719_v26 = vsel %vm2209_vm3, %v3508_v25, 0 }
 0xa99   : > { %4889 = vmatpush3.bf16.xpose.msra.mxu0 %v3719_v26 }
 0xa9a   : > { %4902 = vmatprep.subr.bf16.mxu0 %v5749_v0 }
 0xa9c   : > { %4885 = vmatmul.mubr.msk.bf16.vlgmr.msra.gmra.mxu1 %vm2209_vm3, %v3645_v27 }
 0xa9d   : > { %4898 = vmatprep.mubr.msk.bf16.mxu1 %vm5750_vm0, %v5749_v0  ;;  %4895 = vmatpush3.bf16.msra.mxu1 %v5147_v58 }
 0xa9e   : > { %4896 = vmatprep.subr.bf16.mxu1 %v5749_v0 }
 0xaa0   : > { %4891 = vmatmul.mubr.msk.bf16.vlgmr.msra.gmra.mxu0 %vm2209_vm3, %v3707_v28 }
 0xaa1   : > { %4906 = vmatprep.mubr.msk.bf16.mxu0 %vm5750_vm0, %v5749_v0  ;;  %4897 = vmatpush3.bf16.msra.mxu1 %v5148_v4 }
 0xaa2   : > { %4910 = vmatprep.subr.bf16.mxu1 %v5749_v0 }
 0xb53   : > { %v3569_v31 = vpop.f32.mrf.mxu1 }
 0xb54   : > { %v3631_v32 = vpop.f32.mrf.mxu0  ;;  %3761 = vxpose.xlu0.b32.start.end [1/1] (short) (narrow) %v3569_v31, 8 }
 0xb55   : > { %v4874_v33 = vpop.f32.mrf.mxu1  ;;  %3793 = vxpose.xlu1.b32.start.end [1/1] (short) (narrow) %v3631_v32, 8 }
 0xb56   : > { %v4880_v29 = vpop.f32.mrf.mxu0 }
 0xb57   : > { %v3572_v19 = vpop.f32.mrf.mxu1  ;;  %v5149_v29 = vld [vmem:[#allocation30 + $0x8] sm:$0xff]  }
 0xb58   : > { %v3634_v34 = vpop.f32.mrf.mxu0  ;;  %4903 = vmatpush3.bf16.msra.mxu0 %v5149_v29  ;;  %v5150_v19 = vld [vmem:[#allocation30] sm:$0xff]  }
 0xb59   : > { %v4875_v35 = vpop.f32.mrf.mxu1  ;;  %4904 = vmatprep.subr.bf16.mxu0 %v5749_v0  ;;  %v4660_v34 = vld [vmem:[%s6837_s29] ss:$0 sm:$0xff]  ;;  %s4675_s29 = sshll.u32 %s5721_s30, 7  ;;  %s4267_s30 = scalar_lea.sflag [#allocation8], %s6158_s20 }
 0xb5a   : > { %v4881_v9 = vpop.f32.mrf.mxu0 }
 0xb5c   : > { %v3693_v36 = vpop.f32.mrf.mxu1  ;;  %4905 = vmatpush3.bf16.msra.mxu0 %v5150_v19 }
 0xb5d   : > { %3825 = vxpose.xlu0.b32.start.end [1/1] (short) (narrow) %v3693_v36, 8 }
 0xb5e   : > { %v4886_v37 = vpop.f32.mrf.mxu1 }
 0xb60   : > { %v3696_v38 = vpop.f32.mrf.mxu1  ;;  %v3755_v39 = vpop.f32.mrf.mxu0 }
 0xb61   : > { %3857 = vxpose.xlu0.b32.start.end [1/1] (short) (narrow) %v3755_v39, 8 }
 0xb62   : > { %v4887_v40 = vpop.f32.mrf.mxu1  ;;  %v4892_v41 = vpop.f32.mrf.mxu0 }
 0xb63   : > { %v5151_v41 = vld [vmem:[%s6838_s0 + $0x18] sm:$0xff]  }
 0xb64   : > { %v3758_v43 = vpop.f32.mrf.mxu0 }
 0xb65   : > { %v5152_v43 = vld [vmem:[%s6838_s0 + $0x10] sm:$0xff]  }
 0xb66   : > { %v4893_v44 = vpop.f32.mrf.mxu0 }
 0xb67   : > { %v5154_v44 = vld [vmem:[%s6838_s0] sm:$0xff]  }
 0xbd0   : > { %v3777_v45 = vpop.trf.xlu0 }
 0xbd1   : > { %v3809_v47 = vpop.trf.xlu1 }
 0xbd9   : > { %v3841_v46 = vpop.trf.xlu0 }
 0xbda   : > { %v3889_v49 = vcombine.low %v3777_v45, %v3841_v46  ;;  %v3890_v50 = vcombine.high %v3777_v45, %v3841_v46  ;;  %v4664_v45 = vld [vmem:[%s6839_s6] ss:$0 sm:$0xff] }
 0xbdc   : > { %v3897_v54 = vrot.slane %v3889_v49, %v6285_v42  ;;  %v3904_v55 = vrot.slane %v3890_v50, %v6285_v42 }
 0xbdd   : > { %v3873_v51 = vpop.trf.xlu0 }
 0xbde   : > { %v3905_v52 = vcombine.low %v3809_v47, %v3873_v51  ;;  %v3906_v53 = vcombine.high %v3809_v47, %v3873_v51 }
 0xbe0   : > { %v3913_v56 = vrot.slane %v3905_v52, %v6285_v42  ;;  %v3920_v57 = vrot.slane %v3906_v53, %v6285_v42 }
 0xbe2   : > { %v3921_v59 = vcombine.low %v3897_v54, %v3913_v56  ;;  %v3922_v60 = vcombine.high %v3897_v54, %v3913_v56  ;;  %v3937_v61 = vcombine.low %v3904_v55, %v3920_v57  ;;  %v3938_v62 = vcombine.high %v3904_v55, %v3920_v57  ;;  %v4668_v57 = vld [vmem:[%s6840_s1] ss:$0 sm:$0xff] }
 0xbe4   : > { %v3929_v63 = vrot.slane %v3921_v59, %v6287_v48  ;;  %v3936_v1 = vrot.slane %v3922_v60, %v6287_v48  ;;  %v3945_v2 = vrot.slane %v3937_v61, %v6287_v48  ;;  %v3952_v3 = vrot.slane %v3938_v62, %v6287_v48 }
 0xbe6   : > { %v3957_v5 = vcombine.low %v3929_v63, %v3936_v1  ;;  %v4658_v6 = vcombine.high %v3929_v63, %v3936_v1  ;;  %v3973_v20 = vcombine.low %v3945_v2, %v3952_v3  ;;  %v4659_v7 = vcombine.high %v3945_v2, %v3952_v3 }
 0xbe8   : > { %v3964_v8 = vrot.slane %v3957_v5, %v6285_v42  ;;  %v3972_v10 = vrot.slane %v4658_v6, %v6285_v42  ;;  %v3980_v11 = vrot.slane %v3973_v20, %v6285_v42  ;;  %v3988_v13 = vrot.slane %v4659_v7, %v6285_v42 }
 0xbea   : > { %v3990_v15 = vcombine.high %v3964_v8, %v3972_v10  ;;  %v4006_v16 = vcombine.high %v3980_v11, %v3988_v13  ;;  %v3989_v18 = vcombine.low %v3964_v8, %v3972_v10  ;;  %v4005_v22 = vcombine.low %v3980_v11, %v3988_v13 }
 0xbec   : > { %v4004_v12 = vrot.slane %v3990_v15, %v6287_v48  ;;  %v4020_v14 = vrot.slane %v4006_v16, %v6287_v48  ;;  %v3997_v23 = vrot.slane %v3989_v18, %v6287_v48  ;;  %v4013_v17 = vrot.slane %v4005_v22, %v6287_v48 }
 0xbee   : > { %v4023_v21 = vcombine.low %v4004_v12, %v4020_v14  ;;  %v4022_v24 = vcombine.high %v3997_v23, %v4013_v17  ;;  %v4021_v25 = vcombine.low %v3997_v23, %v4013_v17  ;;  %v4024_v42 = vcombine.high %v4004_v12, %v4020_v14 }
 0xbf0   : > { %4030 = vrot.lane.b32.xlu0 %v4023_v21, %s5756_s10  ;;  %4026 = vrot.lane.b32.xlu1 %v4022_v24, %s5757_s22  ;;  %s6659_s10 = scalar_lea.hbm %s6841_s8, %s4675_s29  ;;  %s5613_s22 = scalar_lea.vmem %s6661_s5, 128 }
 0xbf1   : > { %p5614_p7 = scmp.ne.s32.totalorder %s6661_s5, %s5613_s22 }
 0xbf3   : > { %p5615_p5 = pnand %p5614_p7, %p6842_p3 }
 0xbf4   : > { %4034 = vrot.lane.b32.xlu1 %v4024_v42, %s5758_s27  ;;  %s5759_s27 = smov [#allocation32]  }
 0xbf5   : > { %p5616_p9 = pneg %p5615_p5  ;;  %s5617_s9 = sshll.u32 %s5759_s27, 4  ;;  %s5618_s9 = int_to_ptr.vmem [resolvable:$false] %s5617_s9 }
 0xbf6   : > { %s5619_s12 = scalar_lea.vmem %s5618_s9, 256  ;;  %p5620_p6 = scmp.lt.s32.totalorder %s6661_s5, %s5618_s9 }
 0xbf7   : > { %p5621_p12 = scmp.lt.s32.totalorder %s5619_s12, %s5613_s22 }
 0xbf9   : > { %p5622_p0 = por %p5621_p12, %p5620_p6 }
 0xbfb   : > { %p5623_p4 = pnand %p5622_p0, %p5616_p9 }
 0xc62   : > { %v4027_v26 = vpop.permute.xlu1 %4026  ;;  %v4031_v27 = vpop.permute.xlu0 %4030 }
 0xc63   : > { %v4037_v28 = vsel %vm2209_vm3, %v4021_v25, %v4027_v26 }
 0xc64   : > { %v4038_v32 = vsel %vm2977_vm5, %v4037_v28, %v4031_v27 }
 0xc66   : > { %v4035_v31 = vpop.permute.xlu1 %4034 }
 0xc67   : > { %v4039_v33 = vsel %vm2979_vm6, %v4038_v32, %v4035_v31 }
 0xc68   : > { %v4040_v48 = vpack.c.bf16 %v4039_v33, %v4039_v33 }
 0xc6a   : > { %4899 = vmatmul.mubr.msk.bf16.vlgmr.msra.gmra.mxu1 %vm1126_vm1, %v4040_v48 }
 0xc6b   : > { %4918 = vmatprep.mubr.msk.bf16.mxu1 %vm5750_vm0, %v5749_v0  ;;  %4911 = vmatpush3.bf16.msra.mxu1 %v5151_v41 }
 0xc6c   : > { %4912 = vmatprep.subr.bf16.mxu1 %v5749_v0 }
 0xc6f   : > { %4913 = vmatpush3.bf16.msra.mxu1 %v5152_v43 }
 0xc70   : > { %4914 = vmatprep.subr.bf16.mxu1 %v5749_v0 }
 0xd2a   : > { %v4101_v35 = vpop.f32.mrf.mxu1 }
 0xd2b   : > { %v4102_v9 = vadd.f32 %v4660_v34, %v4101_v35 }
 0xd2c   : > { %v4900_v36 = vpop.f32.mrf.mxu1 }
 0xd2d   : > { %v4107_v37 = vadd.f32 %v4102_v9, %v6477_v30  ;;  %v5153_v30 = vld [vmem:[%s6838_s0 + $0x8] sm:$0xff]  }
 0xd2e   : > { %v4104_v38 = vpop.f32.mrf.mxu1  ;;  %4915 = vmatpush3.bf16.msra.mxu1 %v5153_v30 }
 0xd2f   : > { %v4108_v39 = vpack.c.bf16 %v4107_v37, %v4107_v37  ;;  %4916 = vmatprep.subr.bf16.mxu1 %v5749_v0 }
 0xd30   : > { %v4901_v40 = vpop.f32.mrf.mxu1 }
 0xd31   : > { %4907 = vmatmul.mubr.msk.bf16.vlgmr.msra.gmra.mxu0 %vm1126_vm1, %v4108_v39 }
 0xd32   : > { %4917 = vmatpush3.bf16.msra.mxu1 %v5154_v44 }
 0xdf1   : > { %v4169_v46 = vpop.f32.mrf.mxu0 }
 0xdf2   : > { %v4170_v47 = vadd.f32 %v4664_v45, %v4169_v46 }
 0xdf3   : > { %v4908_v49 = vpop.f32.mrf.mxu0 }
 0xdf4   : > { %v4176_v50 = vmul.f32 0.70710677, %v4170_v47  ;;  %v4175_v0 = vmul.f32 0.5, %v4170_v47 }
 0xdf5   : > { %v4172_v51 = vpop.f32.mrf.mxu0 }
 0xdf6   : > { %5187 = verf.f32 %v4176_v50 }
 0xdf7   : > { %v4909_v52 = vpop.f32.mrf.mxu0 }
 0xe03   : > { %v5188_v53 = vpop.eup %5187 }
 0xe04   : > { %v4178_v54 = vadd.f32 1.0, %v5188_v53 }
 0xe06   : > { %v4179_v55 = vmul.f32 %v4178_v54, %v4175_v0 }
 0xe08   : > { %v4180_v56 = vpack.c.bf16 %v4179_v55, %v4179_v55 }
 0xe0a   : > { %4919 = vmatmul.mubr.msk.bf16.vlgmr.msra.gmra.mxu1 %vm4220_vm8, %v4180_v56 }
 0xeca   : > { %v4258_v58 = vpop.f32.mrf.mxu1 }
 0xecb   : > { %v4259_v59 = vadd.f32 %v4668_v57, %v4258_v58 }
 0xecc   : > { %v4920_v60 = vpop.f32.mrf.mxu1 }
 0xecd   : > { %v4264_v61 = vadd.f32 %v4259_v59, %v4107_v37 }
 0xece   : > { %v4261_v62 = vpop.f32.mrf.mxu1 }
 0xecf   : > { %4265 = vst.msk [vmem:[%s1088_s17] sm:$0xff] %vm1126_vm1, %v4264_v61 }
 0xed0   : > { %v4921_v63 = vpop.f32.mrf.mxu1 }
 0xed1   : > { %5626 = shalt.err (!%p5623_p4)
}
 0xed2   : > { %s5627_s6 = scalar_lea.hbm %s6659_s10, 128  ;;  %s5631_s19 = scalar_lea.hbm %s6841_s8, 256 }
 0xed3   : > { %p5628_p2 = scmp.ne.s32.totalorder %s6659_s10, %s5627_s6  ;;  %p5632_p8 = scmp.lt.s32.totalorder %s6659_s10, %s6841_s8 }
 0xed4   : > { %p5633_p10 = scmp.lt.s32.totalorder %s5631_s19, %s5627_s6 }
 0xed5   : > { %p5629_p13 = pnand %p5628_p2, %p6842_p3 }
 0xed6   : > { %p5634_p11 = por %p5633_p10, %p5632_p8 }
 0xed7   : > { %p5630_p1 = pneg %p5629_p13 }
 0xed9   : > { %p5635_p7 = pnand %p5634_p11, %p5630_p1 }
 0xedb   : > { %5638 = shalt.err (!%p5635_p7)
}
 0xedc   : > { %4978 = dma.vmem_to_hbm [thread:$0]  (%p6842_p3), %s6661_s5, 128, %s6659_s10, %s4267_s30  }
 0xedd PF: > { %s6843_s29 = sld [smem:[#allocation44_spill]]  ;;  %p6846_p9 = scmp.ge.s32.totalorder %s5729_s3, 2 }
 0xede   : > { %s6844_s17 = sld [smem:[#allocation48_spill]] }
 0xee3   : > { %s4293_s13 = sand.u32 1, %s6843_s29  }
 0xee4   : > { %p6845_p5 = scmp.ne.s32.totalorder %s6844_s17, 0  ;;  %s4294_s15 = scalar_lea.sflag [#allocation8], %s4293_s13 }
 0xee6   : > { %p5031_p6 = pnand %p6846_p9, %p6845_p5 }
 0xee8   : > { %p5032_p12 = pneg %p5031_p6 }
 0xeea   : > { %5704 = dma.done.wait (%p5032_p12), %s4294_s15, 128  }
 0xeeb   : > { %5706 = vsyncadd (%p5032_p12), %s4294_s15, 4294967168  ;;  %s53_s3 = sadd.s32 1, %s5729_s3   ;;  %s6847_s4 = sld [smem:[#allocation45_spill]] }
 0xeec   : > { %p50_p0 = scmp.ge.s32.totalorder %s53_s3, 4   ;;  %s6848_s6 = sld [smem:[#allocation47_spill]] }
 0xeed   : > { %s6849_s5 = sld [smem:[#allocation46_spill]]  ;;  %s6850_s29 = smov %s5713_s2 }
 0xeee   : > { %s6852_s30 = smov %s5725_s7 }
 0xeef   :  { %52 = sbr.rel (!%p50_p0) target bundleno = 39 (0x27), region = 257 }
 0xef1   : > { %s6851_s2 = smov %s6847_s4 }
 0xef3   : > { %s6853_s7 = smov %s6849_s5 }
 0xef4   :  { %4299 = vsyncpa [#allocation7], 1 }
 0xef5   :  { %4301 = vsyncpa [#allocation7 + $0x1], 1 }
 0xef6   :  { %4302 = vsyncpa [#allocation10], 1 }
 0xef7   :  { %4304 = vsyncpa [#allocation10 + $0x1], 1 }
 0xef8   :  { %4305 = vsyncpa [#allocation13], 1 }
 0xef9   :  { %4307 = vsyncpa [#allocation13 + $0x1], 1 }
 0xefa   :  { %4308 = vsyncpa [#allocation16], 1 }
 0xefb   :  { %4309 = vsyncpa [#allocation19], 1 }
 0xefc   :  { %4310 = vsyncpa [#allocation22], 1 }
 0xefd   :  { %4311 = vsyncpa [#allocation25], 1 }
 0xefe   :  { %4312 = vsyncpa [#allocation28], 1 }
 0xeff   :  { %4313 = vsyncpa [#allocation31], 1 }
 0xf00   :  { %4314 = vsyncpa [#allocation8], 1 }
 0xf01   :  { %4316 = vsyncpa [#allocation8 + $0x1], 1 }

</bundles_post_ra>
